<compile_context>
chip_gen: v5e
topology: v5e:2x2
jax: 0.10.0
libtpu: 0.0.40
codegen_flags: <defaults>
</compile_context>

<pallas_src>
import functools

import jax
import jax.numpy as jnp
from jax.experimental import pallas as pl
from jax.experimental.pallas import tpu as pltpu

FLAG_LEAKY = True
FLAG_SIGMOID = False            # WGAN-div critic -> raw score
LEAK = 0.2
DOT_DTYPE = jnp.bfloat16        # cast at the MXU dot boundary only


def _act(h):
    if FLAG_LEAKY:
        return jnp.where(h > 0, h, LEAK * h)
    return jnp.maximum(h, 0.0)


def _round_up(n, m):
    return ((n + m - 1) // m) * m


def discriminator_kernel(x_ref, w_ref, p_ref, out_ref,
                         patch_ref, h1_ref, cols_ref, *, r1, r2):
    # layout: activations are (H, W, N, C) so the 3x3 halo / im2col slicing only
    # touches untiled axes; (N, C) sit on the (sublane, lane) axes.
    H, W, N, nc = x_ref.shape
    ndf = w_ref.shape[1]
    HWN = H * W * N
    k1 = 9 * (ndf + 1)            # 3x3-conv contraction length (im2col)
    k2 = H * W * ndf              # 4x4-conv contraction length

    # ---- from_rgb: 1x1 conv (nc -> ndf) on the VPU, bias folded into the init ----
    h = jnp.broadcast_to(p_ref[0:1, :].reshape(1, 1, 1, ndf), (H, W, N, ndf))
    for c in range(nc):           # nc=3 broadcast FMAs; MXU would be ~2% K-utilized
        h = h + x_ref[:, :, :, c:c + 1] * w_ref[c:c + 1, :].reshape(1, 1, 1, ndf)
    h = _act(h)                                               # (H, W, N, ndf), f32

    # ---- minibatch_std_concat_layer ('all'): biased std over batch (axis=2), then
    #      mean over channels only -> per-(H,W) map (matches pggan-pytorch 'all') ----
    mu = jnp.mean(h, axis=2, keepdims=True)
    std = jnp.sqrt(jnp.mean((h - mu) ** 2, axis=2, keepdims=True) + 1e-8)
    std_map = jnp.mean(std, axis=3, keepdims=True)            # (H, W, 1, 1)
    std_b = jnp.broadcast_to(std_map, (H, W, N, 1))           # built once (hoisted)

    # ---- 3x3 conv, pad=1: ONE MXU matmul over K = 9*(ndf+1).
    #      im2col (zero halo included) is staged once in VMEM: columns [t*ndf,(t+1)*ndf)
    #      hold the h-channels of tap t, columns [9*ndf + t] hold its std channel. ----
    patch_ref[...] = jnp.zeros_like(patch_ref)
    for dy in range(3):
        for dx in range(3):
            t = dy * 3 + dx
            oy0, oy1 = max(0, 1 - dy), H - max(0, dy - 1)     # valid output rows
            ox0, ox1 = max(0, 1 - dx), W - max(0, dx - 1)
            iy0, iy1 = max(0, dy - 1), H - max(0, 1 - dy)     # matching input rows
            ix0, ix1 = max(0, dx - 1), W - max(0, 1 - dx)
            patch_ref[oy0:oy1, ox0:ox1, :, t * ndf:(t + 1) * ndf] = h[iy0:iy1, ix0:ix1]
            patch_ref[oy0:oy1, ox0:ox1, :, 9 * ndf + t:9 * ndf + t + 1] = (
                std_b[iy0:iy1, ix0:ix1])
    patches = patch_ref[...].reshape(HWN, k1)                 # rows ordered (y, x, n)
    h1 = jnp.dot(patches.astype(DOT_DTYPE),
                 w_ref[r1:r1 + k1, :].astype(DOT_DTYPE),
                 preferred_element_type=jnp.float32) + p_ref[1:2, :]
    h1 = _act(h1)                                             # (HWN, ndf), f32

    # ---- 4x4 conv on the 4x4 map (VALID -> 1x1): ONE MXU matmul over K = 512.
    #      Relayout (y,x,n,c) -> (n, y*x*c) through tiny VMEM staging buffers. ----
    h1_ref[...] = h1
    for p in range(H * W):
        cols_ref[:, p * ndf:(p + 1) * ndf] = h1_ref[p * N:(p + 1) * N, :]
    h2 = jnp.dot(cols_ref[...].astype(DOT_DTYPE),
                 w_ref[r2:r2 + k2, :].astype(DOT_DTYPE),
                 preferred_element_type=jnp.float32) + p_ref[2:3, :]
    h2 = _act(h2)                                             # (N, ndf)

    # ---- Flatten + Linear(ndf -> 1): K=32 -> VPU multiply + lane reduction ----
    # (N=4 -> lane-dense output layout is irrelevant here; keep the module's (N,1).)
    out = jnp.sum(h2 * p_ref[3:4, :], axis=1, keepdims=True) + p_ref[4:5, 0:1]
    if FLAG_SIGMOID:
        out = jax.nn.sigmoid(out)
    out_ref[...] = out


def pack_params(params):
    """Pack the 9 tiny parameter tensors into 2 VMEM inputs (fewer DMAs)."""
    nc, ndf = params["w_rgb"].shape
    k1 = 9 * (ndf + 1)
    k2 = params["w2"].shape[0] * ndf
    r1 = _round_up(nc, 8)                     # start row of the 3x3-conv weight
    r2 = r1 + _round_up(k1, 8)                # start row of the 4x4-conv weight
    # 3x3 conv weight, reordered to match the im2col column layout above.
    w1p = jnp.concatenate(
        [params["w1"][:, :ndf, :].reshape(9 * ndf, ndf),   # h-channel taps
         params["w1"][:, ndf, :]],                         # std-channel taps
        axis=0)                                            # (9*(ndf+1), ndf)
    w2p = params["w2"].reshape(k2, ndf)                    # (H*W*ndf, ndf)
    w_big = jnp.zeros((r2 + k2, ndf), jnp.float32)
    w_big = w_big.at[:nc].set(params["w_rgb"])
    w_big = w_big.at[r1:r1 + k1].set(w1p)
    w_big = w_big.at[r2:r2 + k2].set(w2p)
    p_small = jnp.zeros((8, ndf), jnp.float32)
    p_small = p_small.at[0].set(params["b_rgb"])
    p_small = p_small.at[1].set(params["b1"])
    p_small = p_small.at[2].set(params["b2"])
    p_small = p_small.at[3].set(params["w_fc"][:, 0])
    p_small = p_small.at[4, 0].set(params["b_fc"][0])
    return w_big, p_small, r1, r2


def discriminator_forward(x_nchw, params):
    N, nc, H, W = x_nchw.shape
    ndf = params["w_rgb"].shape[1]
    assert (H, W) == (4, 4), "initial PGGAN discriminator operates on 4x4 inputs"
    # NCHW (PyTorch) -> (H, W, N, C) for the kernel.
    x = jnp.transpose(x_nchw, (2, 3, 0, 1)).astype(jnp.float32)
    w_big, p_small, r1, r2 = pack_params(params)
    kernel = functools.partial(discriminator_kernel, r1=r1, r2=r2)
    vmem = pl.BlockSpec(memory_space=pltpu.MemorySpace.VMEM)
    return pl.pallas_call(
        kernel,
        out_shape=jax.ShapeDtypeStruct((N, 1), jnp.float32),
        in_specs=[vmem, vmem, vmem],
        out_specs=vmem,
        scratch_shapes=[
            pltpu.VMEM((H, W, N, 9 * (ndf + 1)), jnp.float32),  # im2col staging
            pltpu.VMEM((H * W * N, ndf), jnp.float32),          # conv1 output staging
            pltpu.VMEM((N, H * W * ndf), jnp.float32),          # conv2 operand staging
        ],
    )(x, w_big, p_small)


def init_params(key, nc=3, ndf=32):
    ks = jax.random.split(key, 8)

    def u(k, shape, fan_in):
        bound = 1.0 / jnp.sqrt(jnp.float32(fan_in))
        return jax.random.uniform(k, shape, jnp.float32, -bound, bound)

    return dict(
        w_rgb=u(ks[0], (nc, ndf), nc),                     # 1x1 conv (Cin, Cout)
        b_rgb=u(ks[1], (ndf,), nc),
        w1=u(ks[2], (9, ndf + 1, ndf), 9 * (ndf + 1)),     # 3x3 conv (kh*kw, Cin, Cout)
        b1=u(ks[3], (ndf,), 9 * (ndf + 1)),
        w2=u(ks[4], (16, ndf, ndf), 16 * ndf),             # 4x4 conv (kh*kw, Cin, Cout)
        b2=u(ks[5], (ndf,), 16 * ndf),
        w_fc=u(ks[6], (ndf, 1), ndf),
        b_fc=u(ks[7], (1,), ndf),
    )


def reference_forward(x_nchw, params):
    # Plain-JAX reference (mirrors the kernel's bf16-at-the-dot quantization).
    x = jnp.transpose(x_nchw, (0, 2, 3, 1)).astype(jnp.float32)   # NHWC
    N, H, W, nc = x.shape
    ndf = params["w_rgb"].shape[1]
    dn = ("NHWC", "HWIO", "NHWC")
    h = jnp.einsum("nhwc,cd->nhwd", x, params["w_rgb"],
                   precision=jax.lax.Precision.HIGHEST)
    h = _act(h + params["b_rgb"].reshape(1, 1, 1, ndf))
    mu = jnp.mean(h, axis=0, keepdims=True)
    std = jnp.sqrt(jnp.mean((h - mu) ** 2, axis=0, keepdims=True) + 1e-8)
    std_map = jnp.broadcast_to(jnp.mean(std, axis=-1, keepdims=True), (N, H, W, 1))
    hcat = jnp.concatenate([h, std_map], axis=-1)
    h1 = jax.lax.conv_general_dilated(
        hcat.astype(DOT_DTYPE),
        params["w1"].reshape(3, 3, ndf + 1, ndf).astype(DOT_DTYPE),
        (1, 1), ((1, 1), (1, 1)), dimension_numbers=dn,
        preferred_element_type=jnp.float32)
    h1 = _act(h1 + params["b1"].reshape(1, 1, 1, ndf))
    h2 = jax.lax.conv_general_dilated(
        h1.astype(DOT_DTYPE),
        params["w2"].reshape(4, 4, ndf, ndf).astype(DOT_DTYPE),
        (1, 1), "VALID", dimension_numbers=dn,
        preferred_element_type=jnp.float32)
    h2 = _act(h2 + params["b2"].reshape(1, 1, 1, ndf)).reshape(N, ndf)
    out = jnp.dot(h2, params["w_fc"],
                  precision=jax.lax.Precision.HIGHEST) + params["b_fc"]
    if FLAG_SIGMOID:
        out = jax.nn.sigmoid(out)
    return out


if __name__ == "__main__":
    key = jax.random.PRNGKey(0)
    kx, kp = jax.random.split(key)
    N, NC, NDF, RES = 4, 3, 32, 4   # initial PGGAN discriminator: 4x4 RGB inputs
    x = jax.random.normal(kx, (N, NC, RES, RES), jnp.float32)   # NCHW, PyTorch-style
    params = init_params(kp, nc=NC, ndf=NDF)

    out = jax.block_until_ready(discriminator_forward(x, params))
    ref = jax.block_until_ready(reference_forward(x, params))

    assert out.shape == (N, 1), out.shape
    assert jnp.allclose(out, ref, atol=1e-2, rtol=1e-2), (out, ref)
    print("KERNEL_OK")
</pallas_src>

<mosaic_0001>
module attributes {stable_mosaic.version = 11 : i64} {
  func.func @discriminator_kernel(%arg0: memref<4x4x4x3xf32, #tpu.memory_space<vmem>>, %arg1: memref<824x32xf32, #tpu.memory_space<vmem>>, %arg2: memref<8x32xf32, #tpu.memory_space<vmem>>, %arg3: memref<4x1xf32, #tpu.memory_space<vmem>>, %arg4: memref<4x4x4x297xf32, #tpu.memory_space<vmem>>, %arg5: memref<64x32xf32, #tpu.memory_space<vmem>>, %arg6: memref<4x512xf32, #tpu.memory_space<vmem>>) attributes {dimension_semantics = [], scalar_prefetch = 0 : i64, scratch_operands = 3 : i64, tpu.core_type = #tpu.core_type<tc>} {
    %c0 = arith.constant 0 : index
    %c0_0 = arith.constant 0 : index
    %0 = vector.load %arg2[%c0, %c0_0] : memref<8x32xf32, #tpu.memory_space<vmem>>, vector<1x32xf32>
    %1 = vector.shape_cast %0 : vector<1x32xf32> to vector<1x1x1x32xf32>
    %2 = vector.shape_cast %1 : vector<1x1x1x32xf32> to vector<1x1x1x32xf32>
    %3 = vector.broadcast %2 : vector<1x1x1x32xf32> to vector<4x4x4x32xf32>
    %c0_1 = arith.constant 0 : index
    %c0_2 = arith.constant 0 : index
    %c0_3 = arith.constant 0 : index
    %c0_4 = arith.constant 0 : index
    %4 = vector.load %arg0[%c0_1, %c0_2, %c0_3, %c0_4] : memref<4x4x4x3xf32, #tpu.memory_space<vmem>>, vector<4x4x4x1xf32>
    %c0_5 = arith.constant 0 : index
    %c0_6 = arith.constant 0 : index
    %5 = vector.load %arg1[%c0_5, %c0_6] : memref<824x32xf32, #tpu.memory_space<vmem>>, vector<1x32xf32>
    %6 = vector.shape_cast %5 : vector<1x32xf32> to vector<1x1x1x32xf32>
    %7 = vector.broadcast %4 : vector<4x4x4x1xf32> to vector<4x4x4x32xf32>
    %8 = vector.broadcast %6 : vector<1x1x1x32xf32> to vector<4x4x4x32xf32>
    %9 = arith.mulf %7, %8 : vector<4x4x4x32xf32>
    %10 = arith.addf %3, %9 : vector<4x4x4x32xf32>
    %c0_7 = arith.constant 0 : index
    %c0_8 = arith.constant 0 : index
    %c0_9 = arith.constant 0 : index
    %c1 = arith.constant 1 : index
    %11 = vector.load %arg0[%c0_7, %c0_8, %c0_9, %c1] : memref<4x4x4x3xf32, #tpu.memory_space<vmem>>, vector<4x4x4x1xf32>
    %c1_10 = arith.constant 1 : index
    %c0_11 = arith.constant 0 : index
    %12 = vector.load %arg1[%c1_10, %c0_11] : memref<824x32xf32, #tpu.memory_space<vmem>>, vector<1x32xf32>
    %13 = vector.shape_cast %12 : vector<1x32xf32> to vector<1x1x1x32xf32>
    %14 = vector.broadcast %11 : vector<4x4x4x1xf32> to vector<4x4x4x32xf32>
    %15 = vector.broadcast %13 : vector<1x1x1x32xf32> to vector<4x4x4x32xf32>
    %16 = arith.mulf %14, %15 : vector<4x4x4x32xf32>
    %17 = arith.addf %10, %16 : vector<4x4x4x32xf32>
    %c0_12 = arith.constant 0 : index
    %c0_13 = arith.constant 0 : index
    %c0_14 = arith.constant 0 : index
    %c2 = arith.constant 2 : index
    %18 = vector.load %arg0[%c0_12, %c0_13, %c0_14, %c2] : memref<4x4x4x3xf32, #tpu.memory_space<vmem>>, vector<4x4x4x1xf32>
    %c2_15 = arith.constant 2 : index
    %c0_16 = arith.constant 0 : index
    %19 = vector.load %arg1[%c2_15, %c0_16] : memref<824x32xf32, #tpu.memory_space<vmem>>, vector<1x32xf32>
    %20 = vector.shape_cast %19 : vector<1x32xf32> to vector<1x1x1x32xf32>
    %21 = vector.broadcast %18 : vector<4x4x4x1xf32> to vector<4x4x4x32xf32>
    %22 = vector.broadcast %20 : vector<1x1x1x32xf32> to vector<4x4x4x32xf32>
    %23 = arith.mulf %21, %22 : vector<4x4x4x32xf32>
    %24 = arith.addf %17, %23 : vector<4x4x4x32xf32>
    %cst = arith.constant 0.000000e+00 : f32
    %25 = vector.broadcast %cst : f32 to vector<4x4x4x32xf32>
    %26 = arith.cmpf ogt, %24, %25 : vector<4x4x4x32xf32>
    %cst_17 = arith.constant 2.000000e-01 : f32
    %27 = vector.broadcast %cst_17 : f32 to vector<4x4x4x32xf32>
    %28 = arith.mulf %27, %24 : vector<4x4x4x32xf32>
    %29 = arith.select %26, %24, %28 : vector<4x4x4x32xi1>, vector<4x4x4x32xf32>
    %cst_18 = arith.constant dense<0.000000e+00> : vector<4x4x32xf32>
    %30 = vector.multi_reduction <add>, %29, %cst_18 [2] : vector<4x4x4x32xf32> to vector<4x4x32xf32>
    %31 = vector.shape_cast %30 : vector<4x4x32xf32> to vector<4x4x1x32xf32>
    %cst_19 = arith.constant 4.000000e+00 : f32
    %32 = vector.broadcast %cst_19 : f32 to vector<4x4x1x32xf32>
    %33 = arith.divf %31, %32 : vector<4x4x1x32xf32>
    %34 = vector.broadcast %33 : vector<4x4x1x32xf32> to vector<4x4x4x32xf32>
    %35 = arith.subf %29, %34 : vector<4x4x4x32xf32>
    %36 = arith.mulf %35, %35 : vector<4x4x4x32xf32>
    %cst_20 = arith.constant dense<0.000000e+00> : vector<4x4x32xf32>
    %37 = vector.multi_reduction <add>, %36, %cst_20 [2] : vector<4x4x4x32xf32> to vector<4x4x32xf32>
    %38 = vector.shape_cast %37 : vector<4x4x32xf32> to vector<4x4x1x32xf32>
    %cst_21 = arith.constant 4.000000e+00 : f32
    %39 = vector.broadcast %cst_21 : f32 to vector<4x4x1x32xf32>
    %40 = arith.divf %38, %39 : vector<4x4x1x32xf32>
    %cst_22 = arith.constant 9.99999993E-9 : f32
    %41 = vector.broadcast %cst_22 : f32 to vector<4x4x1x32xf32>
    %42 = arith.addf %40, %41 : vector<4x4x1x32xf32>
    %43 = math.sqrt %42 : vector<4x4x1x32xf32>
    %cst_23 = arith.constant dense<0.000000e+00> : vector<4x4x1xf32>
    %44 = vector.multi_reduction <add>, %43, %cst_23 [3] : vector<4x4x1x32xf32> to vector<4x4x1xf32>
    %45 = vector.shape_cast %44 : vector<4x4x1xf32> to vector<4x4x1x1xf32>
    %cst_24 = arith.constant 3.200000e+01 : f32
    %46 = vector.broadcast %cst_24 : f32 to vector<4x4x1x1xf32>
    %47 = arith.divf %45, %46 : vector<4x4x1x1xf32>
    %48 = vector.shape_cast %47 : vector<4x4x1x1xf32> to vector<4x4x1x1xf32>
    %49 = vector.broadcast %48 : vector<4x4x1x1xf32> to vector<4x4x4x1xf32>
    %cst_25 = arith.constant 0.000000e+00 : f32
    %50 = vector.broadcast %cst_25 : f32 to vector<4x4x4x297xf32>
    %c0_26 = arith.constant 0 : index
    %c0_27 = arith.constant 0 : index
    %c0_28 = arith.constant 0 : index
    %c0_29 = arith.constant 0 : index
    %51 = vector.load %arg4[%c0_26, %c0_27, %c0_28, %c0_29] : memref<4x4x4x297xf32, #tpu.memory_space<vmem>>, vector<4x4x4x297xf32>
    tpu.vector_store %arg4[%c0_26, %c0_27, %c0_28, %c0_29], %50 {strides = array<i32>} : memref<4x4x4x297xf32, #tpu.memory_space<vmem>>, vector<4x4x4x297xf32>,
    %52 = vector.extract_strided_slice %29 {offsets = [0, 0, 0, 0], sizes = [3, 3, 4, 32], strides = [1, 1, 1, 1]} : vector<4x4x4x32xf32> to vector<3x3x4x32xf32>
    %c1_30 = arith.constant 1 : index
    %c1_31 = arith.constant 1 : index
    %c0_32 = arith.constant 0 : index
    %c0_33 = arith.constant 0 : index
    %53 = vector.load %arg4[%c1_30, %c1_31, %c0_32, %c0_33] : memref<4x4x4x297xf32, #tpu.memory_space<vmem>>, vector<3x3x4x32xf32>
    tpu.vector_store %arg4[%c1_30, %c1_31, %c0_32, %c0_33], %52 {strides = array<i32>} : memref<4x4x4x297xf32, #tpu.memory_space<vmem>>, vector<3x3x4x32xf32>,
    %54 = vector.extract_strided_slice %49 {offsets = [0, 0, 0, 0], sizes = [3, 3, 4, 1], strides = [1, 1, 1, 1]} : vector<4x4x4x1xf32> to vector<3x3x4x1xf32>
    %c1_34 = arith.constant 1 : index
    %c1_35 = arith.constant 1 : index
    %c0_36 = arith.constant 0 : index
    %c288 = arith.constant 288 : index
    %55 = vector.load %arg4[%c1_34, %c1_35, %c0_36, %c288] : memref<4x4x4x297xf32, #tpu.memory_space<vmem>>, vector<3x3x4x1xf32>
    tpu.vector_store %arg4[%c1_34, %c1_35, %c0_36, %c288], %54 {strides = array<i32>} : memref<4x4x4x297xf32, #tpu.memory_space<vmem>>, vector<3x3x4x1xf32>,
    %56 = vector.extract_strided_slice %29 {offsets = [0, 0, 0, 0], sizes = [3, 4, 4, 32], strides = [1, 1, 1, 1]} : vector<4x4x4x32xf32> to vector<3x4x4x32xf32>
    %c1_37 = arith.constant 1 : index
    %c0_38 = arith.constant 0 : index
    %c0_39 = arith.constant 0 : index
    %c32 = arith.constant 32 : index
    %57 = vector.load %arg4[%c1_37, %c0_38, %c0_39, %c32] : memref<4x4x4x297xf32, #tpu.memory_space<vmem>>, vector<3x4x4x32xf32>
    tpu.vector_store %arg4[%c1_37, %c0_38, %c0_39, %c32], %56 {strides = array<i32>} : memref<4x4x4x297xf32, #tpu.memory_space<vmem>>, vector<3x4x4x32xf32>,
    %58 = vector.extract_strided_slice %49 {offsets = [0, 0, 0, 0], sizes = [3, 4, 4, 1], strides = [1, 1, 1, 1]} : vector<4x4x4x1xf32> to vector<3x4x4x1xf32>
    %c1_40 = arith.constant 1 : index
    %c0_41 = arith.constant 0 : index
    %c0_42 = arith.constant 0 : index
    %c289 = arith.constant 289 : index
    %59 = vector.load %arg4[%c1_40, %c0_41, %c0_42, %c289] : memref<4x4x4x297xf32, #tpu.memory_space<vmem>>, vector<3x4x4x1xf32>
    tpu.vector_store %arg4[%c1_40, %c0_41, %c0_42, %c289], %58 {strides = array<i32>} : memref<4x4x4x297xf32, #tpu.memory_space<vmem>>, vector<3x4x4x1xf32>,
    %60 = vector.extract_strided_slice %29 {offsets = [0, 1, 0, 0], sizes = [3, 3, 4, 32], strides = [1, 1, 1, 1]} : vector<4x4x4x32xf32> to vector<3x3x4x32xf32>
    %c1_43 = arith.constant 1 : index
    %c0_44 = arith.constant 0 : index
    %c0_45 = arith.constant 0 : index
    %c64 = arith.constant 64 : index
    %61 = vector.load %arg4[%c1_43, %c0_44, %c0_45, %c64] : memref<4x4x4x297xf32, #tpu.memory_space<vmem>>, vector<3x3x4x32xf32>
    tpu.vector_store %arg4[%c1_43, %c0_44, %c0_45, %c64], %60 {strides = array<i32>} : memref<4x4x4x297xf32, #tpu.memory_space<vmem>>, vector<3x3x4x32xf32>,
    %62 = vector.extract_strided_slice %49 {offsets = [0, 1, 0, 0], sizes = [3, 3, 4, 1], strides = [1, 1, 1, 1]} : vector<4x4x4x1xf32> to vector<3x3x4x1xf32>
    %c1_46 = arith.constant 1 : index
    %c0_47 = arith.constant 0 : index
    %c0_48 = arith.constant 0 : index
    %c290 = arith.constant 290 : index
    %63 = vector.load %arg4[%c1_46, %c0_47, %c0_48, %c290] : memref<4x4x4x297xf32, #tpu.memory_space<vmem>>, vector<3x3x4x1xf32>
    tpu.vector_store %arg4[%c1_46, %c0_47, %c0_48, %c290], %62 {strides = array<i32>} : memref<4x4x4x297xf32, #tpu.memory_space<vmem>>, vector<3x3x4x1xf32>,
    %64 = vector.extract_strided_slice %29 {offsets = [0, 0, 0, 0], sizes = [4, 3, 4, 32], strides = [1, 1, 1, 1]} : vector<4x4x4x32xf32> to vector<4x3x4x32xf32>
    %c0_49 = arith.constant 0 : index
    %c1_50 = arith.constant 1 : index
    %c0_51 = arith.constant 0 : index
    %c96 = arith.constant 96 : index
    %65 = vector.load %arg4[%c0_49, %c1_50, %c0_51, %c96] : memref<4x4x4x297xf32, #tpu.memory_space<vmem>>, vector<4x3x4x32xf32>
    tpu.vector_store %arg4[%c0_49, %c1_50, %c0_51, %c96], %64 {strides = array<i32>} : memref<4x4x4x297xf32, #tpu.memory_space<vmem>>, vector<4x3x4x32xf32>,
    %66 = vector.extract_strided_slice %49 {offsets = [0, 0, 0, 0], sizes = [4, 3, 4, 1], strides = [1, 1, 1, 1]} : vector<4x4x4x1xf32> to vector<4x3x4x1xf32>
    %c0_52 = arith.constant 0 : index
    %c1_53 = arith.constant 1 : index
    %c0_54 = arith.constant 0 : index
    %c291 = arith.constant 291 : index
    %67 = vector.load %arg4[%c0_52, %c1_53, %c0_54, %c291] : memref<4x4x4x297xf32, #tpu.memory_space<vmem>>, vector<4x3x4x1xf32>
    tpu.vector_store %arg4[%c0_52, %c1_53, %c0_54, %c291], %66 {strides = array<i32>} : memref<4x4x4x297xf32, #tpu.memory_space<vmem>>, vector<4x3x4x1xf32>,
    %c0_55 = arith.constant 0 : index
    %c0_56 = arith.constant 0 : index
    %c0_57 = arith.constant 0 : index
    %c128 = arith.constant 128 : index
    %68 = vector.load %arg4[%c0_55, %c0_56, %c0_57, %c128] : memref<4x4x4x297xf32, #tpu.memory_space<vmem>>, vector<4x4x4x32xf32>
    tpu.vector_store %arg4[%c0_55, %c0_56, %c0_57, %c128], %29 {strides = array<i32>} : memref<4x4x4x297xf32, #tpu.memory_space<vmem>>, vector<4x4x4x32xf32>,
    %c0_58 = arith.constant 0 : index
    %c0_59 = arith.constant 0 : index
    %c0_60 = arith.constant 0 : index
    %c292 = arith.constant 292 : index
    %69 = vector.load %arg4[%c0_58, %c0_59, %c0_60, %c292] : memref<4x4x4x297xf32, #tpu.memory_space<vmem>>, vector<4x4x4x1xf32>
    tpu.vector_store %arg4[%c0_58, %c0_59, %c0_60, %c292], %49 {strides = array<i32>} : memref<4x4x4x297xf32, #tpu.memory_space<vmem>>, vector<4x4x4x1xf32>,
    %70 = vector.extract_strided_slice %29 {offsets = [0, 1, 0, 0], sizes = [4, 3, 4, 32], strides = [1, 1, 1, 1]} : vector<4x4x4x32xf32> to vector<4x3x4x32xf32>
    %c0_61 = arith.constant 0 : index
    %c0_62 = arith.constant 0 : index
    %c0_63 = arith.constant 0 : index
    %c160 = arith.constant 160 : index
    %71 = vector.load %arg4[%c0_61, %c0_62, %c0_63, %c160] : memref<4x4x4x297xf32, #tpu.memory_space<vmem>>, vector<4x3x4x32xf32>
    tpu.vector_store %arg4[%c0_61, %c0_62, %c0_63, %c160], %70 {strides = array<i32>} : memref<4x4x4x297xf32, #tpu.memory_space<vmem>>, vector<4x3x4x32xf32>,
    %72 = vector.extract_strided_slice %49 {offsets = [0, 1, 0, 0], sizes = [4, 3, 4, 1], strides = [1, 1, 1, 1]} : vector<4x4x4x1xf32> to vector<4x3x4x1xf32>
    %c0_64 = arith.constant 0 : index
    %c0_65 = arith.constant 0 : index
    %c0_66 = arith.constant 0 : index
    %c293 = arith.constant 293 : index
    %73 = vector.load %arg4[%c0_64, %c0_65, %c0_66, %c293] : memref<4x4x4x297xf32, #tpu.memory_space<vmem>>, vector<4x3x4x1xf32>
    tpu.vector_store %arg4[%c0_64, %c0_65, %c0_66, %c293], %72 {strides = array<i32>} : memref<4x4x4x297xf32, #tpu.memory_space<vmem>>, vector<4x3x4x1xf32>,
    %74 = vector.extract_strided_slice %29 {offsets = [1, 0, 0, 0], sizes = [3, 3, 4, 32], strides = [1, 1, 1, 1]} : vector<4x4x4x32xf32> to vector<3x3x4x32xf32>
    %c0_67 = arith.constant 0 : index
    %c1_68 = arith.constant 1 : index
    %c0_69 = arith.constant 0 : index
    %c192 = arith.constant 192 : index
    %75 = vector.load %arg4[%c0_67, %c1_68, %c0_69, %c192] : memref<4x4x4x297xf32, #tpu.memory_space<vmem>>, vector<3x3x4x32xf32>
    tpu.vector_store %arg4[%c0_67, %c1_68, %c0_69, %c192], %74 {strides = array<i32>} : memref<4x4x4x297xf32, #tpu.memory_space<vmem>>, vector<3x3x4x32xf32>,
    %76 = vector.extract_strided_slice %49 {offsets = [1, 0, 0, 0], sizes = [3, 3, 4, 1], strides = [1, 1, 1, 1]} : vector<4x4x4x1xf32> to vector<3x3x4x1xf32>
    %c0_70 = arith.constant 0 : index
    %c1_71 = arith.constant 1 : index
    %c0_72 = arith.constant 0 : index
    %c294 = arith.constant 294 : index
    %77 = vector.load %arg4[%c0_70, %c1_71, %c0_72, %c294] : memref<4x4x4x297xf32, #tpu.memory_space<vmem>>, vector<3x3x4x1xf32>
    tpu.vector_store %arg4[%c0_70, %c1_71, %c0_72, %c294], %76 {strides = array<i32>} : memref<4x4x4x297xf32, #tpu.memory_space<vmem>>, vector<3x3x4x1xf32>,
    %78 = vector.extract_strided_slice %29 {offsets = [1, 0, 0, 0], sizes = [3, 4, 4, 32], strides = [1, 1, 1, 1]} : vector<4x4x4x32xf32> to vector<3x4x4x32xf32>
    %c0_73 = arith.constant 0 : index
    %c0_74 = arith.constant 0 : index
    %c0_75 = arith.constant 0 : index
    %c224 = arith.constant 224 : index
    %79 = vector.load %arg4[%c0_73, %c0_74, %c0_75, %c224] : memref<4x4x4x297xf32, #tpu.memory_space<vmem>>, vector<3x4x4x32xf32>
    tpu.vector_store %arg4[%c0_73, %c0_74, %c0_75, %c224], %78 {strides = array<i32>} : memref<4x4x4x297xf32, #tpu.memory_space<vmem>>, vector<3x4x4x32xf32>,
    %80 = vector.extract_strided_slice %49 {offsets = [1, 0, 0, 0], sizes = [3, 4, 4, 1], strides = [1, 1, 1, 1]} : vector<4x4x4x1xf32> to vector<3x4x4x1xf32>
    %c0_76 = arith.constant 0 : index
    %c0_77 = arith.constant 0 : index
    %c0_78 = arith.constant 0 : index
    %c295 = arith.constant 295 : index
    %81 = vector.load %arg4[%c0_76, %c0_77, %c0_78, %c295] : memref<4x4x4x297xf32, #tpu.memory_space<vmem>>, vector<3x4x4x1xf32>
    tpu.vector_store %arg4[%c0_76, %c0_77, %c0_78, %c295], %80 {strides = array<i32>} : memref<4x4x4x297xf32, #tpu.memory_space<vmem>>, vector<3x4x4x1xf32>,
    %82 = vector.extract_strided_slice %29 {offsets = [1, 1, 0, 0], sizes = [3, 3, 4, 32], strides = [1, 1, 1, 1]} : vector<4x4x4x32xf32> to vector<3x3x4x32xf32>
    %c0_79 = arith.constant 0 : index
    %c0_80 = arith.constant 0 : index
    %c0_81 = arith.constant 0 : index
    %c256 = arith.constant 256 : index
    %83 = vector.load %arg4[%c0_79, %c0_80, %c0_81, %c256] : memref<4x4x4x297xf32, #tpu.memory_space<vmem>>, vector<3x3x4x32xf32>
    tpu.vector_store %arg4[%c0_79, %c0_80, %c0_81, %c256], %82 {strides = array<i32>} : memref<4x4x4x297xf32, #tpu.memory_space<vmem>>, vector<3x3x4x32xf32>,
    %84 = vector.extract_strided_slice %49 {offsets = [1, 1, 0, 0], sizes = [3, 3, 4, 1], strides = [1, 1, 1, 1]} : vector<4x4x4x1xf32> to vector<3x3x4x1xf32>
    %c0_82 = arith.constant 0 : index
    %c0_83 = arith.constant 0 : index
    %c0_84 = arith.constant 0 : index
    %c296 = arith.constant 296 : index
    %85 = vector.load %arg4[%c0_82, %c0_83, %c0_84, %c296] : memref<4x4x4x297xf32, #tpu.memory_space<vmem>>, vector<3x3x4x1xf32>
    tpu.vector_store %arg4[%c0_82, %c0_83, %c0_84, %c296], %84 {strides = array<i32>} : memref<4x4x4x297xf32, #tpu.memory_space<vmem>>, vector<3x3x4x1xf32>,
    %c0_85 = arith.constant 0 : index
    %c0_86 = arith.constant 0 : index
    %c0_87 = arith.constant 0 : index
    %c0_88 = arith.constant 0 : index
    %86 = vector.load %arg4[%c0_85, %c0_86, %c0_87, %c0_88] : memref<4x4x4x297xf32, #tpu.memory_space<vmem>>, vector<4x4x4x297xf32>
    %87 = vector.shape_cast %86 : vector<4x4x4x297xf32> to vector<64x297xf32>
    %88 = arith.truncf %87 : vector<64x297xf32> to vector<64x297xbf16>
    %c8 = arith.constant 8 : index
    %c0_89 = arith.constant 0 : index
    %89 = vector.load %arg1[%c8, %c0_89] : memref<824x32xf32, #tpu.memory_space<vmem>>, vector<297x32xf32>
    %90 = arith.truncf %89 : vector<297x32xf32> to vector<297x32xbf16>
    %cst_90 = arith.constant dense<0.000000e+00> : vector<64x32xf32>
    %91 = tpu.matmul %88, %90, %cst_90 {dimension_numbers = #tpu.dot_dimension_numbers<[1], [0], [0], [1], [0, 0, 1, 1], [], []>} : vector<64x297xbf16>, vector<297x32xbf16>, vector<64x32xf32> -> vector<64x32xf32>
    %c1_91 = arith.constant 1 : index
    %c0_92 = arith.constant 0 : index
    %92 = vector.load %arg2[%c1_91, %c0_92] : memref<8x32xf32, #tpu.memory_space<vmem>>, vector<1x32xf32>
    %93 = vector.broadcast %92 : vector<1x32xf32> to vector<64x32xf32>
    %94 = arith.addf %91, %93 : vector<64x32xf32>
    %cst_93 = arith.constant 0.000000e+00 : f32
    %95 = vector.broadcast %cst_93 : f32 to vector<64x32xf32>
    %96 = arith.cmpf ogt, %94, %95 : vector<64x32xf32>
    %cst_94 = arith.constant 2.000000e-01 : f32
    %97 = vector.broadcast %cst_94 : f32 to vector<64x32xf32>
    %98 = arith.mulf %97, %94 : vector<64x32xf32>
    %99 = arith.select %96, %94, %98 : vector<64x32xi1>, vector<64x32xf32>
    %c0_95 = arith.constant 0 : index
    %c0_96 = arith.constant 0 : index
    %100 = vector.load %arg5[%c0_95, %c0_96] : memref<64x32xf32, #tpu.memory_space<vmem>>, vector<64x32xf32>
    tpu.vector_store %arg5[%c0_95, %c0_96], %99 {strides = array<i32>} : memref<64x32xf32, #tpu.memory_space<vmem>>, vector<64x32xf32>,
    %c0_97 = arith.constant 0 : index
    %c0_98 = arith.constant 0 : index
    %101 = vector.load %arg5[%c0_97, %c0_98] : memref<64x32xf32, #tpu.memory_space<vmem>>, vector<4x32xf32>
    %c0_99 = arith.constant 0 : index
    %c0_100 = arith.constant 0 : index
    %102 = vector.load %arg6[%c0_99, %c0_100] : memref<4x512xf32, #tpu.memory_space<vmem>>, vector<4x32xf32>
    tpu.vector_store %arg6[%c0_99, %c0_100], %101 {strides = array<i32>} : memref<4x512xf32, #tpu.memory_space<vmem>>, vector<4x32xf32>,
    %c4 = arith.constant 4 : index
    %c0_101 = arith.constant 0 : index
    %103 = vector.load %arg5[%c4, %c0_101] : memref<64x32xf32, #tpu.memory_space<vmem>>, vector<4x32xf32>
    %c0_102 = arith.constant 0 : index
    %c32_103 = arith.constant 32 : index
    %104 = vector.load %arg6[%c0_102, %c32_103] : memref<4x512xf32, #tpu.memory_space<vmem>>, vector<4x32xf32>
    tpu.vector_store %arg6[%c0_102, %c32_103], %103 {strides = array<i32>} : memref<4x512xf32, #tpu.memory_space<vmem>>, vector<4x32xf32>,
    %c8_104 = arith.constant 8 : index
    %c0_105 = arith.constant 0 : index
    %105 = vector.load %arg5[%c8_104, %c0_105] : memref<64x32xf32, #tpu.memory_space<vmem>>, vector<4x32xf32>
    %c0_106 = arith.constant 0 : index
    %c64_107 = arith.constant 64 : index
    %106 = vector.load %arg6[%c0_106, %c64_107] : memref<4x512xf32, #tpu.memory_space<vmem>>, vector<4x32xf32>
    tpu.vector_store %arg6[%c0_106, %c64_107], %105 {strides = array<i32>} : memref<4x512xf32, #tpu.memory_space<vmem>>, vector<4x32xf32>,
    %c12 = arith.constant 12 : index
    %c0_108 = arith.constant 0 : index
    %107 = vector.load %arg5[%c12, %c0_108] : memref<64x32xf32, #tpu.memory_space<vmem>>, vector<4x32xf32>
    %c0_109 = arith.constant 0 : index
    %c96_110 = arith.constant 96 : index
    %108 = vector.load %arg6[%c0_109, %c96_110] : memref<4x512xf32, #tpu.memory_space<vmem>>, vector<4x32xf32>
    tpu.vector_store %arg6[%c0_109, %c96_110], %107 {strides = array<i32>} : memref<4x512xf32, #tpu.memory_space<vmem>>, vector<4x32xf32>,
    %c16 = arith.constant 16 : index
    %c0_111 = arith.constant 0 : index
    %109 = vector.load %arg5[%c16, %c0_111] : memref<64x32xf32, #tpu.memory_space<vmem>>, vector<4x32xf32>
    %c0_112 = arith.constant 0 : index
    %c128_113 = arith.constant 128 : index
    %110 = vector.load %arg6[%c0_112, %c128_113] : memref<4x512xf32, #tpu.memory_space<vmem>>, vector<4x32xf32>
    tpu.vector_store %arg6[%c0_112, %c128_113], %109 {strides = array<i32>} : memref<4x512xf32, #tpu.memory_space<vmem>>, vector<4x32xf32>,
    %c20 = arith.constant 20 : index
    %c0_114 = arith.constant 0 : index
    %111 = vector.load %arg5[%c20, %c0_114] : memref<64x32xf32, #tpu.memory_space<vmem>>, vector<4x32xf32>
    %c0_115 = arith.constant 0 : index
    %c160_116 = arith.constant 160 : index
    %112 = vector.load %arg6[%c0_115, %c160_116] : memref<4x512xf32, #tpu.memory_space<vmem>>, vector<4x32xf32>
    tpu.vector_store %arg6[%c0_115, %c160_116], %111 {strides = array<i32>} : memref<4x512xf32, #tpu.memory_space<vmem>>, vector<4x32xf32>,
    %c24 = arith.constant 24 : index
    %c0_117 = arith.constant 0 : index
    %113 = vector.load %arg5[%c24, %c0_117] : memref<64x32xf32, #tpu.memory_space<vmem>>, vector<4x32xf32>
    %c0_118 = arith.constant 0 : index
    %c192_119 = arith.constant 192 : index
    %114 = vector.load %arg6[%c0_118, %c192_119] : memref<4x512xf32, #tpu.memory_space<vmem>>, vector<4x32xf32>
    tpu.vector_store %arg6[%c0_118, %c192_119], %113 {strides = array<i32>} : memref<4x512xf32, #tpu.memory_space<vmem>>, vector<4x32xf32>,
    %c28 = arith.constant 28 : index
    %c0_120 = arith.constant 0 : index
    %115 = vector.load %arg5[%c28, %c0_120] : memref<64x32xf32, #tpu.memory_space<vmem>>, vector<4x32xf32>
    %c0_121 = arith.constant 0 : index
    %c224_122 = arith.constant 224 : index
    %116 = vector.load %arg6[%c0_121, %c224_122] : memref<4x512xf32, #tpu.memory_space<vmem>>, vector<4x32xf32>
    tpu.vector_store %arg6[%c0_121, %c224_122], %115 {strides = array<i32>} : memref<4x512xf32, #tpu.memory_space<vmem>>, vector<4x32xf32>,
    %c32_123 = arith.constant 32 : index
    %c0_124 = arith.constant 0 : index
    %117 = vector.load %arg5[%c32_123, %c0_124] : memref<64x32xf32, #tpu.memory_space<vmem>>, vector<4x32xf32>
    %c0_125 = arith.constant 0 : index
    %c256_126 = arith.constant 256 : index
    %118 = vector.load %arg6[%c0_125, %c256_126] : memref<4x512xf32, #tpu.memory_space<vmem>>, vector<4x32xf32>
    tpu.vector_store %arg6[%c0_125, %c256_126], %117 {strides = array<i32>} : memref<4x512xf32, #tpu.memory_space<vmem>>, vector<4x32xf32>,
    %c36 = arith.constant 36 : index
    %c0_127 = arith.constant 0 : index
    %119 = vector.load %arg5[%c36, %c0_127] : memref<64x32xf32, #tpu.memory_space<vmem>>, vector<4x32xf32>
    %c0_128 = arith.constant 0 : index
    %c288_129 = arith.constant 288 : index
    %120 = vector.load %arg6[%c0_128, %c288_129] : memref<4x512xf32, #tpu.memory_space<vmem>>, vector<4x32xf32>
    tpu.vector_store %arg6[%c0_128, %c288_129], %119 {strides = array<i32>} : memref<4x512xf32, #tpu.memory_space<vmem>>, vector<4x32xf32>,
    %c40 = arith.constant 40 : index
    %c0_130 = arith.constant 0 : index
    %121 = vector.load %arg5[%c40, %c0_130] : memref<64x32xf32, #tpu.memory_space<vmem>>, vector<4x32xf32>
    %c0_131 = arith.constant 0 : index
    %c320 = arith.constant 320 : index
    %122 = vector.load %arg6[%c0_131, %c320] : memref<4x512xf32, #tpu.memory_space<vmem>>, vector<4x32xf32>
    tpu.vector_store %arg6[%c0_131, %c320], %121 {strides = array<i32>} : memref<4x512xf32, #tpu.memory_space<vmem>>, vector<4x32xf32>,
    %c44 = arith.constant 44 : index
    %c0_132 = arith.constant 0 : index
    %123 = vector.load %arg5[%c44, %c0_132] : memref<64x32xf32, #tpu.memory_space<vmem>>, vector<4x32xf32>
    %c0_133 = arith.constant 0 : index
    %c352 = arith.constant 352 : index
    %124 = vector.load %arg6[%c0_133, %c352] : memref<4x512xf32, #tpu.memory_space<vmem>>, vector<4x32xf32>
    tpu.vector_store %arg6[%c0_133, %c352], %123 {strides = array<i32>} : memref<4x512xf32, #tpu.memory_space<vmem>>, vector<4x32xf32>,
    %c48 = arith.constant 48 : index
    %c0_134 = arith.constant 0 : index
    %125 = vector.load %arg5[%c48, %c0_134] : memref<64x32xf32, #tpu.memory_space<vmem>>, vector<4x32xf32>
    %c0_135 = arith.constant 0 : index
    %c384 = arith.constant 384 : index
    %126 = vector.load %arg6[%c0_135, %c384] : memref<4x512xf32, #tpu.memory_space<vmem>>, vector<4x32xf32>
    tpu.vector_store %arg6[%c0_135, %c384], %125 {strides = array<i32>} : memref<4x512xf32, #tpu.memory_space<vmem>>, vector<4x32xf32>,
    %c52 = arith.constant 52 : index
    %c0_136 = arith.constant 0 : index
    %127 = vector.load %arg5[%c52, %c0_136] : memref<64x32xf32, #tpu.memory_space<vmem>>, vector<4x32xf32>
    %c0_137 = arith.constant 0 : index
    %c416 = arith.constant 416 : index
    %128 = vector.load %arg6[%c0_137, %c416] : memref<4x512xf32, #tpu.memory_space<vmem>>, vector<4x32xf32>
    tpu.vector_store %arg6[%c0_137, %c416], %127 {strides = array<i32>} : memref<4x512xf32, #tpu.memory_space<vmem>>, vector<4x32xf32>,
    %c56 = arith.constant 56 : index
    %c0_138 = arith.constant 0 : index
    %129 = vector.load %arg5[%c56, %c0_138] : memref<64x32xf32, #tpu.memory_space<vmem>>, vector<4x32xf32>
    %c0_139 = arith.constant 0 : index
    %c448 = arith.constant 448 : index
    %130 = vector.load %arg6[%c0_139, %c448] : memref<4x512xf32, #tpu.memory_space<vmem>>, vector<4x32xf32>
    tpu.vector_store %arg6[%c0_139, %c448], %129 {strides = array<i32>} : memref<4x512xf32, #tpu.memory_space<vmem>>, vector<4x32xf32>,
    %c60 = arith.constant 60 : index
    %c0_140 = arith.constant 0 : index
    %131 = vector.load %arg5[%c60, %c0_140] : memref<64x32xf32, #tpu.memory_space<vmem>>, vector<4x32xf32>
    %c0_141 = arith.constant 0 : index
    %c480 = arith.constant 480 : index
    %132 = vector.load %arg6[%c0_141, %c480] : memref<4x512xf32, #tpu.memory_space<vmem>>, vector<4x32xf32>
    tpu.vector_store %arg6[%c0_141, %c480], %131 {strides = array<i32>} : memref<4x512xf32, #tpu.memory_space<vmem>>, vector<4x32xf32>,
    %c0_142 = arith.constant 0 : index
    %c0_143 = arith.constant 0 : index
    %133 = vector.load %arg6[%c0_142, %c0_143] : memref<4x512xf32, #tpu.memory_space<vmem>>, vector<4x512xf32>
    %134 = arith.truncf %133 : vector<4x512xf32> to vector<4x512xbf16>
    %c312 = arith.constant 312 : index
    %c0_144 = arith.constant 0 : index
    %135 = vector.load %arg1[%c312, %c0_144] : memref<824x32xf32, #tpu.memory_space<vmem>>, vector<512x32xf32>
    %136 = arith.truncf %135 : vector<512x32xf32> to vector<512x32xbf16>
    %cst_145 = arith.constant dense<0.000000e+00> : vector<4x32xf32>
    %137 = tpu.matmul %134, %136, %cst_145 {dimension_numbers = #tpu.dot_dimension_numbers<[1], [0], [0], [1], [0, 0, 1, 1], [], []>} : vector<4x512xbf16>, vector<512x32xbf16>, vector<4x32xf32> -> vector<4x32xf32>
    %c2_146 = arith.constant 2 : index
    %c0_147 = arith.constant 0 : index
    %138 = vector.load %arg2[%c2_146, %c0_147] : memref<8x32xf32, #tpu.memory_space<vmem>>, vector<1x32xf32>
    %139 = vector.broadcast %138 : vector<1x32xf32> to vector<4x32xf32>
    %140 = arith.addf %137, %139 : vector<4x32xf32>
    %cst_148 = arith.constant 0.000000e+00 : f32
    %141 = vector.broadcast %cst_148 : f32 to vector<4x32xf32>
    %142 = arith.cmpf ogt, %140, %141 : vector<4x32xf32>
    %cst_149 = arith.constant 2.000000e-01 : f32
    %143 = vector.broadcast %cst_149 : f32 to vector<4x32xf32>
    %144 = arith.mulf %143, %140 : vector<4x32xf32>
    %145 = arith.select %142, %140, %144 : vector<4x32xi1>, vector<4x32xf32>
    %c3 = arith.constant 3 : index
    %c0_150 = arith.constant 0 : index
    %146 = vector.load %arg2[%c3, %c0_150] : memref<8x32xf32, #tpu.memory_space<vmem>>, vector<1x32xf32>
    %147 = vector.broadcast %146 : vector<1x32xf32> to vector<4x32xf32>
    %148 = arith.mulf %145, %147 : vector<4x32xf32>
    %cst_151 = arith.constant dense<0.000000e+00> : vector<4xf32>
    %149 = vector.multi_reduction <add>, %148, %cst_151 [1] : vector<4x32xf32> to vector<4xf32>
    %150 = vector.shape_cast %149 : vector<4xf32> to vector<4x1xf32>
    %c4_152 = arith.constant 4 : index
    %c0_153 = arith.constant 0 : index
    %151 = vector.load %arg2[%c4_152, %c0_153] : memref<8x32xf32, #tpu.memory_space<vmem>>, vector<1x1xf32>
    %152 = vector.broadcast %151 : vector<1x1xf32> to vector<4x1xf32>
    %153 = arith.addf %150, %152 : vector<4x1xf32>
    %c0_154 = arith.constant 0 : index
    %c0_155 = arith.constant 0 : index
    %154 = vector.load %arg3[%c0_154, %c0_155] : memref<4x1xf32, #tpu.memory_space<vmem>>, vector<4x1xf32>
    tpu.vector_store %arg3[%c0_154, %c0_155], %153 {strides = array<i32>} : memref<4x1xf32, #tpu.memory_space<vmem>>, vector<4x1xf32>,
    return
  }
}

</mosaic_0001>

<bundles_post_ra>
// kernel: tpu_custom_call.1
= control target key start
LH: loop header
LB: loop body
LE: loop exit
PB: predicated region body
PF: predicated region fallthrough
CT: control target
= control target key end

     0   :  { %v2074_v0 = vmov 1   ;;  %v2075_v1 = vmov 0   ;;  %v2076_v9 = vmov 2   ;;  %v2077_v24 = vmov 4.0   ;;  %s2079_s24 = smov 32   ;;  %s2080_s25 = smov 64   ;;  %s3477_s0 = inlined_call_operand.vmem [shape: f32[4,4,4,3], index: 0, kind: input, shape index: {}]   ;;  %s3478_s1 = inlined_call_operand.vmem [shape: f32[824,32], index: 1, kind: input, shape index: {}]   ;;  %s3479_s2 = inlined_call_operand.vmem [shape: f32[8,32], index: 2, kind: input, shape index: {}]   ;;  %s3480_s3 = inlined_call_operand.vmem [shape: f32[4,1], index: 3, kind: output, shape index: {}]  }
   0x1   :  { %2007 = vset.pattern.permute.xlu2 %v2074_v0  ;;  %2006 = vset.pattern.permute.xlu1 %v2075_v1  ;;  %v19_v2 = vld [vmem:[%s3477_s0 + $0x8] sm:$0xf]  ;;  %v17_v3 = vld [vmem:[%s3477_s0] sm:$0xf]  ;;  %v20_v4 = vld [vmem:[%s3477_s0 + $0xc] sm:$0xf]  ;;  %2038 = vrcp.f32 %v2077_v24 }
   0x2   :  { %2005 = vset.pattern.permute.xlu0 %v2075_v1  ;;  %46 = vperm.xlu1 %2006, %v19_v2   ;;  %v18_v5 = vld [vmem:[%s3477_s0 + $0x4] sm:$0xf]  ;;  %v22_v6 = vld [vmem:[%s3477_s0 + $0x14] sm:$0xf]  ;;  %v21_v7 = vld [vmem:[%s3477_s0 + $0x10] sm:$0xf] }
   0x3   :  { %149 = vperm.xlu2 %2007, %v17_v3   ;;  %36 = vperm.xlu0 %2005, %v17_v3   ;;  %v23_v8 = vld [vmem:[%s3477_s0 + $0x18] sm:$0xf]  ;;  %v2133_v10 = vld [vmem:[%s3477_s0 + $0x34] sm:$0xf]  ;;  %v24_v11 = vld [vmem:[%s3477_s0 + $0x1c] sm:$0xf] }
   0x4   :  { %v25_v12 = vld [vmem:[%s3477_s0 + $0x20] sm:$0xf]  ;;  %v2150_v13 = vld [vmem:[%s3477_s0 + $0x38] sm:$0xf]  ;;  %v26_v14 = vld [vmem:[%s3477_s0 + $0x24] sm:$0xf] }
   0x5   :  { %v27_v15 = vld [vmem:[%s3477_s0 + $0x28] sm:$0xf]  ;;  %v28_v16 = vld [vmem:[%s3477_s0 + $0x2c] sm:$0xf]  ;;  %v2170_v17 = vld [vmem:[%s3477_s0 + $0x3c] sm:$0xf] }
   0x6   :  { %v29_v21 = vld [vmem:[%s3477_s0 + $0x30] sm:$0xf]  ;;  %v2185_v22 = vld [vmem:[%s3478_s1 + $0x1] ss:$0 sm:$0xff]  ;;  %v2191_v23 = vld [vmem:[%s3478_s1] ss:$0 sm:$0xff] }
   0x7   :  { %v2196_v25 = vld [vmem:[%s3479_s2] ss:$0 sm:$0xff]  ;;  %v2203_v27 = vld [vmem:[%s3478_s1 + $0x2] ss:$0 sm:$0xff]  ;;  %v2039_v32 = vpop.eup %2038  ;;  %vm391_vm0 = vcmask 257024   ;;  %v2078_v60 = vmov 0.0  }
   0x8   :  { %v505_v36 = vmul.f32 4.0, %v2039_v32  ;;  %vm509_vm2 = vweird.f32 %v2039_v32  ;;  %967 = vst [vmem:[#allocation2] sm:$0xff] %v2078_v60  ;;  %vm895_vm7 = vcmask 261120   ;;  %s2082_s26 = smov 96  }
   0x9   :  { %970 = vst [vmem:[#allocation2 + $0xc] sm:$0xff] %v2078_v60 }
   0xa   :  { %51 = vperm.xlu1 %2006, %v20_v4   ;;  %v506_v41 = vsub.f32 1.0, %v505_v36  ;;  %972 = vst [vmem:[#allocation2 + $0x18] sm:$0xff] %v2078_v60 }
   0xb   :  { %153 = vperm.xlu2 %2007, %v18_v5   ;;  %41 = vperm.xlu0 %2005, %v18_v5   ;;  %974 = vst [vmem:[#allocation2 + $0x24] sm:$0xff] %v2078_v60 }
   0xc   :  { %v507_v46 = vmul.f32 %v2039_v32, %v506_v41  ;;  %976 = vst [vmem:[#allocation2 + $0x30] sm:$0xff] %v2078_v60 }
   0xd   :  { %978 = vst [vmem:[#allocation2 + $0x3c] sm:$0xff] %v2078_v60 }
   0xe   :  { %v508_v51 = vadd.f32 %v2039_v32, %v507_v46  ;;  %980 = vst [vmem:[#allocation2 + $0x48] sm:$0xff] %v2078_v60 }
   0xf   :  { %982 = vst [vmem:[#allocation2 + $0x54] sm:$0xff] %v2078_v60 }
  0x10   :  { %v2231_v55 = vsel %vm509_vm2, %v2039_v32, %v508_v51  ;;  %984 = vst [vmem:[#allocation2 + $0x60] sm:$0xff] %v2078_v60 }
  0x11   :  { %986 = vst [vmem:[#allocation2 + $0x6c] sm:$0xff] %v2078_v60 }
  0x12   :  { %61 = vperm.xlu1 %2006, %v22_v6   ;;  %988 = vst [vmem:[#allocation2 + $0x78] sm:$0xff] %v2078_v60 }
  0x13   :  { %157 = vperm.xlu2 %2007, %v19_v2   ;;  %56 = vperm.xlu0 %2005, %v21_v7   ;;  %990 = vst [vmem:[#allocation2 + $0x84] sm:$0xff] %v2078_v60 }
  0x14   :  { %992 = vst [vmem:[#allocation2 + $0x90] sm:$0xff] %v2078_v60 }
  0x15   :  { %994 = vst [vmem:[#allocation2 + $0x9c] sm:$0xff] %v2078_v60 }
  0x16   :  { %996 = vst [vmem:[#allocation2 + $0xa8] sm:$0xff] %v2078_v60 }
  0x17   :  { %998 = vst [vmem:[#allocation2 + $0xb4] sm:$0xff] %v2078_v60 }
  0x1a   :  { %2008 = vset.pattern.permute.xlu1 %v2074_v0 }
  0x1b   :  { %2009 = vset.pattern.permute.xlu2 %v2076_v9  ;;  %66 = vperm.xlu0 %2005, %v23_v8  }
  0x1c   :  { %161 = vperm.xlu1 %2008, %v20_v4   ;;  %247 = vperm.xlu2 %2009, %v17_v3  }
  0x23   :  { %101 = vperm.xlu0 %2005, %v2133_v10  }
  0x24   :  { %165 = vperm.xlu1 %2008, %v21_v7   ;;  %2010 = vset.pattern.permute.xlu2 %v2074_v0 }
  0x25   :  { %169 = vperm.xlu2 %2010, %v22_v6  }
  0x2b   :  { %2021 = vset.pattern.permute.xlu0 %v2074_v0 }
  0x2c   :  { %2011 = vset.pattern.permute.xlu1 %v2076_v9  ;;  %173 = vperm.xlu0 %2021, %v23_v8  }
  0x2d   :  { %255 = vperm.xlu1 %2011, %v19_v2   ;;  %2012 = vset.pattern.permute.xlu2 %v2075_v1 }
  0x2e   :  { %71 = vperm.xlu2 %2012, %v24_v11  }
  0x34   :  { %181 = vperm.xlu0 %2021, %v25_v12  }
  0x35   :  { %259 = vperm.xlu1 %2011, %v20_v4  }
  0x36   :  { %2013 = vset.pattern.permute.xlu2 %v2076_v9 }
  0x37   :  { %263 = vperm.xlu2 %2013, %v21_v7  }
  0x3c   :  { %205 = vperm.xlu0 %2021, %v2150_v13  }
  0x3d   :  { %267 = vperm.xlu1 %2011, %v22_v6  }
  0x3f   :  { %2014 = vset.pattern.permute.xlu2 %v2074_v0 }
  0x40   :  { %177 = vperm.xlu2 %2014, %v24_v11  }
  0x44   :  { %2026 = vset.pattern.permute.xlu0 %v2076_v9 }
  0x45   :  { %275 = vperm.xlu1 %2011, %v24_v11   ;;  %251 = vperm.xlu0 %2026, %v18_v5  }
  0x48   :  { %2015 = vset.pattern.permute.xlu2 %v2075_v1 }
  0x49   :  { %76 = vperm.xlu2 %2015, %v25_v12  }
  0x4d   :  { %2016 = vset.pattern.permute.xlu1 %v2075_v1  ;;  %271 = vperm.xlu0 %2026, %v23_v8  }
  0x4e   :  { %81 = vperm.xlu1 %2016, %v26_v14  }
  0x51   :  { %86 = vperm.xlu2 %2015, %v27_v15  }
  0x55   :  { %283 = vperm.xlu0 %2026, %v26_v14  }
  0x56   :  { %2017 = vset.pattern.permute.xlu1 %v2074_v0 }
  0x57   :  { %185 = vperm.xlu1 %2017, %v26_v14  }
  0x59   :  { %91 = vperm.xlu2 %2015, %v28_v16  }
  0x5d   :  { %307 = vperm.xlu0 %2026, %v2170_v17   ;;  %v150_v18 = vpop.permute.xlu2 %149 }
  0x5e   :  { %v213_v29 = vmul.f32 %v2185_v22, %v150_v18 }
  0x5f   :  { %189 = vperm.xlu1 %2017, %v27_v15  }
  0x61   :  { %2018 = vset.pattern.permute.xlu2 %v2076_v9 }
  0x62   :  { %279 = vperm.xlu2 %2018, %v25_v12  }
  0x65   :  { %v2174_v19 = vpop.permute.xlu2 %153 }
  0x67   :  { %193 = vperm.xlu1 %2017, %v28_v16  }
  0x6a   :  { %287 = vperm.xlu2 %2018, %v27_v15  }
  0x6d   :  { %v2176_v20 = vpop.permute.xlu2 %157 }
  0x6e   :  { %v215_v15 = vmul.f32 %v2185_v22, %v2176_v20 }
  0x6f   :  { %2019 = vset.pattern.permute.xlu1 %v2076_v9 }
  0x70   :  { %291 = vperm.xlu1 %2019, %v28_v16  }
  0x72   :  { %2020 = vset.pattern.permute.xlu2 %v2075_v1 }
  0x73   :  { %96 = vperm.xlu2 %2020, %v29_v21  }
  0x74   :  { %v2198_v26 = vpop.permute.xlu1 %46 }
  0x75   :  { %v37_v28 = vpop.permute.xlu0 %36 }
  0x76   :  { %v115_v30 = vmul.f32 %v2191_v23, %v37_v28  ;;  %v248_v31 = vpop.permute.xlu2 %247 }
  0x77   :  { %v311_v34 = vmul.f32 %v2203_v27, %v248_v31 }
  0x78   :  { %v131_v33 = vadd.f32 %v2196_v25, %v115_v30  ;;  %2022 = vset.pattern.permute.xlu1 %v2075_v1 }
  0x79   :  { %106 = vperm.xlu1 %2022, %v2150_v13  }
  0x7a   :  { %v229_v35 = vadd.f32 %v213_v29, %v131_v33 }
  0x7b   :  { %2023 = vset.pattern.permute.xlu2 %v2074_v0 }
  0x7c   :  { %v327_v37 = vadd.f32 %v311_v34, %v229_v35  ;;  %197 = vperm.xlu2 %2023, %v29_v21   ;;  %v2212_v38 = vpop.permute.xlu1 %51 }
  0x7d   :  { %v2214_v39 = vpop.permute.xlu0 %41  ;;  %v118_v20 = vmul.f32 %v2191_v23, %v2212_v38 }
  0x7e   :  { %vm343_vm1 = vcmp.gt.f32.partialorder %v327_v37, 0.0  ;;  %v359_v40 = vmul.f32 0.2, %v327_v37 }
  0x7f   :  { %v2216_v42 = vpop.permute.xlu2 %169  ;;  %v134_v38 = vadd.f32 %v2196_v25, %v118_v20 }
  0x80   :  { %v2218_v43 = vsel %vm343_vm1, %v327_v37, %v359_v40 }
  0x81   :  { %v392_v44 = vsel %vm391_vm0, %v2218_v43, 0.0  ;;  %2024 = vset.pattern.permute.xlu1 %v2074_v0  ;;  %1001 = vst.msk [vmem:[#allocation2 + $0x3c] sm:$0xf] %vm391_vm0, %v2218_v43 }
  0x82   :  { %v393_v45 = vrot.slane %v392_v44, 4  ;;  %201 = vperm.xlu1 %2024, %v2133_v10   ;;  %1208 = vst.msk [vmem:[#allocation2 + $0x4] sm:$0xf] %vm391_vm0, %v2218_v43 }
  0x84   :  { %v394_v47 = vadd.f32 %v393_v45, %v392_v44  ;;  %2025 = vset.pattern.permute.xlu2 %v2075_v1  ;;  %v2225_v48 = vpop.permute.xlu1 %61 }
  0x85   :  { %111 = vperm.xlu2 %2025, %v2170_v17   ;;  %v57_v49 = vpop.permute.xlu0 %56 }
  0x86   :  { %v395_v50 = vrot.slane %v394_v47, 2  ;;  %v119_v1 = vmul.f32 %v2191_v23, %v57_v49 }
  0x88   :  { %v396_v52 = vadd.f32 %v395_v50, %v394_v47  ;;  %v2228_v53 = vpop.permute.xlu2 %71  ;;  %v120_v47 = vmul.f32 %v2191_v23, %v2225_v48  ;;  %v218_v48 = vmul.f32 %v2185_v22, %v2216_v42 }
  0x8a   :  { %v397_v54 = vrot.slane %v396_v52, 1  ;;  %2027 = vset.pattern.permute.xlu1 %v2076_v9 }
  0x8b   :  { %295 = vperm.xlu1 %2027, %v29_v21  }
  0x8c   :  { %v398_v56 = vadd.f32 %v397_v54, %v396_v52 }
  0x8d   :  { %2028 = vset.pattern.permute.xlu2 %v2076_v9  ;;  %v2234_v57 = vpop.permute.xlu0 %66  ;;  %v117_v9 = vmul.f32 %v2191_v23, %v2198_v26 }
  0x8e   :  { %v511_v58 = vmul.f32 %v2231_v55, %v398_v56  ;;  %v2237_v59 = vpop.permute.xlu1 %161  ;;  %299 = vperm.xlu2 %2028, %v2133_v10  }
  0x8f   :  { %v133_v16 = vadd.f32 %v2196_v25, %v117_v9  ;;  %v216_v40 = vmul.f32 %v2185_v22, %v2237_v59 }
  0x90   :  { %v527_v61 = vsub.f32 %v2218_v43, %v511_v58 }
  0x91   :  { %v264_v62 = vpop.permute.xlu2 %263  ;;  %v231_v30 = vadd.f32 %v215_v15, %v133_v16  ;;  %v232_v52 = vadd.f32 %v216_v40, %v134_v38 }
  0x92   :  { %v543_v63 = vmul.f32 %v527_v61, %v527_v61  ;;  %v315_v7 = vmul.f32 %v2203_v27, %v264_v62 }
  0x93   :  { %2029 = vset.pattern.permute.xlu1 %v2074_v0  ;;  %v135_v0 = vadd.f32 %v2196_v25, %v119_v1 }
  0x94   :  { %v559_v2 = vsel %vm391_vm0, %v543_v63, 0.0  ;;  %209 = vperm.xlu1 %2029, %v2170_v17   ;;  %v136_v63 = vadd.f32 %v2196_v25, %v120_v47 }
  0x95   :  { %v560_v3 = vrot.slane %v559_v2, 4  ;;  %v2252_v4 = vpop.permute.xlu0 %101 }
  0x96   :  { %v166_v5 = vpop.permute.xlu1 %165  ;;  %303 = vperm.xlu2 %2028, %v2150_v13  }
  0x97   :  { %v561_v6 = vadd.f32 %v560_v3, %v559_v2  ;;  %v217_v8 = vmul.f32 %v2185_v22, %v166_v5 }
  0x99   :  { %v562_v10 = vrot.slane %v561_v6, 2  ;;  %v233_v11 = vadd.f32 %v217_v8, %v135_v0 }
  0x9a   :  { %v2265_v12 = vpop.permute.xlu2 %177 }
  0x9b   :  { %v563_v13 = vadd.f32 %v562_v10, %v561_v6  ;;  %v331_v14 = vadd.f32 %v315_v7, %v233_v11  ;;  %v116_v7 = vmul.f32 %v2191_v23, %v2214_v39  ;;  %v220_v40 = vmul.f32 %v2185_v22, %v2265_v12 }
  0x9d   :  { %v564_v17 = vrot.slane %v563_v13, 1  ;;  %vm347_vm3 = vcmp.gt.f32.partialorder %v331_v14, 0.0  ;;  %v363_v18 = vmul.f32 0.2, %v331_v14  ;;  %v132_v20 = vadd.f32 %v2196_v25, %v116_v7 }
  0x9e   :  { %v2274_v21 = vpop.permute.xlu0 %173 }
  0x9f   :  { %v565_v24 = vadd.f32 %v564_v17, %v563_v13  ;;  %v2278_v26 = vsel %vm347_vm3, %v331_v14, %v363_v18  ;;  %v256_v28 = vpop.permute.xlu1 %255  ;;  %v234_v14 = vadd.f32 %v218_v48, %v136_v63  ;;  %v122_v18 = vmul.f32 %v2191_v23, %v2228_v53 }
  0xa0   :  { %v420_v29 = vsel %vm391_vm0, %v2278_v26, 0.0  ;;  %v313_v31 = vmul.f32 %v2203_v27, %v256_v28  ;;  %1004 = vst.msk [vmem:[#allocation2 + $0x6c] sm:$0xf] %vm391_vm0, %v2278_v26  ;;  %v214_v28 = vmul.f32 %v2185_v22, %v2174_v19 }
  0xa1   :  { %v671_v32 = vmul.f32 %v565_v24, %v2231_v55  ;;  %v421_v33 = vrot.slane %v420_v29, 4  ;;  %1212 = vst.msk [vmem:[#allocation2 + $0x34] sm:$0xf] %vm391_vm0, %v2278_v26  ;;  %v138_v53 = vadd.f32 %v2196_v25, %v122_v18 }
  0xa2   :  { %v329_v34 = vadd.f32 %v313_v31, %v231_v30  ;;  %v121_v31 = vmul.f32 %v2191_v23, %v2234_v57  ;;  %v230_v47 = vadd.f32 %v214_v28, %v132_v20 }
  0xa3   :  { %v2292_v35 = vadd.f32 1e-08, %v671_v32  ;;  %v422_v36 = vadd.f32 %v421_v33, %v420_v29  ;;  %v2294_v37 = vpop.permute.xlu2 %76 }
  0xa4   :  { %vm345_vm4 = vcmp.gt.f32.partialorder %v329_v34, 0.0  ;;  %v361_v41 = vmul.f32 0.2, %v329_v34 }
  0xa5   :  { %v423_v44 = vrot.slane %v422_v36, 2  ;;  %2040 = vrsqrt.f32 %v2292_v35  ;;  %vm710_vm8 = vcmp.eq.f32.partialorder %v2292_v35, inf  ;;  %vm712_vm9 = vcmp.eq.f32.partialorder %v2292_v35, 0.0 }
  0xa6   :  { %v2300_v45 = vsel %vm345_vm4, %v329_v34, %v361_v41  ;;  %v2302_v46 = vpop.permute.xlu0 %181 }
  0xa7   :  { %v424_v49 = vadd.f32 %v423_v44, %v422_v36  ;;  %v406_v50 = vsel %vm391_vm0, %v2300_v45, 0.0  ;;  %v260_v51 = vpop.permute.xlu1 %259  ;;  %1003 = vst.msk [vmem:[#allocation2 + $0x54] sm:$0xf] %vm391_vm0, %v2300_v45 }
  0xa8   :  { %v407_v54 = vrot.slane %v406_v50, 4  ;;  %v314_v56 = vmul.f32 %v2203_v27, %v260_v51  ;;  %1210 = vst.msk [vmem:[#allocation2 + $0x1c] sm:$0xf] %vm391_vm0, %v2300_v45 }
  0xa9   :  { %v425_v58 = vrot.slane %v424_v49, 1 }
  0xaa   :  { %v408_v59 = vadd.f32 %v407_v54, %v406_v50  ;;  %v330_v61 = vadd.f32 %v314_v56, %v232_v52 }
  0xab   :  { %v2041_v62 = vpop.eup %2040  ;;  %v426_v1 = vadd.f32 %v425_v58, %v424_v49  ;;  %v2316_v2 = vpop.permute.xlu2 %86  ;;  %v137_v49 = vadd.f32 %v2196_v25, %v121_v31  ;;  %v123_v58 = vmul.f32 %v2191_v23, %v2294_v37 }
  0xac   :  { %v409_v3 = vrot.slane %v408_v59, 2  ;;  %vm346_vm5 = vcmp.gt.f32.partialorder %v330_v61, 0.0  ;;  %v362_v5 = vmul.f32 0.2, %v330_v61  ;;  %v704_v6 = vmul.f32 %v2041_v62, %v2292_v35 }
  0xad   :  { %v515_v0 = vmul.f32 %v2231_v55, %v426_v1  ;;  %v713_v1 = vand.u32 2147483648, %v2292_v35  ;;  %v139_v7 = vadd.f32 %v2196_v25, %v123_v58 }
  0xae   :  { %v410_v8 = vadd.f32 %v409_v3, %v408_v59  ;;  %v2322_v9 = vsel %vm346_vm5, %v330_v61, %v362_v5  ;;  %v2324_v10 = vpop.permute.xlu0 %205  ;;  %v705_v42 = vmul.f32 %v2041_v62, %v704_v6  ;;  %v236_v59 = vadd.f32 %v220_v40, %v138_v53 }
  0xaf   :  { %v413_v11 = vsel %vm391_vm0, %v2322_v9, 0.0  ;;  %v268_v13 = vpop.permute.xlu1 %267  ;;  %1211 = vst.msk [vmem:[#allocation2 + $0x28] sm:$0xf] %vm391_vm0, %v2322_v9  ;;  %v531_v15 = vsub.f32 %v2278_v26, %v515_v0 }
  0xb0   :  { %v411_v16 = vrot.slane %v410_v8, 1  ;;  %v414_v17 = vrot.slane %v413_v11, 4  ;;  %v316_v39 = vmul.f32 %v2203_v27, %v268_v13  ;;  %v706_v24 = vmul.f32 0.5, %v705_v42 }
  0xb1   :  { %v547_v36 = vmul.f32 %v531_v15, %v531_v15 }
  0xb2   :  { %v415_v29 = vadd.f32 %v414_v17, %v413_v11  ;;  %v332_v30 = vadd.f32 %v316_v39, %v234_v14  ;;  %v412_v32 = vadd.f32 %v411_v16, %v410_v8  ;;  %v707_v34 = vsub.f32 1.5, %v706_v24 }
  0xb3   :  { %v2339_v33 = vpop.permute.xlu2 %91  ;;  %v587_v56 = vsel %vm391_vm0, %v547_v36, 0.0  ;;  %v221_v8 = vmul.f32 %v2185_v22, %v2302_v46  ;;  %v219_v16 = vmul.f32 %v2185_v22, %v2274_v21 }
  0xb4   :  { %v416_v38 = vrot.slane %v415_v29, 2  ;;  %vm348_vm6 = vcmp.gt.f32.partialorder %v332_v30, 0.0  ;;  %v364_v19 = vmul.f32 0.2, %v332_v30  ;;  %v708_v41 = vmul.f32 %v2041_v62, %v707_v34 }
  0xb5   :  { %v513_v57 = vmul.f32 %v2231_v55, %v412_v32  ;;  %v588_v3 = vrot.slane %v587_v56, 4  ;;  %v235_v53 = vadd.f32 %v219_v16, %v137_v49 }
  0xb6   :  { %v417_v44 = vadd.f32 %v416_v38, %v415_v29  ;;  %v2346_v50 = vsel %vm348_vm6, %v332_v30, %v364_v19  ;;  %v709_v54 = vmul.f32 %v708_v41, %v2292_v35  ;;  %v237_v29 = vadd.f32 %v221_v8, %v139_v7 }
  0xb7   :  { %v276_v51 = vpop.permute.xlu1 %275  ;;  %v252_v52 = vpop.permute.xlu0 %251  ;;  %1005 = vst.msk [vmem:[#allocation2 + $0x78] sm:$0xf] %vm391_vm0, %v2346_v50  ;;  %v427_v63 = vsel %vm391_vm0, %v2346_v50, 0.0  ;;  %v529_v5 = vsub.f32 %v2300_v45, %v513_v57  ;;  %v589_v18 = vadd.f32 %v588_v3, %v587_v56 }
  0xb8   :  { %v418_v12 = vrot.slane %v417_v44, 1  ;;  %v318_v61 = vmul.f32 %v2203_v27, %v276_v51  ;;  %v312_v62 = vmul.f32 %v2203_v27, %v252_v52  ;;  %1213 = vst.msk [vmem:[#allocation2 + $0x40] sm:$0xf] %vm391_vm0, %v2346_v50  ;;  %v711_v37 = vsel %vm710_vm8, %v2292_v35, %v709_v54 }
  0xb9   :  { %v428_v13 = vrot.slane %v427_v63, 4  ;;  %v714_v15 = vsel %vm712_vm9, %v713_v1, %v711_v37  ;;  %v545_v24 = vmul.f32 %v529_v5, %v529_v5 }
  0xba   :  { %v419_v48 = vadd.f32 %v418_v12, %v417_v44  ;;  %v334_v6 = vadd.f32 %v318_v61, %v236_v59  ;;  %v328_v0 = vadd.f32 %v312_v62, %v230_v47  ;;  %v896_v31 = vsel %vm895_vm7, %v714_v15, 0.0 }
  0xbb   :  { %v429_v34 = vadd.f32 %v428_v13, %v427_v63  ;;  %v590_v44 = vrot.slane %v589_v18, 2  ;;  %v573_v47 = vsel %vm391_vm0, %v545_v24, 0.0 }
  0xbc   :  { %v514_v42 = vmul.f32 %v2231_v55, %v419_v48  ;;  %v280_v11 = vpop.permute.xlu2 %279  ;;  %vm350_vm10 = vcmp.gt.f32.partialorder %v334_v6, 0.0  ;;  %v366_v14 = vmul.f32 0.2, %v334_v6  ;;  %vm344_vm11 = vcmp.gt.f32.partialorder %v328_v0, 0.0 }
  0xbd   :  { %v360_v39 = vmul.f32 0.2, %v328_v0  ;;  %v319_v46 = vmul.f32 %v2203_v27, %v280_v11  ;;  %v430_v58 = vrot.slane %v429_v34, 2  ;;  %v591_v62 = vadd.f32 %v590_v44, %v589_v18 }
  0xbe   :  { %v530_v17 = vsub.f32 %v2322_v9, %v514_v42  ;;  %v2372_v28 = vsel %vm350_vm10, %v334_v6, %v366_v14  ;;  %897 = vadd.xlane.f32.xlu1 %v896_v31  ;;  %v574_v48 = vrot.slane %v573_v47, 4 }
  0xbf   :  { %v272_v20 = vpop.permute.xlu0 %271  ;;  %v441_v35 = vsel %vm391_vm0, %v2372_v28, 0.0  ;;  %v2377_v30 = vsel %vm344_vm11, %v328_v0, %v360_v39  ;;  %1215 = vst.msk [vmem:[#allocation2 + $0x58] sm:$0xf] %vm391_vm0, %v2372_v28  ;;  %v335_v19 = vadd.f32 %v319_v46, %v237_v29  ;;  %v431_v7 = vadd.f32 %v430_v58, %v429_v34 }
  0xc0   :  { %v82_v21 = vpop.permute.xlu1 %81  ;;  %v546_v32 = vmul.f32 %v530_v17, %v530_v17  ;;  %v442_v36 = vrot.slane %v441_v35, 4  ;;  %v399_v38 = vsel %vm391_vm0, %v2377_v30, 0.0  ;;  %1002 = vst.msk [vmem:[#allocation2 + $0x48] sm:$0xf] %vm391_vm0, %v2377_v30  ;;  %v317_v41 = vmul.f32 %v2203_v27, %v272_v20 }
  0xc1   :  { %v400_v40 = vrot.slane %v399_v38, 4  ;;  %1209 = vst.msk [vmem:[#allocation2 + $0x10] sm:$0xf] %vm391_vm0, %v2377_v30  ;;  %vm351_vm12 = vcmp.gt.f32.partialorder %v335_v19, 0.0  ;;  %v367_v51 = vmul.f32 0.2, %v335_v19  ;;  %v124_v3 = vmul.f32 %v2191_v23, %v82_v21 }
  0xc2   :  { %v333_v52 = vadd.f32 %v317_v41, %v235_v53  ;;  %v580_v56 = vsel %vm391_vm0, %v546_v32, 0.0  ;;  %v443_v49 = vadd.f32 %v442_v36, %v441_v35  ;;  %v575_v11 = vadd.f32 %v574_v48, %v573_v47 }
  0xc3   :  { %v401_v57 = vadd.f32 %v400_v40, %v399_v38  ;;  %v2393_v59 = vsel %vm351_vm12, %v335_v19, %v367_v51  ;;  %v581_v63 = vrot.slane %v580_v56, 4  ;;  %v140_v13 = vadd.f32 %v2196_v25, %v124_v3 }
  0xc4   :  { %v2390_v54 = vpop.permute.xlu2 %287  ;;  %vm349_vm13 = vcmp.gt.f32.partialorder %v333_v52, 0.0  ;;  %v365_v61 = vmul.f32 0.2, %v333_v52  ;;  %1007 = vst.msk [vmem:[#allocation2 + $0x9c] sm:$0xf] %vm391_vm0, %v2393_v59  ;;  %v444_v5 = vrot.slane %v443_v49, 2  ;;  %v125_v21 = vmul.f32 %v2191_v23, %v2316_v2 }
  0xc5   :  { %v402_v12 = vrot.slane %v401_v57, 2  ;;  %1216 = vst.msk [vmem:[#allocation2 + $0x64] sm:$0xf] %vm391_vm0, %v2393_v59  ;;  %v592_v14 = vrot.slane %v591_v62, 1  ;;  %v582_v15 = vadd.f32 %v581_v63, %v580_v56  ;;  %v432_v20 = vrot.slane %v431_v7, 1 }
  0xc6   :  { %v2397_v1 = vsel %vm349_vm13, %v333_v52, %v365_v61  ;;  %v445_v18 = vadd.f32 %v444_v5, %v443_v49  ;;  %v576_v31 = vrot.slane %v575_v11, 2  ;;  %v141_v2 = vadd.f32 %v2196_v25, %v125_v21 }
  0xc7   :  { %v403_v37 = vadd.f32 %v402_v12, %v401_v57  ;;  %v434_v6 = vsel %vm391_vm0, %v2397_v1, 0.0  ;;  %1006 = vst.msk [vmem:[#allocation2 + $0x84] sm:$0xf] %vm391_vm0, %v2397_v1  ;;  %v284_v39 = vpop.permute.xlu0 %283  ;;  %v593_v36 = vadd.f32 %v592_v14, %v591_v62  ;;  %v583_v38 = vrot.slane %v582_v15, 2 }
  0xc8   :  { %v435_v42 = vrot.slane %v434_v6, 4  ;;  %1214 = vst.msk [vmem:[#allocation2 + $0x4c] sm:$0xf] %vm391_vm0, %v2397_v1  ;;  %v320_v32 = vmul.f32 %v2203_v27, %v284_v39  ;;  %v446_v19 = vrot.slane %v445_v18, 1  ;;  %v433_v47 = vadd.f32 %v432_v20, %v431_v7 }
  0xc9   :  { %v186_v0 = vpop.permute.xlu1 %185  ;;  %v404_v8 = vrot.slane %v403_v37, 1  ;;  %v577_v52 = vadd.f32 %v576_v31, %v575_v11  ;;  %v584_v58 = vadd.f32 %v583_v38, %v582_v15  ;;  %v675_v12 = vmul.f32 %v593_v36, %v2231_v55 }
  0xca   :  { %v436_v17 = vadd.f32 %v435_v42, %v434_v6  ;;  %v222_v24 = vmul.f32 %v2185_v22, %v186_v0  ;;  %v447_v61 = vadd.f32 %v446_v19, %v445_v18  ;;  %v126_v42 = vmul.f32 %v2191_v23, %v2339_v33 }
  0xcb   :  { %v405_v16 = vadd.f32 %v404_v8, %v403_v37  ;;  %v516_v37 = vmul.f32 %v2231_v55, %v433_v47  ;;  %v578_v5 = vrot.slane %v577_v52, 1  ;;  %v585_v8 = vrot.slane %v584_v58, 1 }
  0xcc   :  { %v437_v35 = vrot.slane %v436_v17, 2  ;;  %v238_v34 = vadd.f32 %v222_v24, %v140_v13  ;;  %v321_v11 = vmul.f32 %v2203_v27, %v2390_v54  ;;  %v2435_v13 = vadd.f32 1e-08, %v675_v12 }
  0xcd   :  { %v2410_v46 = vpop.permute.xlu2 %96  ;;  %v512_v29 = vmul.f32 %v2231_v55, %v405_v16  ;;  %v518_v14 = vmul.f32 %v2231_v55, %v447_v61  ;;  %v532_v18 = vsub.f32 %v2346_v50, %v516_v37  ;;  %v579_v24 = vadd.f32 %v578_v5, %v577_v52 }
  0xce   :  { %v438_v40 = vadd.f32 %v437_v35, %v436_v17  ;;  %v336_v41 = vadd.f32 %v320_v32, %v238_v34  ;;  %2042 = vrsqrt.f32 %v2435_v13  ;;  %v586_v33 = vadd.f32 %v585_v8, %v584_v58 }
  0xcf   :  { %v528_v53 = vsub.f32 %v2377_v30, %v512_v29  ;;  %v142_v54 = vadd.f32 %v2196_v25, %v126_v42  ;;  %v534_v31 = vsub.f32 %v2372_v28, %v518_v14  ;;  %v548_v32 = vmul.f32 %v532_v18, %v532_v18 }
  0xd0   :  { %v439_v51 = vrot.slane %v438_v40, 1  ;;  %vm352_vm14 = vcmp.gt.f32.partialorder %v336_v41, 0.0  ;;  %v368_v56 = vmul.f32 0.2, %v336_v41  ;;  %v673_v19 = vmul.f32 %v579_v24, %v2231_v55 }
  0xd1   :  { %v190_v44 = vpop.permute.xlu1 %189  ;;  %v544_v57 = vmul.f32 %v528_v53, %v528_v53  ;;  %v594_v52 = vsel %vm391_vm0, %v548_v32, 0.0  ;;  %vm758_vm2 = vcmp.eq.f32.partialorder %v2435_v13, inf  ;;  %vm760_vm3 = vcmp.eq.f32.partialorder %v2435_v13, 0.0 }
  0xd2   :  { %v440_v48 = vadd.f32 %v439_v51, %v438_v40  ;;  %v2420_v63 = vsel %vm352_vm14, %v336_v41, %v368_v56  ;;  %v223_v7 = vmul.f32 %v2185_v22, %v190_v44  ;;  %v674_v44 = vmul.f32 %v586_v33, %v2231_v55 }
  0xd3   :  { %v566_v49 = vsel %vm391_vm0, %v544_v57, 0.0  ;;  %1008 = vst.msk [vmem:[#allocation2 + $0xa8] sm:$0xf] %vm391_vm0, %v2420_v63  ;;  %v550_v57 = vmul.f32 %v534_v31, %v534_v31  ;;  %v455_v51 = vsel %vm391_vm0, %v2420_v63, 0.0  ;;  %v2459_v61 = vadd.f32 1e-08, %v673_v19 }
  0xd4   :  { %v567_v62 = vrot.slane %v566_v49, 4  ;;  %v517_v0 = vmul.f32 %v2231_v55, %v440_v48  ;;  %1217 = vst.msk [vmem:[#allocation2 + $0x70] sm:$0xf] %vm391_vm0, %v2420_v63  ;;  %v239_v17 = vadd.f32 %v223_v7, %v141_v2  ;;  %v2043_v41 = vpop.eup %2042  ;;  %v2462_v48 = vadd.f32 1e-08, %v674_v44 }
  0xd5   :  { %v752_v58 = vmul.f32 %v2043_v41, %v2435_v13  ;;  %v456_v37 = vrot.slane %v455_v51, 4  ;;  %2044 = vrsqrt.f32 %v2459_v61  ;;  %vm734_vm5 = vcmp.eq.f32.partialorder %v2459_v61, inf }
  0xd6   :  { %v2423_v3 = vpop.permute.xlu2 %197  ;;  %v568_v6 = vadd.f32 %v567_v62, %v566_v49  ;;  %v533_v16 = vsub.f32 %v2397_v1, %v517_v0  ;;  %v337_v35 = vadd.f32 %v321_v11, %v239_v17  ;;  %v608_v0 = vsel %vm391_vm0, %v550_v57, 0.0 }
  0xd7   :  { %v753_v5 = vmul.f32 %v2043_v41, %v752_v58  ;;  %v609_v14 = vrot.slane %v608_v0, 4  ;;  %2046 = vrsqrt.f32 %v2462_v48  ;;  %vm736_vm6 = vcmp.eq.f32.partialorder %v2459_v61, 0.0 }
  0xd8   :  { %v569_v15 = vrot.slane %v568_v6, 2  ;;  %v549_v29 = vmul.f32 %v533_v16, %v533_v16  ;;  %vm353_vm15 = vcmp.gt.f32.partialorder %v337_v35, 0.0  ;;  %v369_v34 = vmul.f32 0.2, %v337_v35 }
  0xd9   :  { %v194_v39 = vpop.permute.xlu1 %193  ;;  %v754_v7 = vmul.f32 0.5, %v753_v5  ;;  %v610_v32 = vadd.f32 %v609_v14, %v608_v0  ;;  %vm746_vm11 = vcmp.eq.f32.partialorder %v2462_v48, inf  ;;  %vm748_vm13 = vcmp.eq.f32.partialorder %v2462_v48, 0.0 }
  0xda   :  { %v570_v20 = vadd.f32 %v569_v15, %v568_v6  ;;  %v601_v21 = vsel %vm391_vm0, %v549_v29, 0.0  ;;  %v224_v36 = vmul.f32 %v2185_v22, %v194_v39  ;;  %v2449_v47 = vsel %vm353_vm15, %v337_v35, %v369_v34 }
  0xdb   :  { %v602_v53 = vrot.slane %v601_v21, 4  ;;  %1009 = vst.msk [vmem:[#allocation2 + $0xb4] sm:$0xf] %vm391_vm0, %v2449_v47  ;;  %v595_v6 = vrot.slane %v594_v52, 4  ;;  %v457_v15 = vadd.f32 %v456_v37, %v455_v51  ;;  %v755_v16 = vsub.f32 1.5, %v754_v7  ;;  %v2045_v33 = vpop.eup %2044 }
  0xdc   :  { %v571_v38 = vrot.slane %v570_v20, 1  ;;  %v240_v56 = vadd.f32 %v224_v36, %v142_v54  ;;  %1218 = vst.msk [vmem:[#allocation2 + $0x7c] sm:$0xf] %vm391_vm0, %v2449_v47  ;;  %v227_v35 = vmul.f32 %v2185_v22, %v2324_v10  ;;  %v761_v10 = vand.u32 2147483648, %v2435_v13 }
  0xdd   :  { %v603_v12 = vadd.f32 %v602_v53, %v601_v21  ;;  %v596_v39 = vadd.f32 %v595_v6, %v594_v52  ;;  %v756_v29 = vmul.f32 %v2043_v41, %v755_v16  ;;  %v458_v34 = vrot.slane %v457_v15, 2  ;;  %v2047_v19 = vpop.eup %2046 }
  0xde   :  { %v572_v49 = vadd.f32 %v571_v38, %v570_v20  ;;  %v128_v20 = vmul.f32 %v2191_v23, %v2252_v4  ;;  %v728_v38 = vmul.f32 %v2045_v33, %v2459_v61  ;;  %v127_v41 = vmul.f32 %v2191_v23, %v2410_v46 }
  0xdf   :  { %v2445_v40 = vpop.permute.xlu2 %111  ;;  %v604_v8 = vrot.slane %v603_v12, 2  ;;  %v757_v36 = vmul.f32 %v756_v29, %v2435_v13  ;;  %v597_v4 = vrot.slane %v596_v39, 2  ;;  %v740_v58 = vmul.f32 %v2047_v19, %v2462_v48 }
  0xe0   :  { %v672_v11 = vmul.f32 %v572_v49, %v2231_v55  ;;  %v729_v57 = vmul.f32 %v2045_v33, %v728_v38  ;;  %v459_v49 = vadd.f32 %v458_v34, %v457_v15  ;;  %v144_v46 = vadd.f32 %v2196_v25, %v128_v20 }
  0xe1   :  { %v605_v54 = vadd.f32 %v604_v8, %v603_v12  ;;  %v759_v44 = vsel %vm758_vm2, %v2435_v13, %v757_v36  ;;  %v741_v0 = vmul.f32 %v2047_v19, %v740_v58  ;;  %v598_v7 = vadd.f32 %v597_v4, %v596_v39 }
  0xe2   :  { %v292_v2 = vpop.permute.xlu1 %291  ;;  %v2468_v24 = vadd.f32 1e-08, %v672_v11  ;;  %v762_v52 = vsel %vm760_vm3, %v761_v10, %v759_v44  ;;  %v448_v8 = vsel %vm391_vm0, %v2393_v59, 0.0  ;;  %v143_v15 = vadd.f32 %v2196_v25, %v127_v41 }
  0xe3   :  { %v322_v62 = vmul.f32 %v2203_v27, %v292_v2  ;;  %v606_v51 = vrot.slane %v605_v54, 1  ;;  %v611_v2 = vrot.slane %v610_v32, 2  ;;  %v908_v12 = vsel %vm895_vm7, %v762_v52, 0.0 }
  0xe4   :  { %2048 = vrsqrt.f32 %v2468_v24  ;;  %909 = vadd.xlane.f32.xlu1 %v908_v12  ;;  %v225_v36 = vmul.f32 %v2185_v22, %v2423_v3  ;;  %v599_v12 = vrot.slane %v598_v7, 1  ;;  %vm722_vm9 = vcmp.eq.f32.partialorder %v2468_v24, inf }
  0xe5   :  { %v338_v42 = vadd.f32 %v322_v62, %v240_v56  ;;  %v730_v62 = vmul.f32 0.5, %v729_v57  ;;  %v607_v14 = vadd.f32 %v606_v51, %v605_v54  ;;  %v612_v29 = vadd.f32 %v611_v2, %v610_v32 }
  0xe6   :  { %v737_v32 = vand.u32 2147483648, %v2459_v61  ;;  %v449_v57 = vrot.slane %v448_v8, 4  ;;  %vm724_vm10 = vcmp.eq.f32.partialorder %v2468_v24, 0.0 }
  0xe7   :  { %vm354_vm1 = vcmp.gt.f32.partialorder %v338_v42, 0.0  ;;  %v370_v18 = vmul.f32 0.2, %v338_v42  ;;  %v677_v41 = vmul.f32 %v607_v14, %v2231_v55  ;;  %v600_v14 = vadd.f32 %v599_v12, %v598_v7 }
  0xe8   :  { %v300_v17 = vpop.permute.xlu2 %299  ;;  %v130_v7 = vmul.f32 %v2191_v23, %v2445_v40 }
  0xe9   :  { %v2474_v31 = vsel %vm354_vm1, %v338_v42, %v370_v18  ;;  %v731_v42 = vsub.f32 1.5, %v730_v62  ;;  %v742_v18 = vmul.f32 0.5, %v741_v0  ;;  %v324_v39 = vmul.f32 %v2203_v27, %v300_v17 }
  0xea   :  { %1219 = vst.msk [vmem:[#allocation2 + $0x88] sm:$0xf] %vm391_vm0, %v2474_v31  ;;  %v2049_v5 = vpop.eup %2048  ;;  %v613_v62 = vrot.slane %v612_v29, 1  ;;  %v725_v0 = vand.u32 2147483648, %v2468_v24 }
  0xeb   :  { %v107_v21 = vpop.permute.xlu1 %106  ;;  %v716_v11 = vmul.f32 %v2049_v5, %v2468_v24  ;;  %v732_v20 = vmul.f32 %v2045_v33, %v731_v42 }
  0xec   :  { %v129_v53 = vmul.f32 %v2191_v23, %v107_v21  ;;  %v460_v21 = vrot.slane %v459_v49, 1 }
  0xed   :  { %v733_v4 = vmul.f32 %v732_v20, %v2459_v61  ;;  %v450_v20 = vadd.f32 %v449_v57, %v448_v8 }
  0xee   :  { %v145_v56 = vadd.f32 %v2196_v25, %v129_v53  ;;  %v743_v53 = vsub.f32 1.5, %v742_v18 }
  0xef   :  { %v735_v3 = vsel %vm734_vm5, %v2459_v61, %v733_v4  ;;  %v451_v23 = vrot.slane %v450_v20, 2 }
  0xf0   :  { %v304_v37 = vpop.permute.xlu2 %303  ;;  %v243_v6 = vadd.f32 %v227_v35, %v145_v56  ;;  %v717_v35 = vmul.f32 %v2049_v5, %v716_v11  ;;  %v738_v51 = vsel %vm736_vm6, %v737_v32, %v735_v3  ;;  %v744_v2 = vmul.f32 %v2047_v19, %v743_v53  ;;  %v308_v3 = vpop.permute.xlu0 %307 }
  0xf1   :  { %v325_v13 = vmul.f32 %v2203_v27, %v304_v37  ;;  %v902_v52 = vsel %vm895_vm7, %v738_v51, 0.0  ;;  %v461_v37 = vadd.f32 %v460_v21, %v459_v49  ;;  %v614_v21 = vadd.f32 %v613_v62, %v612_v29 }
  0xf2   :  { %v718_v10 = vmul.f32 0.5, %v717_v35  ;;  %903 = vadd.xlane.f32.xlu0 %v902_v52  ;;  %v745_v11 = vmul.f32 %v744_v2, %v2462_v48  ;;  %v469_v29 = vsel %vm391_vm0, %v2474_v31, 0.0  ;;  %v326_v12 = vmul.f32 %v2203_v27, %v308_v3 }
  0xf3   :  { %v341_v16 = vadd.f32 %v325_v13, %v243_v6  ;;  %v2512_v6 = vadd.f32 1e-08, %v677_v41  ;;  %v241_v13 = vadd.f32 %v225_v36, %v143_v15  ;;  %v678_v53 = vmul.f32 %v614_v21, %v2231_v55 }
  0xf4   :  { %v202_v34 = vpop.permute.xlu1 %201  ;;  %v719_v44 = vsub.f32 1.5, %v718_v10  ;;  %v747_v35 = vsel %vm746_vm11, %v2462_v48, %v745_v11  ;;  %v146_v41 = vadd.f32 %v2196_v25, %v130_v7  ;;  %v462_v25 = vsel %vm391_vm0, %v2449_v47, 0.0 }
  0xf5   :  { %vm357_vm4 = vcmp.gt.f32.partialorder %v341_v16, 0.0  ;;  %v373_v38 = vmul.f32 0.2, %v341_v16  ;;  %v226_v54 = vmul.f32 %v2185_v22, %v202_v34  ;;  %2050 = vrsqrt.f32 %v2512_v6 }
  0xf6   :  { %v720_v58 = vmul.f32 %v2049_v5, %v719_v44  ;;  %v520_v34 = vmul.f32 %v2231_v55, %v461_v37  ;;  %v2550_v52 = vadd.f32 1e-08, %v678_v53  ;;  %vm782_vm15 = vcmp.eq.f32.partialorder %v2512_v6, inf }
  0xf7   :  { %v2504_v33 = vsel %vm357_vm4, %v341_v16, %v373_v38  ;;  %v242_v17 = vadd.f32 %v226_v54, %v144_v46  ;;  %v676_v38 = vmul.f32 %v600_v14, %v2231_v55  ;;  %v785_v14 = vand.u32 2147483648, %v2512_v6 }
  0xf8   :  { %1222 = vst.msk [vmem:[#allocation2 + $0xac] sm:$0xf] %vm391_vm0, %v2504_v33  ;;  %v721_v46 = vmul.f32 %v720_v58, %v2468_v24  ;;  %v536_v40 = vsub.f32 %v2420_v63, %v520_v34  ;;  %vm784_vm1 = vcmp.eq.f32.partialorder %v2512_v6, 0.0  ;;  %vm968_vm4 = vcmask 330752  }
  0xf9   :  { %v340_v56 = vadd.f32 %v324_v39, %v242_v17  ;;  %v749_v39 = vand.u32 2147483648, %v2462_v48  ;;  %v2540_v10 = vadd.f32 1e-08, %v676_v38  ;;  %v470_v17 = vrot.slane %v469_v29, 4  ;;  %969 = vst.msk [vmem:[#allocation2 + $0x8] sm:$0xf] %vm968_vm4, %v2078_v60 }
  0xfa   :  { %v723_v49 = vsel %vm722_vm9, %v2468_v24, %v721_v46  ;;  %v552_v58 = vmul.f32 %v536_v40, %v536_v40  ;;  %vm794_vm5 = vcmp.eq.f32.partialorder %v2550_v52, inf  ;;  %971 = vst.msk [vmem:[#allocation2 + $0x14] sm:$0xf] %vm968_vm4, %v2078_v60  ;;  %vm796_vm6 = vcmp.eq.f32.partialorder %v2550_v52, 0.0 }
  0xfb   :  { %vm356_vm8 = vcmp.gt.f32.partialorder %v340_v56, 0.0  ;;  %v372_v61 = vmul.f32 0.2, %v340_v56  ;;  %v726_v15 = vsel %vm724_vm10, %v725_v0, %v723_v49  ;;  %v2051_v36 = vpop.eup %2050  ;;  %v750_v54 = vsel %vm748_vm13, %v749_v39, %v747_v35  ;;  %977 = vst.msk [vmem:[#allocation2 + $0x38] sm:$0xf] %vm968_vm4, %v2078_v60 }
  0xfc   :  { %v899_v16 = vsel %vm895_vm7, %v726_v15, 0.0  ;;  %v776_v8 = vmul.f32 %v2051_v36, %v2512_v6  ;;  %2052 = vrsqrt.f32 %v2540_v10  ;;  %v905_v44 = vsel %vm895_vm7, %v750_v54, 0.0  ;;  %979 = vst.msk [vmem:[#allocation2 + $0x44] sm:$0xf] %vm968_vm4, %v2078_v60 }
  0xfd   :  { %v296_v42 = vpop.permute.xlu1 %295  ;;  %v2519_v19 = vsel %vm356_vm8, %v340_v56, %v372_v61  ;;  %900 = vadd.xlane.f32.xlu2 %v899_v16  ;;  %v452_v56 = vadd.f32 %v451_v23, %v450_v20  ;;  %2054 = vrsqrt.f32 %v2550_v52  ;;  %v471_v37 = vadd.f32 %v470_v17, %v469_v29  ;;  %973 = vst.msk [vmem:[#allocation2 + $0x20] sm:$0xf] %vm968_vm4, %v2078_v60 }
  0xfe   :  { %v323_v5 = vmul.f32 %v2203_v27, %v296_v42  ;;  %1221 = vst.msk [vmem:[#allocation2 + $0xa0] sm:$0xf] %vm391_vm0, %v2519_v19  ;;  %v777_v32 = vmul.f32 %v2051_v36, %v776_v8  ;;  %v463_v49 = vrot.slane %v462_v25, 4  ;;  %vm770_vm2 = vcmp.eq.f32.partialorder %v2540_v10, inf }
  0xff   :  { %v453_v0 = vrot.slane %v452_v56, 1  ;;  %v472_v11 = vrot.slane %v471_v37, 2  ;;  %v773_v3 = vand.u32 2147483648, %v2540_v10  ;;  %vm772_vm3 = vcmp.eq.f32.partialorder %v2540_v10, 0.0  ;;  %975 = vst.msk [vmem:[#allocation2 + $0x2c] sm:$0xf] %vm968_vm4, %v2078_v60 }
 0x100   :  { %v339_v18 = vadd.f32 %v323_v5, %v241_v13  ;;  %v778_v57 = vmul.f32 0.5, %v777_v32  ;;  %v464_v7 = vadd.f32 %v463_v49, %v462_v25  ;;  %981 = vst.msk [vmem:[#allocation2 + $0x50] sm:$0xf] %vm968_vm4, %v2078_v60  ;;  %vm1010_vm9 = vcmask 265472  }
 0x101   :  { %v473_v39 = vadd.f32 %v472_v11, %v471_v37  ;;  %983 = vst.msk [vmem:[#allocation2 + $0x5c] sm:$0xf] %vm968_vm4, %v2078_v60  ;;  %vm1082_vm10 = vcmask 273672   ;;  %vm1195_vm11 = vcmask 290072  }
 0x102   :  { %vm355_vm12 = vcmp.gt.f32.partialorder %v339_v18, 0.0  ;;  %v371_v24 = vmul.f32 0.2, %v339_v18  ;;  %v779_v2 = vsub.f32 1.5, %v778_v57  ;;  %v2053_v13 = vpop.eup %2052  ;;  %v465_v23 = vrot.slane %v464_v7, 2 }
 0x103   :  { %v764_v42 = vmul.f32 %v2053_v13, %v2540_v10  ;;  %v2055_v16 = vpop.eup %2054  ;;  %v474_v40 = vrot.slane %v473_v39, 1  ;;  %985 = vst.msk [vmem:[#allocation2 + $0x68] sm:$0xf] %vm968_vm4, %v2078_v60 }
 0x104   :  { %v2534_v4 = vsel %vm355_vm12, %v339_v18, %v371_v24  ;;  %v780_v61 = vmul.f32 %v2051_v36, %v779_v2  ;;  %v454_v24 = vadd.f32 %v453_v0, %v452_v56  ;;  %v788_v38 = vmul.f32 %v2055_v16, %v2550_v52  ;;  %987 = vst.msk [vmem:[#allocation2 + $0x74] sm:$0xf] %vm968_vm4, %v2078_v60 }
 0x105   :  { %1220 = vst.msk [vmem:[#allocation2 + $0x94] sm:$0xf] %vm391_vm0, %v2534_v4  ;;  %906 = vadd.xlane.f32.xlu2 %v905_v44  ;;  %v765_v15 = vmul.f32 %v2053_v13, %v764_v42  ;;  %v475_v56 = vadd.f32 %v474_v40, %v473_v39  ;;  %v797_v0 = vand.u32 2147483648, %v2550_v52  ;;  %vm1224_vm12 = vcmask 298272  }
 0x106   :  { %v210_v48 = vpop.permute.xlu1 %209  ;;  %1036 = vrot.lane.b32.xlu0 %v2300_v45, %s2079_s24  ;;  %v781_v27 = vmul.f32 %v780_v61, %v2512_v6  ;;  %v789_v54 = vmul.f32 %v2055_v16, %v788_v38  ;;  %989 = vst.msk [vmem:[#allocation2 + $0x80] sm:$0xf] %vm968_vm4, %v2078_v60 }
 0x107   :  { %v228_v51 = vmul.f32 %v2185_v22, %v210_v48  ;;  %v622_v22 = vsel %vm391_vm0, %v552_v58, 0.0  ;;  %v766_v36 = vmul.f32 0.5, %v765_v15  ;;  %v522_v61 = vmul.f32 %v2231_v55, %v475_v56  ;;  %991 = vst.msk [vmem:[#allocation2 + $0x8c] sm:$0xf] %vm968_vm4, %v2078_v60 }
 0x108   :  { %v623_v18 = vrot.slane %v622_v22, 4  ;;  %v783_v21 = vsel %vm782_vm15, %v2512_v6, %v781_v27  ;;  %v519_v6 = vmul.f32 %v2231_v55, %v454_v24  ;;  %v790_v32 = vmul.f32 0.5, %v789_v54  ;;  %993 = vst.msk [vmem:[#allocation2 + $0x98] sm:$0xf] %vm968_vm4, %v2078_v60 }
 0x109   :  { %v244_v62 = vadd.f32 %v228_v51, %v146_v41  ;;  %v786_v34 = vsel %vm784_vm1, %v785_v14, %v783_v21  ;;  %v767_v29 = vsub.f32 1.5, %v766_v36  ;;  %v466_v51 = vadd.f32 %v465_v23, %v464_v7  ;;  %995 = vst.msk [vmem:[#allocation2 + $0xa4] sm:$0xf] %vm968_vm4, %v2078_v60 }
 0x10a   :  { %v914_v35 = vsel %vm895_vm7, %v786_v34, 0.0  ;;  %v624_v8 = vadd.f32 %v623_v18, %v622_v22  ;;  %v791_v17 = vsub.f32 1.5, %v790_v32  ;;  %v535_v44 = vsub.f32 %v2393_v59, %v519_v6  ;;  %997 = vst.msk [vmem:[#allocation2 + $0xb0] sm:$0xf] %vm968_vm4, %v2078_v60 }
 0x10b   :  { %v342_v46 = vadd.f32 %v326_v12, %v244_v62  ;;  %915 = vadd.xlane.f32.xlu1 %v914_v35  ;;  %v768_v53 = vmul.f32 %v2053_v13, %v767_v29  ;;  %v2081_v13 = vmov 32.0   ;;  %999 = vst.msk [vmem:[#allocation2 + $0xbc] sm:$0xf] %vm968_vm4, %v2078_v60  ;;  %vm1132_vm4 = vcmask 281872  }
 0x10c   :  { %v625_v41 = vrot.slane %v624_v8, 2  ;;  %v792_v2 = vmul.f32 %v2055_v16, %v791_v17  ;;  %v551_v37 = vmul.f32 %v535_v44, %v535_v44  ;;  %2056 = vrcp.f32 %v2081_v13 }
 0x10d   :  { %vm358_vm14 = vcmp.gt.f32.partialorder %v342_v46, 0.0  ;;  %v374_v5 = vmul.f32 0.2, %v342_v46  ;;  %v769_v48 = vmul.f32 %v768_v53, %v2540_v10 }
 0x10e   :  { %1101 = vrot.lane.b32.xlu0 %v2346_v50, %s2080_s25  ;;  %v626_v12 = vadd.f32 %v625_v41, %v624_v8  ;;  %v793_v25 = vmul.f32 %v792_v2, %v2550_v52  ;;  %v615_v49 = vsel %vm391_vm0, %v551_v37, 0.0 }
 0x10f   :  { %v2565_v20 = vsel %vm358_vm14, %v342_v46, %v374_v5  ;;  %v771_v57 = vsel %vm770_vm2, %v2540_v10, %v769_v48  ;;  %v467_v10 = vrot.slane %v466_v51, 1  ;;  %v538_v5 = vsub.f32 %v2474_v31, %v522_v61 }
 0x110   :  { %1223 = vst.msk [vmem:[#allocation2 + $0xb8] sm:$0xf] %vm391_vm0, %v2565_v20  ;;  %v774_v58 = vsel %vm772_vm3, %v773_v3, %v771_v57  ;;  %v795_v46 = vsel %vm794_vm5, %v2550_v52, %v793_v25  ;;  %v627_v22 = vrot.slane %v626_v12, 1  ;;  %v616_v16 = vrot.slane %v615_v49, 4 }
 0x111   :  { %v911_v62 = vsel %vm895_vm7, %v774_v58, 0.0  ;;  %v798_v42 = vsel %vm796_vm6, %v797_v0, %v795_v46  ;;  %v468_v27 = vadd.f32 %v467_v10, %v466_v51  ;;  %v554_v21 = vmul.f32 %v538_v5, %v538_v5 }
 0x112   :  { %912 = vadd.xlane.f32.xlu2 %v911_v62  ;;  %v2057_v11 = vpop.eup %2056  ;;  %v917_v52 = vsel %vm895_vm7, %v798_v42, 0.0  ;;  %v628_v14 = vadd.f32 %v627_v22, %v626_v12  ;;  %v617_v36 = vadd.f32 %v616_v16, %v615_v49  ;;  %v476_v46 = vsel %vm391_vm0, %v2534_v4, 0.0 }
 0x113   :  { %v945_v15 = vmul.f32 32.0, %v2057_v11  ;;  %v521_v18 = vmul.f32 %v2231_v55, %v468_v27  ;;  %v636_v39 = vsel %vm391_vm0, %v554_v21, 0.0  ;;  %vm949_vm8 = vweird.f32 %v2057_v11 }
 0x114   :  { %v680_v24 = vmul.f32 %v628_v14, %v2231_v55  ;;  %v618_v29 = vrot.slane %v617_v36, 2  ;;  %v637_v54 = vrot.slane %v636_v39, 4  ;;  %v477_v42 = vrot.slane %v476_v46, 4 }
 0x115   :  { %v946_v34 = vsub.f32 1.0, %v945_v15  ;;  %v537_v7 = vsub.f32 %v2449_v47, %v521_v18  ;;  %v497_v15 = vsel %vm391_vm0, %v2565_v20, 0.0 }
 0x116   :  { %1276 = vrot.lane.b32.xlu0 %v2278_v26, %s2080_s25  ;;  %v2630_v38 = vadd.f32 1e-08, %v680_v24  ;;  %v619_v23 = vadd.f32 %v618_v29, %v617_v36  ;;  %v638_v40 = vadd.f32 %v637_v54, %v636_v39  ;;  %v478_v5 = vadd.f32 %v477_v42, %v476_v46 }
 0x117   :  { %v947_v35 = vmul.f32 %v2057_v11, %v946_v34  ;;  %v553_v6 = vmul.f32 %v537_v7, %v537_v7  ;;  %v498_v34 = vrot.slane %v497_v15, 4 }
 0x118   :  { %2058 = vrsqrt.f32 %v2630_v38  ;;  %v620_v3 = vrot.slane %v619_v23, 1  ;;  %v639_v44 = vrot.slane %v638_v40, 2  ;;  %v479_v18 = vrot.slane %v478_v5, 2 }
 0x119   :  { %v948_v8 = vadd.f32 %v2057_v11, %v947_v35  ;;  %v629_v32 = vsel %vm391_vm0, %v553_v6, 0.0  ;;  %vm818_vm13 = vcmp.eq.f32.partialorder %v2630_v38, inf  ;;  %v821_v7 = vand.u32 2147483648, %v2630_v38 }
 0x11a   :  { %918 = vadd.xlane.f32.xlu2 %v917_v52  ;;  %v630_v17 = vrot.slane %v629_v32, 4  ;;  %v621_v51 = vadd.f32 %v620_v3, %v619_v23  ;;  %v640_v58 = vadd.f32 %v639_v44, %v638_v40  ;;  %v480_v36 = vadd.f32 %v479_v18, %v478_v5 }
 0x11b   :  { %v2637_v53 = vsel %vm949_vm8, %v2057_v11, %v948_v8  ;;  %v499_v8 = vadd.f32 %v498_v34, %v497_v15  ;;  %vm820_vm14 = vcmp.eq.f32.partialorder %v2630_v38, 0.0  ;;  %vm1263_vm8 = vcmask 306472  }
 0x11c   :  { %v631_v56 = vadd.f32 %v630_v17, %v629_v32  ;;  %v641_v62 = vrot.slane %v640_v58, 1  ;;  %v679_v25 = vmul.f32 %v621_v51, %v2231_v55  ;;  %v481_v23 = vrot.slane %v480_v36, 1 }
 0x11d   :  { %v500_v40 = vrot.slane %v499_v8, 2 }
 0x11e   :  { %1149 = vrot.lane.b32.xlu0 %v2300_v45, %s2082_s26  ;;  %v2059_v48 = vpop.eup %2058  ;;  %v632_v12 = vrot.slane %v631_v56, 2  ;;  %v642_v10 = vadd.f32 %v641_v62, %v640_v58  ;;  %v2653_v61 = vadd.f32 1e-08, %v679_v25 }
 0x11f   :  { %v812_v57 = vmul.f32 %v2059_v48, %v2630_v38  ;;  %v501_v3 = vadd.f32 %v500_v40, %v499_v8 }
 0x120   :  { %v633_v13 = vadd.f32 %v632_v12, %v631_v56  ;;  %2060 = vrsqrt.f32 %v2653_v61  ;;  %v682_v49 = vmul.f32 %v642_v10, %v2231_v55  ;;  %vm806_vm15 = vcmp.eq.f32.partialorder %v2653_v61, inf }
 0x121   :  { %v813_v2 = vmul.f32 %v2059_v48, %v812_v57  ;;  %v483_v57 = vsel %vm391_vm0, %v2519_v19, 0.0  ;;  %v502_v56 = vrot.slane %v501_v3, 1  ;;  %v809_v15 = vand.u32 2147483648, %v2653_v61 }
 0x122   :  { %v634_v22 = vrot.slane %v633_v13, 1  ;;  %v2663_v11 = vadd.f32 1e-08, %v682_v49  ;;  %v484_v62 = vrot.slane %v483_v57, 4  ;;  %vm808_vm1 = vcmp.eq.f32.partialorder %v2653_v61, 0.0 }
 0x123   :  { %v814_v37 = vmul.f32 0.5, %v813_v2 }
 0x124   :  { %1038 = vrot.lane.b32.xlu1 %v2322_v9, %s2079_s24  ;;  %v635_v52 = vadd.f32 %v634_v22, %v633_v13  ;;  %2062 = vrsqrt.f32 %v2663_v11  ;;  %v485_v42 = vadd.f32 %v484_v62, %v483_v57  ;;  %vm842_vm2 = vcmp.eq.f32.partialorder %v2663_v11, inf }
 0x125   :  { %v815_v0 = vsub.f32 1.5, %v814_v37  ;;  %v503_v37 = vadd.f32 %v502_v56, %v501_v3  ;;  %vm844_vm3 = vcmp.eq.f32.partialorder %v2663_v11, 0.0 }
 0x126   :  { %1155 = vrot.lane.b32.xlu0 %v2397_v1, %s2082_s26  ;;  %v2061_v14 = vpop.eup %2060  ;;  %v681_v21 = vmul.f32 %v635_v52, %v2231_v55  ;;  %v486_v18 = vrot.slane %v485_v42, 2 }
 0x127   :  { %v816_v27 = vmul.f32 %v2059_v48, %v815_v0  ;;  %v800_v24 = vmul.f32 %v2061_v14, %v2653_v61  ;;  %v482_v48 = vadd.f32 %v481_v23, %v480_v36 }
 0x128   :  { %v2676_v39 = vadd.f32 1e-08, %v681_v21  ;;  %v487_v8 = vadd.f32 %v486_v18, %v485_v42 }
 0x129   :  { %v817_v16 = vmul.f32 %v816_v27, %v2630_v38  ;;  %v801_v29 = vmul.f32 %v2061_v14, %v800_v24  ;;  %v523_v51 = vmul.f32 %v2231_v55, %v482_v48  ;;  %v526_v27 = vmul.f32 %v2231_v55, %v503_v37 }
 0x12a   :  { %v2063_v54 = vpop.eup %2062  ;;  %2064 = vrsqrt.f32 %v2676_v39  ;;  %v488_v48 = vrot.slane %v487_v8, 1  ;;  %vm830_vm5 = vcmp.eq.f32.partialorder %v2676_v39, inf  ;;  %v833_v37 = vand.u32 2147483648, %v2676_v39 }
 0x12b   :  { %v819_v35 = vsel %vm818_vm13, %v2630_v38, %v817_v16  ;;  %v539_v25 = vsub.f32 %v2534_v4, %v523_v51  ;;  %v490_v16 = vsel %vm391_vm0, %v2504_v33, 0.0  ;;  %v542_v24 = vsub.f32 %v2565_v20, %v526_v27 }
 0x12c   :  { %1103 = vrot.lane.b32.xlu1 %v2397_v1, %s2080_s25  ;;  %v822_v6 = vsel %vm820_vm14, %v821_v7, %v819_v35  ;;  %v491_v7 = vrot.slane %v490_v16, 4  ;;  %vm832_vm6 = vcmp.eq.f32.partialorder %v2676_v39, 0.0  ;;  %vm1300_vm13 = vcmask 314672  }
 0x12d   :  { %v923_v32 = vsel %vm895_vm7, %v822_v6, 0.0  ;;  %v555_v49 = vmul.f32 %v539_v25, %v539_v25  ;;  %vm1331_vm14 = vcmask 322872  }
 0x12f   :  { %v643_v34 = vsel %vm391_vm0, %v555_v49, 0.0 }
 0x130   :  { %v2065_v44 = vpop.eup %2064  ;;  %v644_v6 = vrot.slane %v643_v34, 4 }
 0x131   :  { %v898_v41 = vpop.xlane.xlu1 %897  ;;  %v824_v12 = vmul.f32 %v2065_v44, %v2676_v39 }
 0x132   :  { %v951_v60 = vmul.f32 %v2637_v53, %v898_v41  ;;  %1034 = vrot.lane.b32.xlu2 %v2377_v30, %s2079_s24  ;;  %v802_v41 = vmul.f32 0.5, %v801_v29  ;;  %v645_v3 = vadd.f32 %v644_v6, %v643_v34 }
 0x133   :  { %v825_v0 = vmul.f32 %v2065_v44, %v824_v12 }
 0x134   :  { %1011 = vst.msk [vmem:[#allocation2 + $0x44] sm:$0xf] %vm1010_vm9, %v951_v60  ;;  %1147 = vrot.lane.b32.xlu1 %v2377_v30, %s2082_s26  ;;  %v803_v17 = vsub.f32 1.5, %v802_v41  ;;  %v492_v41 = vadd.f32 %v491_v7, %v490_v16  ;;  %v646_v12 = vrot.slane %v645_v3, 2 }
 0x135   :  { %1083 = vst.msk [vmem:[#allocation2 + $0x38] sm:$0xf] %vm1082_vm10, %v951_v60 }
 0x136   :  { %1196 = vst.msk [vmem:[#allocation2 + $0x14] sm:$0xf] %vm1195_vm11, %v951_v60  ;;  %v804_v58 = vmul.f32 %v2061_v14, %v803_v17  ;;  %v826_v14 = vmul.f32 0.5, %v825_v0 }
 0x137   :  { %1225 = vst.msk [vmem:[#allocation2 + $0x8] sm:$0xf] %vm1224_vm12, %v951_v60  ;;  %v836_v60 = vmul.f32 %v2063_v54, %v2663_v11 }
 0x138   :  { %v805_v10 = vmul.f32 %v804_v58, %v2653_v61  ;;  %v827_v36 = vsub.f32 1.5, %v826_v14  ;;  %v489_v58 = vadd.f32 %v488_v48, %v487_v8 }
 0x139   :  { %v837_v38 = vmul.f32 %v2063_v54, %v836_v60  ;;  %v845_v60 = vand.u32 2147483648, %v2663_v11 }
 0x13a   :  { %1145 = vrot.lane.b32.xlu2 %v2218_v43, %s2082_s26  ;;  %v807_v5 = vsel %vm806_vm15, %v2653_v61, %v805_v10  ;;  %v558_v61 = vmul.f32 %v542_v24, %v542_v24  ;;  %v647_v10 = vadd.f32 %v646_v12, %v645_v3  ;;  %vm1069_vm15 = vcmask 519424  }
 0x13b   :  { %v838_v2 = vmul.f32 0.5, %v837_v38  ;;  %v810_v21 = vsel %vm808_vm1, %v809_v15, %v807_v5  ;;  %vm1122_vm1 = vcmask 781824  }
 0x13c   :  { %1153 = vrot.lane.b32.xlu1 %v2346_v50, %s2082_s26  ;;  %v664_v38 = vsel %vm391_vm0, %v558_v61, 0.0  ;;  %v648_v27 = vrot.slane %v647_v10, 1 }
 0x13d   :  { %v839_v46 = vsub.f32 1.5, %v838_v2  ;;  %v665_v62 = vrot.slane %v664_v38, 4 }
 0x13e   :  { %v649_v16 = vadd.f32 %v648_v27, %v647_v10 }
 0x13f   :  { %v840_v52 = vmul.f32 %v2063_v54, %v839_v46  ;;  %v920_v54 = vsel %vm895_vm7, %v810_v21, 0.0  ;;  %v666_v46 = vadd.f32 %v665_v62, %v664_v38  ;;  %v1563_v38 = vld [vmem:[%s3478_s1 + $0x130] sm:$0x1] }
 0x141   :  { %v841_v35 = vmul.f32 %v840_v52, %v2663_v11  ;;  %v667_v5 = vrot.slane %v666_v46, 2 }
 0x142   :  { %1151 = vrot.lane.b32.xlu2 %v2278_v26, %s2082_s26 }
 0x143   :  { %v843_v40 = vsel %vm842_vm2, %v2663_v11, %v841_v35  ;;  %v668_v18 = vadd.f32 %v667_v5, %v666_v46  ;;  %vm1598_vm2 = vcmask 1043456   ;;  %v1558_v5 = vld [vmem:[%s3478_s1 + $0x108] sm:$0xff] }
 0x144   :  { %v846_v17 = vsel %vm844_vm3, %v845_v60, %v843_v40  ;;  %vm1599_vm3 = vcmask 1044480  }
 0x145   :  { %v929_v2 = vsel %vm895_vm7, %v846_v17, 0.0  ;;  %v669_v24 = vrot.slane %v668_v18, 1  ;;  %v1562_v17 = vld [vmem:[%s3478_s1 + $0x128] sm:$0xff] }
 0x147   :  { %v670_v6 = vadd.f32 %v669_v24, %v668_v18 }
 0x149   :  { %v686_v40 = vmul.f32 %v670_v6, %v2231_v55  ;;  %v1554_v6 = vld [vmem:[%s3478_s1 + $0xe8] sm:$0xff] }
 0x14a   :  { %1310 = vrot.lane.b32.xlu2 %v2372_v28, %s2082_s26 }
 0x150   :  { %924 = vadd.xlane.f32.xlu0 %v923_v32  ;;  %v828_v32 = vmul.f32 %v2065_v44, %v827_v36  ;;  %v493_v44 = vrot.slane %v492_v41, 2 }
 0x152   :  { %v829_v57 = vmul.f32 %v828_v32, %v2676_v39  ;;  %v494_v25 = vadd.f32 %v493_v44, %v492_v41 }
 0x154   :  { %v831_v11 = vsel %vm830_vm5, %v2676_v39, %v829_v57  ;;  %v495_v42 = vrot.slane %v494_v25, 1  ;;  %v1582_v57 = vpack.c.bf16 %v1563_v38, %v1562_v17  ;;  %vm1182_vm5 = vcmask 1044224   ;;  %v1552_v17 = vld [vmem:[%s3478_s1 + $0xd8] sm:$0xff]  ;;  %v1553_v38 = vld [vmem:[%s3478_s1 + $0xe0] sm:$0xff] }
 0x155   :  { %v834_v0 = vsel %vm832_vm6, %v833_v37, %v831_v11  ;;  %v1556_v37 = vld [vmem:[%s3478_s1 + $0xf8] sm:$0xff]  ;;  %vm1353_vm6 = vcmask 331072  }
 0x156   :  { %v926_v49 = vsel %vm895_vm7, %v834_v0, 0.0 }
 0x157   :  { %v910_v13 = vpop.xlane.xlu1 %909 }
 0x158   :  { %v2691_v22 = vmul.f32 %v2637_v53, %v910_v13  ;;  %v524_v13 = vmul.f32 %v2231_v55, %v489_v58  ;;  %v1561_v58 = vld [vmem:[%s3478_s1 + $0x120] sm:$0xff] }
 0x15a   :  { %1014 = vst.msk [vmem:[#allocation2 + $0x74] sm:$0xf] %vm1010_vm9, %v2691_v22  ;;  %v540_v39 = vsub.f32 %v2519_v19, %v524_v13  ;;  %v1557_v13 = vld [vmem:[%s3478_s1 + $0x100] sm:$0xff] }
 0x15b   :  { %1087 = vst.msk [vmem:[#allocation2 + $0x68] sm:$0xf] %vm1082_vm10, %v2691_v22  ;;  %v1579_v0 = vpack.c.bf16 %v1557_v13, %v1556_v37 }
 0x15c   :  { %v556_v15 = vmul.f32 %v540_v39, %v540_v39 }
 0x15d   :  { %1634 = vmatpush.bf16.msra.mxu1 %v1579_v0 }
 0x164   :  { %1044 = vrot.lane.b32.xlu0 %v2397_v1, %s2079_s24 }
 0x165   :  { %v904_v29 = vpop.xlane.xlu0 %903 }
 0x166   :  { %v2711_v23 = vmul.f32 %v2637_v53, %v904_v29  ;;  %921 = vadd.xlane.f32.xlu1 %v920_v54 }
 0x168   :  { %1013 = vst.msk [vmem:[#allocation2 + $0x5c] sm:$0xf] %vm1010_vm9, %v2711_v23 }
 0x169   :  { %1198 = vst.msk [vmem:[#allocation2 + $0x2c] sm:$0xf] %vm1195_vm11, %v2711_v23 }
 0x16c   :  { %1042 = vrot.lane.b32.xlu0 %v2346_v50, %s2079_s24 }
 0x16e   :  { %930 = vadd.xlane.f32.xlu1 %v929_v2  ;;  %v1540_v2 = vld [vmem:[%s3478_s1 + $0x78] sm:$0xff] }
 0x170   :  { %v901_v51 = vpop.xlane.xlu2 %900 }
 0x171   :  { %v952_v56 = vmul.f32 %v2637_v53, %v901_v51  ;;  %v2083_v51 = vmov 65535  }
 0x172   :  { %v1600_v44 = vsel %vm1598_vm2, 4294967295, %v2083_v51 }
 0x173   :  { %1084 = vst.msk [vmem:[#allocation2 + $0x44] sm:$0xf] %vm1082_vm10, %v952_v56  ;;  %927 = vadd.xlane.f32.xlu2 %v926_v49  ;;  %v1601_v11 = vsel %vm1599_vm3, %v1600_v44, 0 }
 0x174   :  { %1133 = vst.msk [vmem:[#allocation2 + $0x38] sm:$0xf] %vm1132_vm4, %v952_v56  ;;  %1099 = vrot.lane.b32.xlu0 %v2322_v9, %s2080_s25  ;;  %v496_v9 = vadd.f32 %v495_v42, %v494_v25  ;;  %v1541_v25 = vld [vmem:[%s3478_s1 + $0x80] sm:$0xff]  ;;  %v1603_v10 = vand.u32 %v1601_v11, %v1582_v57  ;;  %v1551_v11 = vld [vmem:[%s3478_s1 + $0xd0] sm:$0xff] }
 0x175   :  { %1134 = vst.msk [vmem:[#allocation2 + $0x44] sm:$0xf] %vm1132_vm4, %v2711_v23  ;;  %v1571_v46 = vpack.c.bf16 %v1541_v25, %v1540_v2 }
 0x176   :  { %1199 = vst.msk [vmem:[#allocation2 + $0x44] sm:$0xf] %vm1195_vm11, %v2691_v22  ;;  %v525_v34 = vmul.f32 %v2231_v55, %v496_v9  ;;  %1668 = vmatpush.bf16.msra.mxu2 %v1603_v10  ;;  %v1559_v9 = vld [vmem:[%s3478_s1 + $0x110] sm:$0xff] }
 0x177   :  { %1226 = vst.msk [vmem:[#allocation2 + $0x14] sm:$0xf] %vm1224_vm12, %v952_v56  ;;  %1605 = vmatpush.bf16.msra.mxu0 %v1571_v46 }
 0x178   :  { %1229 = vst.msk [vmem:[#allocation2 + $0x38] sm:$0xf] %vm1224_vm12, %v2691_v22  ;;  %v1037_v52 = vpop.permute.xlu0 %1036  ;;  %v907_v14 = vpop.xlane.xlu2 %906  ;;  %v541_v7 = vsub.f32 %v2504_v33, %v525_v34 }
 0x179   :  { %1264 = vst.msk [vmem:[#allocation2 + $0x8] sm:$0xf] %vm1263_vm8, %v952_v56  ;;  %v954_v21 = vmul.f32 %v2637_v53, %v907_v14  ;;  %v1580_v14 = vpack.c.bf16 %v1559_v9, %v1558_v5 }
 0x17a   :  { %1265 = vst.msk [vmem:[#allocation2 + $0x14] sm:$0xf] %vm1263_vm8, %v2711_v23 }
 0x17b   :  { %1301 = vst.msk [vmem:[#allocation2 + $0x14] sm:$0xf] %vm1300_vm13, %v2691_v22 }
 0x17c   :  { %1332 = vst.msk [vmem:[#allocation2 + $0x8] sm:$0xf] %vm1331_vm14, %v2691_v22  ;;  %1278 = vrot.lane.b32.xlu0 %v2393_v59, %s2080_s25  ;;  %v683_v22 = vmul.f32 %v649_v16, %v2231_v55 }
 0x17d   :  { %1344 = vst.msk [vmem:[#allocation2 + $0x8] sm:$0xf] %vm391_vm0, %v2346_v50  ;;  %v650_v50 = vsel %vm391_vm0, %v556_v15, 0.0 }
 0x17e   :  { %1072 = vst.msk [vmem:[#allocation2 + $0x48] sm:$0xf] %vm1069_vm15, %v1037_v52  ;;  %v916_v35 = vpop.xlane.xlu1 %915  ;;  %v651_v8 = vrot.slane %v650_v50, 4  ;;  %v2777_v54 = vadd.f32 1e-08, %v683_v22 }
 0x17f   :  { %1252 = vst.msk [vmem:[#allocation2 + $0x10] sm:$0xf] %vm1069_vm15, %v1037_v52  ;;  %v2770_v36 = vmul.f32 %v2637_v53, %v916_v35 }
 0x180   :  { %1012 = vst.msk [vmem:[#allocation2 + $0x50] sm:$0xf] %vm1010_vm9, %v952_v56  ;;  %v2773_v29 = vpop.permute.xlu0 %1101  ;;  %v652_v61 = vadd.f32 %v651_v8, %v650_v50  ;;  %2066 = vrsqrt.f32 %v2777_v54  ;;  %v1539_v8 = vld [vmem:[%s3478_s1 + $0x70] sm:$0xff]  ;;  %vm854_vm2 = vcmp.eq.f32.partialorder %v2777_v54, inf  ;;  %vm856_vm3 = vcmp.eq.f32.partialorder %v2777_v54, 0.0 }
 0x181   :  { %1197 = vst.msk [vmem:[#allocation2 + $0x20] sm:$0xf] %vm1195_vm11, %v952_v56  ;;  %v1560_v56 = vld [vmem:[%s3478_s1 + $0x118] sm:$0xff] }
 0x182   :  { %1085 = vst.msk [vmem:[#allocation2 + $0x50] sm:$0xf] %vm1082_vm10, %v2711_v23  ;;  %v653_v41 = vrot.slane %v652_v61, 2  ;;  %v1581_v42 = vpack.c.bf16 %v1561_v58, %v1560_v56  ;;  %v1534_v56 = vld [vmem:[%s3478_s1 + $0x48] sm:$0xff]  ;;  %v1535_v58 = vld [vmem:[%s3478_s1 + $0x50] sm:$0xff] }
 0x183   :  { %1227 = vst.msk [vmem:[#allocation2 + $0x20] sm:$0xf] %vm1224_vm12, %v2711_v23  ;;  %v557_v23 = vmul.f32 %v541_v7, %v541_v7  ;;  %v1568_v46 = vpack.c.bf16 %v1535_v58, %v1534_v56  ;;  %v1527_v56 = vld [vmem:[%s3478_s1 + $0x10] sm:$0xff] }
 0x184   :  { %1086 = vst.msk [vmem:[#allocation2 + $0x5c] sm:$0xf] %vm1082_vm10, %v954_v21  ;;  %1159 = vrot.lane.b32.xlu0 %v2420_v63, %s2082_s26  ;;  %v654_v62 = vadd.f32 %v653_v41, %v652_v61  ;;  %1669 = vmatpush.bf16.msra.mxu2 %v1581_v42  ;;  %v1555_v61 = vld [vmem:[%s3478_s1 + $0xf0] sm:$0xff]  ;;  %v1548_v42 = vld [vmem:[%s3478_s1 + $0xb8] sm:$0xff] }
 0x185   :  { %1135 = vst.msk [vmem:[#allocation2 + $0x50] sm:$0xf] %vm1132_vm4, %v954_v21  ;;  %v657_v32 = vsel %vm391_vm0, %v557_v23, 0.0  ;;  %v913_v48 = vpop.xlane.xlu2 %912 }
 0x186   :  { %1228 = vst.msk [vmem:[#allocation2 + $0x2c] sm:$0xf] %vm1224_vm12, %v954_v21  ;;  %v2795_v3 = vmul.f32 %v2637_v53, %v913_v48  ;;  %v2816_v12 = vpop.eup %2066  ;;  %v655_v49 = vrot.slane %v654_v62, 1 }
 0x187   :  { %1266 = vst.msk [vmem:[#allocation2 + $0x20] sm:$0xf] %vm1263_vm8, %v954_v21  ;;  %1032 = vrot.lane.b32.xlu1 %v2218_v43, %s2079_s24  ;;  %v2803_v43 = vadd.f32 1e-08, %v686_v40  ;;  %v848_v39 = vmul.f32 %v2816_v12, %v2777_v54  ;;  %v1536_v40 = vld [vmem:[%s3478_s1 + $0x58] sm:$0xff] }
 0x188   :  { %1016 = vst.msk [vmem:[#allocation2 + $0x8c] sm:$0xf] %vm1010_vm9, %v2770_v36  ;;  %v1277_v60 = vpop.permute.xlu0 %1276  ;;  %v656_v18 = vadd.f32 %v655_v49, %v654_v62  ;;  %1670 = vmatpush.bf16.msra.mxu2 %v1580_v14  ;;  %v1550_v62 = vld [vmem:[%s3478_s1 + $0xc8] sm:$0xff] }
 0x189   :  { %1201 = vst.msk [vmem:[#allocation2 + $0x5c] sm:$0xf] %vm1195_vm11, %v2770_v36  ;;  %2068 = vrsqrt.f32 %v2803_v43  ;;  %v849_v15 = vmul.f32 %v2816_v12, %v848_v39  ;;  %v1576_v0 = vpack.c.bf16 %v1551_v11, %v1550_v62  ;;  %v1530_v14 = vld [vmem:[%s3478_s1 + $0x28] sm:$0xff]  ;;  %v1543_v11 = vld [vmem:[%s3478_s1 + $0x90] sm:$0xff] }
 0x18a   :  { %1303 = vst.msk [vmem:[#allocation2 + $0x2c] sm:$0xf] %vm1300_vm13, %v2770_v36  ;;  %v684_v7 = vmul.f32 %v656_v18, %v2231_v55  ;;  %v1542_v62 = vld [vmem:[%s3478_s1 + $0x88] sm:$0xff] }
 0x18b   :  { %1291 = vst.msk [vmem:[#allocation2 + $0x10] sm:$0xf] %vm1122_vm1, %v1277_v60  ;;  %1046 = vrot.lane.b32.xlu2 %v2372_v28, %s2079_s24  ;;  %v850_v22 = vmul.f32 0.5, %v849_v15  ;;  %v1578_v60 = vpack.c.bf16 %v1555_v61, %v1554_v6  ;;  %v1531_v15 = vld [vmem:[%s3478_s1 + $0x30] sm:$0xff] }
 0x18c   :  { %1333 = vst.msk [vmem:[#allocation2 + $0x14] sm:$0xf] %vm1331_vm14, %v2795_v3  ;;  %v2910_v44 = vadd.f32 1e-08, %v684_v7 }
 0x18d   :  { %1345 = vst.msk [vmem:[#allocation2 + $0x14] sm:$0xf] %vm391_vm0, %v2397_v1  ;;  %v658_v1 = vrot.slane %v657_v32, 4  ;;  %v919_v27 = vpop.xlane.xlu2 %918  ;;  %v851_v48 = vsub.f32 1.5, %v850_v22  ;;  %1635 = vmatpush.bf16.msra.mxu1 %v1578_v60  ;;  %v1547_v22 = vld [vmem:[%s3478_s1 + $0xb0] sm:$0xff] }
 0x18e   :  { %1015 = vst.msk [vmem:[#allocation2 + $0x80] sm:$0xf] %vm1010_vm9, %v2795_v3  ;;  %2070 = vrsqrt.f32 %v2910_v44 }
 0x18f   :  { %1088 = vst.msk [vmem:[#allocation2 + $0x74] sm:$0xf] %vm1082_vm10, %v2795_v3  ;;  %1107 = vrot.lane.b32.xlu1 %v2420_v63, %s2080_s25  ;;  %v659_v52 = vadd.f32 %v658_v1, %v657_v32  ;;  %v2857_v16 = vpop.eup %2068  ;;  %v1537_v32 = vld [vmem:[%s3478_s1 + $0x60] sm:$0xff]  ;;  %v852_v37 = vmul.f32 %v2816_v12, %v851_v48  ;;  %v1532_v1 = vld [vmem:[%s3478_s1 + $0x38] sm:$0xff] }
 0x190   :  { %1136 = vst.msk [vmem:[#allocation2 + $0x68] sm:$0xf] %vm1132_vm4, %v2795_v3  ;;  %v1150_v21 = vpop.permute.xlu0 %1149  ;;  %v884_v24 = vmul.f32 %v2857_v16, %v2803_v43  ;;  %v1569_v51 = vpack.c.bf16 %v1537_v32, %v1536_v40  ;;  %v1533_v12 = vld [vmem:[%s3478_s1 + $0x40] sm:$0xff]  ;;  %v1544_v40 = vld [vmem:[%s3478_s1 + $0x98] sm:$0xff] }
 0x191   :  { %1200 = vst.msk [vmem:[#allocation2 + $0x50] sm:$0xf] %vm1195_vm11, %v2795_v3  ;;  %v660_v50 = vrot.slane %v659_v52, 2  ;;  %v853_v49 = vmul.f32 %v852_v37, %v2777_v54  ;;  %v1567_v5 = vpack.c.bf16 %v1533_v12, %v1532_v1  ;;  %v1545_v32 = vld [vmem:[%s3478_s1 + $0xa0] sm:$0xff] }
 0x192   :  { %1230 = vst.msk [vmem:[#allocation2 + $0x44] sm:$0xf] %vm1224_vm12, %v2795_v3  ;;  %v885_v57 = vmul.f32 %v2857_v16, %v884_v24 }
 0x193   :  { %1267 = vst.msk [vmem:[#allocation2 + $0x38] sm:$0xf] %vm1263_vm8, %v2795_v3  ;;  %1097 = vrot.lane.b32.xlu2 %v2300_v45, %s2080_s25  ;;  %v958_v45 = vmul.f32 %v2637_v53, %v919_v27  ;;  %v661_v41 = vadd.f32 %v660_v50, %v659_v52  ;;  %v1546_v50 = vld [vmem:[%s3478_s1 + $0xa8] sm:$0xff]  ;;  %v855_v24 = vsel %vm854_vm2, %v2777_v54, %v853_v49  ;;  %vm890_vm2 = vcmp.eq.f32.partialorder %v2803_v43, inf }
 0x194   :  { %1302 = vst.msk [vmem:[#allocation2 + $0x20] sm:$0xf] %vm1300_vm13, %v2795_v3  ;;  %v886_v13 = vmul.f32 0.5, %v885_v57  ;;  %v2962_v18 = vpop.eup %2070  ;;  %v1574_v6 = vpack.c.bf16 %v1547_v22, %v1546_v50 }
 0x195   :  { %1089 = vst.msk [vmem:[#allocation2 + $0x80] sm:$0xf] %vm1082_vm10, %v2770_v36  ;;  %v1035_v35 = vpop.permute.xlu2 %1034  ;;  %v662_v25 = vrot.slane %v661_v41, 1 }
 0x196   :  { %1137 = vst.msk [vmem:[#allocation2 + $0x74] sm:$0xf] %vm1132_vm4, %v2770_v36  ;;  %v2867_v34 = vpop.permute.xlu1 %1038  ;;  %v887_v27 = vsub.f32 1.5, %v886_v13 }
 0x197   :  { %1231 = vst.msk [vmem:[#allocation2 + $0x50] sm:$0xf] %vm1224_vm12, %v2770_v36  ;;  %1095 = vrot.lane.b32.xlu1 %v2377_v30, %s2080_s25  ;;  %v1538_v30 = vld [vmem:[%s3478_s1 + $0x68] sm:$0xff]  ;;  %v663_v39 = vadd.f32 %v662_v25, %v661_v41 }
 0x198   :  { %1268 = vst.msk [vmem:[#allocation2 + $0x44] sm:$0xf] %vm1263_vm8, %v2770_v36  ;;  %v1570_v23 = vpack.c.bf16 %v1539_v8, %v1538_v30  ;;  %v1156_v9 = vpop.permute.xlu0 %1155  ;;  %v857_v30 = vand.u32 2147483648, %v2777_v54  ;;  %v1566_v8 = vpack.c.bf16 %v1531_v15, %v1530_v14 }
 0x199   :  { %1334 = vst.msk [vmem:[#allocation2 + $0x20] sm:$0xf] %vm1331_vm14, %v2770_v36 }
 0x19a   :  { %1185 = vst.msk [vmem:[#allocation2 + $0x24] sm:$0xf] %vm1182_vm5, %v1150_v21  ;;  %1606 = vmatpush.bf16.msra.mxu0 %v1570_v23  ;;  %v860_v23 = vmul.f32 %v2962_v18, %v2910_v44  ;;  %v858_v61 = vsel %vm856_vm3, %v857_v30, %v855_v24  ;;  %vm892_vm3 = vcmp.eq.f32.partialorder %v2803_v43, 0.0 }
 0x19b   :  { %1346 = vst.msk [vmem:[#allocation2 + $0x20] sm:$0xf] %vm391_vm0, %v2372_v28  ;;  %1109 = vrot.lane.b32.xlu2 %v2449_v47, %s2080_s25  ;;  %v932_v57 = vsel %vm895_vm7, %v858_v61, 0.0 }
 0x19c   :  { %1354 = vst.msk [vmem:[#allocation2 + $0x8] sm:$0xf] %vm1353_vm6, %v2795_v3  ;;  %v1577_v3 = vpack.c.bf16 %v1553_v38, %v1552_v17  ;;  %v861_v58 = vmul.f32 %v2962_v18, %v860_v23  ;;  %v869_v23 = vand.u32 2147483648, %v2910_v44 }
 0x19d   :  { %1090 = vst.msk [vmem:[#allocation2 + $0x8c] sm:$0xf] %vm1082_vm10, %v958_v45  ;;  %v1146_v10 = vpop.permute.xlu2 %1145 }
 0x19e   :  { %1138 = vst.msk [vmem:[#allocation2 + $0x80] sm:$0xf] %vm1132_vm4, %v958_v45  ;;  %v2922_v2 = vpop.permute.xlu1 %1103  ;;  %1607 = vmatpush.bf16.msra.mxu0 %v1569_v51  ;;  %1636 = vmatpush.bf16.msra.mxu1 %v1577_v3  ;;  %v1573_v51 = vpack.c.bf16 %v1545_v32, %v1544_v40  ;;  %v1526_v3 = vld [vmem:[%s3478_s1 + $0x8] sm:$0xff]  ;;  %v862_v1 = vmul.f32 0.5, %v861_v58 }
 0x19f   :  { %1232 = vst.msk [vmem:[#allocation2 + $0x5c] sm:$0xf] %vm1224_vm12, %v958_v45  ;;  %1161 = vrot.lane.b32.xlu1 %v2449_v47, %s2082_s26 }
 0x1a0   :  { %1269 = vst.msk [vmem:[#allocation2 + $0x50] sm:$0xf] %vm1263_vm8, %v958_v45 }
 0x1a1   :  { %1335 = vst.msk [vmem:[#allocation2 + $0x2c] sm:$0xf] %vm1331_vm14, %v958_v45 }
 0x1a2   :  { %1355 = vst.msk [vmem:[#allocation2 + $0x14] sm:$0xf] %vm1353_vm6, %v2770_v36  ;;  %v1549_v36 = vld [vmem:[%s3478_s1 + $0xc0] sm:$0xff]  ;;  %1608 = vmatpush.bf16.msra.mxu0 %v1568_v46  ;;  %1637 = vmatpush.bf16.msra.mxu1 %v1576_v0  ;;  %v1564_v46 = vpack.c.bf16 %v1527_v56, %v1526_v3  ;;  %v1572_v0 = vpack.c.bf16 %v1543_v11, %v1542_v62 }
 0x1a3   :  { %1356 = vst.msk [vmem:[#allocation2 + $0x20] sm:$0xf] %vm1353_vm6, %v958_v45  ;;  %v1575_v52 = vpack.c.bf16 %v1549_v36, %v1548_v42  ;;  %1157 = vrot.lane.b32.xlu2 %v2393_v59, %s2082_s26  ;;  %v888_v45 = vmul.f32 %v2857_v16, %v887_v27  ;;  %v1529_v16 = vld [vmem:[%s3478_s1 + $0x20] sm:$0xff] }
 0x1a4   :  { %1071 = vst.msk [vmem:[#allocation2 + $0x3c] sm:$0xf] %vm1069_vm15, %v1035_v35 }
 0x1a5   :  { %1251 = vst.msk [vmem:[#allocation2 + $0x4] sm:$0xf] %vm1069_vm15, %v1035_v35  ;;  %v685_v35 = vmul.f32 %v663_v39, %v2231_v55  ;;  %v2981_v7 = vpop.permute.xlu2 %1151  ;;  %v1528_v55 = vld [vmem:[%s3478_s1 + $0x18] sm:$0xff]  ;;  %v889_v60 = vmul.f32 %v888_v45, %v2803_v43  ;;  %v863_v39 = vsub.f32 1.5, %v862_v1 }
 0x1a6   :  { %1073 = vst.msk [vmem:[#allocation2 + $0x54] sm:$0xf] %vm1069_vm15, %v2867_v34  ;;  %v1148_v21 = vpop.permute.xlu1 %1147  ;;  %1609 = vmatpush.bf16.msra.mxu0 %v1567_v5  ;;  %1638 = vmatpush.bf16.msra.mxu1 %v1575_v52  ;;  %v1565_v38 = vpack.c.bf16 %v1529_v16, %v1528_v55 }
 0x1a7   :  { %1188 = vst.msk [vmem:[#allocation2 + $0x54] sm:$0xf] %vm1182_vm5, %v1156_v9  ;;  %v3004_v48 = vadd.f32 1e-08, %v685_v35  ;;  %v891_v25 = vsel %vm890_vm2, %v2803_v43, %v889_v60  ;;  %vm3481_vm2 = vcmask 334848  }
 0x1a8   :  { %1253 = vst.msk [vmem:[#allocation2 + $0x1c] sm:$0xf] %vm1069_vm15, %v2867_v34  ;;  %v1364_v34 = vld [vmem:[#allocation2 + $0x8] sm:$0xf]  ;;  %v1370_v17 = vld [vmem:[#allocation2 + $0x2c] sm:$0xf] }
 0x1a9   :  { %1292 = vst.msk [vmem:[#allocation2 + $0x1c] sm:$0xf] %vm1122_vm1, %v2773_v29  ;;  %v1366_v54 = vld [vmem:[#allocation2 + $0x14] sm:$0xf]  ;;  %2072 = vrsqrt.f32 %v3004_v48  ;;  %v881_v60 = vand.u32 2147483648, %v3004_v48 }
 0x1aa   :  { %1321 = vst.msk [vmem:[#allocation2 + $0x1c] sm:$0xf] %vm1182_vm5, %v1156_v9  ;;  %v1368_v41 = vld [vmem:[#allocation2 + $0x20] sm:$0xf]  ;;  %1610 = vmatpush.bf16.msra.mxu0 %v1566_v8  ;;  %1639 = vmatpush.bf16.msra.mxu1 %v1574_v6 }
 0x1ab   :  { %1183 = vst.msk [vmem:[#allocation2 + $0xc] sm:$0xf] %vm1182_vm5, %v1146_v10  ;;  %1312 = vrot.lane.b32.xlu2 %v2474_v31, %s2082_s26  ;;  %v893_v10 = vand.u32 2147483648, %v2803_v43 }
 0x1ac   :  { %1293 = vst.msk [vmem:[#allocation2 + $0x28] sm:$0xf] %vm1122_vm1, %v2922_v2 }
 0x1ad   :  { %1431 = vst [vmem:[#allocation1 + $0x10] ss:$2 sm:$0xff] %v1364_v34  ;;  %v1311_v37 = vpop.permute.xlu2 %1310  ;;  %v894_v12 = vsel %vm892_vm3, %v893_v10, %v891_v25  ;;  %vm866_vm3 = vcmp.eq.f32.partialorder %v2910_v44, inf }
 0x1ae   :  { %1433 = vst [vmem:[#allocation1 + $0x11] ss:$2 sm:$0xff] %v1366_v54  ;;  %933 = vadd.xlane.f32.xlu0 %v932_v57  ;;  %v3027_v13 = vpop.permute.xlu1 %1153  ;;  %1611 = vmatpush.bf16.msra.mxu0 %v1565_v38  ;;  %v941_v36 = vsel %vm895_vm7, %v894_v12, 0.0 }
 0x1af   :  { %1439 = vst [vmem:[#allocation1 + $0x30] ss:$2 sm:$0xff] %v1368_v41  ;;  %1640 = vmatpush.bf16.msra.mxu1 %v1573_v51  ;;  %v2073_v42 = vpop.eup %2072 }
 0x1b0   :  { %1441 = vst [vmem:[#allocation1 + $0x31] ss:$2 sm:$0xff] %v1370_v17  ;;  %v872_v52 = vmul.f32 %v2073_v42, %v3004_v48 }
 0x1b1   :  { %1319 = vst.msk [vmem:[#allocation2 + $0x4] sm:$0xf] %vm1182_vm5, %v2981_v7 }
 0x1b2   :  { %1184 = vst.msk [vmem:[#allocation2 + $0x18] sm:$0xf] %vm1182_vm5, %v1148_v21  ;;  %1612 = vmatpush.bf16.msra.mxu0 %v1564_v46  ;;  %v864_v21 = vmul.f32 %v2962_v18, %v863_v39  ;;  %v873_v50 = vmul.f32 %v2073_v42, %v872_v52 }
 0x1b3   :  { %1322 = vst.msk [vmem:[#allocation2 + $0x28] sm:$0xf] %vm1182_vm5, %v1311_v37  ;;  %1641 = vmatpush.bf16.msra.mxu1 %v1572_v0 }
 0x1b4   :  { %1320 = vst.msk [vmem:[#allocation2 + $0x10] sm:$0xf] %vm1182_vm5, %v3027_v13  ;;  %v865_v22 = vmul.f32 %v864_v21, %v2910_v44  ;;  %v874_v24 = vmul.f32 0.5, %v873_v50 }
 0x1b5   :  { %v1444_v49 = vld.sshfl [vmem:[#allocation1 + $0x10] sm:$0xff pattern:$0x75316420] }
 0x1b6   :  { %942 = vadd.xlane.f32.xlu0 %v941_v36  ;;  %v867_v34 = vsel %vm866_vm3, %v2910_v44, %v865_v22  ;;  %v875_v54 = vsub.f32 1.5, %v874_v24  ;;  %vm878_vm3 = vcmp.eq.f32.partialorder %v3004_v48, inf }
 0x1b7   :  { %v1447_v27 = vld.sshfl [vmem:[#allocation1 + $0x30] sm:$0xff pattern:$0x75316420] }
 0x1b8   :  { %v1516_v43 = vpack.c.bf16 %v1447_v27, %v1444_v49  ;;  %v1363_v5 = vld [vmem:[#allocation2] sm:$0xff]  ;;  %v876_v32 = vmul.f32 %v2073_v42, %v875_v54 }
 0x1b9   :  { %1427 = vst [vmem:[#allocation1] ss:$2 sm:$0xff] %v1363_v5  ;;  %v1367_v9 = vld [vmem:[#allocation2 + $0x18] sm:$0xff] }
 0x1ba   :  { %1991 = vmatmul.msk.bf16.vlgmr.msra.gmra.mxu2 %vm3481_vm2, %v1516_v43  ;;  %1435 = vst [vmem:[#allocation1 + $0x20] ss:$2 sm:$0xff] %v1367_v9  ;;  %v1369_v14 = vld [vmem:[#allocation2 + $0x24] sm:$0xff]  ;;  %vm868_vm2 = vcmp.eq.f32.partialorder %v2910_v44, 0.0  ;;  %v877_v41 = vmul.f32 %v876_v32, %v3004_v48 }
 0x1bb   :  { %1437 = vst [vmem:[#allocation1 + $0x21] ss:$2 sm:$0xff] %v1369_v14  ;;  %v1365_v15 = vld [vmem:[#allocation2 + $0xc] sm:$0xff]  ;;  %v870_v61 = vsel %vm868_vm2, %v869_v23, %v867_v34  ;;  %vm880_vm2 = vcmp.eq.f32.partialorder %v3004_v48, 0.0 }
 0x1bc   :  { %1429 = vst [vmem:[#allocation1 + $0x1] ss:$2 sm:$0xff] %v1365_v15  ;;  %v935_v40 = vsel %vm895_vm7, %v870_v61, 0.0  ;;  %v879_v44 = vsel %vm878_vm3, %v3004_v48, %v877_v41 }
 0x1bd   :  { %v882_v17 = vsel %vm880_vm2, %v881_v60, %v879_v44 }
 0x1be   :  { %v938_v57 = vsel %vm895_vm7, %v882_v17, 0.0 }
 0x1c2   :  { %v1445_v45 = vld.sshfl [vmem:[#allocation1 + $0x20] sm:$0xff pattern:$0x75316420]  ;;  %v1446_v35 = vld.sshfl [vmem:[#allocation1 + $0x28] sm:$0xff pattern:$0x75316420] }
 0x1c3   :  { %v1442_v30 = vld.sshfl [vmem:[#allocation1] sm:$0xff pattern:$0x75316420]  ;;  %v1443_v8 = vld.sshfl [vmem:[#allocation1 + $0x8] sm:$0xff pattern:$0x75316420]  ;;  %v925_v6 = vpop.xlane.xlu0 %924 }
 0x1c4   :  { %v1514_v55 = vpack.c.bf16 %v1445_v45, %v1442_v30  ;;  %v1515_v16 = vpack.c.bf16 %v1446_v35, %v1443_v8  ;;  %v960_v18 = vmul.f32 %v2637_v53, %v925_v6  ;;  %v3174_v8 = vld [vmem:[%s3479_s2 + $0x1] ss:$0 sm:$0xff] }
 0x1c6   :  { %1613 = vmatmul.bf16.vlgmr.msra.gmra.mxu0 %v1514_v55  ;;  %1642 = vmatmul.bf16.vlgmr.msra.gmra.mxu1 %v1515_v16  ;;  %1305 = vst.msk [vmem:[#allocation2 + $0x50] sm:$0xf] %vm1300_vm13, %v960_v18 }
 0x1c7   :  { %1018 = vst.msk [vmem:[#allocation2 + $0xb0] sm:$0xf] %vm1010_vm9, %v960_v18 }
 0x1c8   :  { %1203 = vst.msk [vmem:[#allocation2 + $0x80] sm:$0xf] %vm1195_vm11, %v960_v18 }
 0x1c9   :  { %936 = vadd.xlane.f32.xlu1 %v935_v40 }
 0x1ca   :  { %1040 = vrot.lane.b32.xlu0 %v2278_v26, %s2079_s24 }
 0x1d2   :  { %1105 = vrot.lane.b32.xlu0 %v2372_v28, %s2080_s25 }
 0x1d4   :  { %939 = vadd.xlane.f32.xlu2 %v938_v57 }
 0x1d6   :  { %v1045_v38 = vpop.permute.xlu0 %1044 }
 0x1d7   :  { %1076 = vst.msk [vmem:[#allocation2 + $0x78] sm:$0xf] %vm1069_vm15, %v1045_v38 }
 0x1d8   :  { %1255 = vst.msk [vmem:[#allocation2 + $0x40] sm:$0xf] %vm1069_vm15, %v1045_v38 }
 0x1d9   :  { %v922_v26 = vpop.xlane.xlu1 %921 }
 0x1da   :  { %1284 = vrot.lane.b32.xlu0 %v2504_v33, %s2080_s25  ;;  %v959_v51 = vmul.f32 %v2637_v53, %v922_v26 }
 0x1dc   :  { %1304 = vst.msk [vmem:[#allocation2 + $0x44] sm:$0xf] %vm1300_vm13, %v959_v51 }
 0x1dd   :  { %1336 = vst.msk [vmem:[#allocation2 + $0x38] sm:$0xf] %vm1331_vm14, %v959_v51 }
 0x1de   :  { %v1043_v28 = vpop.permute.xlu0 %1042  ;;  %1337 = vst.msk [vmem:[#allocation2 + $0x44] sm:$0xf] %vm1331_vm14, %v960_v18 }
 0x1df   :  { %1075 = vst.msk [vmem:[#allocation2 + $0x6c] sm:$0xf] %vm1069_vm15, %v1043_v28 }
 0x1e0   :  { %1254 = vst.msk [vmem:[#allocation2 + $0x34] sm:$0xf] %vm1069_vm15, %v1043_v28 }
 0x1e1   :  { %1127 = vst.msk [vmem:[#allocation2 + $0x6c] sm:$0xf] %vm1122_vm1, %v2922_v2  ;;  %v931_v3 = vpop.xlane.xlu1 %930 }
 0x1e2   :  { %1347 = vst.msk [vmem:[#allocation2 + $0x38] sm:$0xf] %vm391_vm0, %v2420_v63  ;;  %1167 = vrot.lane.b32.xlu0 %v2504_v33, %s2082_s26  ;;  %1052 = vrot.lane.b32.xlu1 %v2449_v47, %s2079_s24  ;;  %v962_v56 = vmul.f32 %v2637_v53, %v931_v3 }
 0x1e3   :  { %1348 = vst.msk [vmem:[#allocation2 + $0x44] sm:$0xf] %vm391_vm0, %v2449_v47 }
 0x1e4   :  { %1357 = vst.msk [vmem:[#allocation2 + $0x38] sm:$0xf] %vm1353_vm6, %v960_v18 }
 0x1e5   :  { %1017 = vst.msk [vmem:[#allocation2 + $0xa4] sm:$0xf] %vm1010_vm9, %v959_v51 }
 0x1e6   :  { %1091 = vst.msk [vmem:[#allocation2 + $0x98] sm:$0xf] %vm1082_vm10, %v959_v51  ;;  %v928_v2 = vpop.xlane.xlu2 %927  ;;  %v1100_v48 = vpop.permute.xlu0 %1099 }
 0x1e7   :  { %1202 = vst.msk [vmem:[#allocation2 + $0x74] sm:$0xf] %vm1195_vm11, %v959_v51  ;;  %v961_v47 = vmul.f32 %v2637_v53, %v928_v2 }
 0x1e8   :  { %1233 = vst.msk [vmem:[#allocation2 + $0x68] sm:$0xf] %vm1224_vm12, %v959_v51 }
 0x1e9   :  { %1092 = vst.msk [vmem:[#allocation2 + $0xa4] sm:$0xf] %vm1082_vm10, %v960_v18 }
 0x1ea   :  { %1139 = vst.msk [vmem:[#allocation2 + $0x98] sm:$0xf] %vm1132_vm4, %v960_v18  ;;  %1111 = vrot.lane.b32.xlu0 %v2474_v31, %s2080_s25  ;;  %1050 = vrot.lane.b32.xlu1 %v2420_v63, %s2079_s24 }
 0x1eb   :  { %1234 = vst.msk [vmem:[#allocation2 + $0x74] sm:$0xf] %vm1224_vm12, %v960_v18 }
 0x1ec   :  { %1270 = vst.msk [vmem:[#allocation2 + $0x68] sm:$0xf] %vm1263_vm8, %v960_v18  ;;  %1054 = vrot.lane.b32.xlu2 %v2474_v31, %s2079_s24 }
 0x1ed   :  { %1125 = vst.msk [vmem:[#allocation2 + $0x48] sm:$0xf] %vm1122_vm1, %v1100_v48 }
 0x1ee   :  { %1187 = vst.msk [vmem:[#allocation2 + $0x48] sm:$0xf] %vm1182_vm5, %v3027_v13  ;;  %v1047_v63 = vpop.permute.xlu2 %1046  ;;  %v1279_v58 = vpop.permute.xlu0 %1278  ;;  %v1372_v13 = vld [vmem:[#allocation2 + $0x38] sm:$0xf] }
 0x1ef   :  { %1306 = vst.msk [vmem:[#allocation2 + $0x5c] sm:$0xf] %vm1300_vm13, %v961_v47 }
 0x1f0   :  { %1338 = vst.msk [vmem:[#allocation2 + $0x50] sm:$0xf] %vm1331_vm14, %v961_v47 }
 0x1f1   :  { %1339 = vst.msk [vmem:[#allocation2 + $0x5c] sm:$0xf] %vm1331_vm14, %v962_v56 }
 0x1f2   :  { %1349 = vst.msk [vmem:[#allocation2 + $0x50] sm:$0xf] %vm391_vm0, %v2474_v31  ;;  %1246 = vrot.lane.b32.xlu0 %v2565_v20, %s2079_s24  ;;  %1282 = vrot.lane.b32.xlu1 %v2519_v19, %s2080_s25 }
 0x1f3   :  { %1358 = vst.msk [vmem:[#allocation2 + $0x44] sm:$0xf] %vm1353_vm6, %v961_v47 }
 0x1f4   :  { %1359 = vst.msk [vmem:[#allocation2 + $0x50] sm:$0xf] %vm1353_vm6, %v962_v56  ;;  %1280 = vrot.lane.b32.xlu2 %v2534_v4, %s2080_s25 }
 0x1f5   :  { %1019 = vst.msk [vmem:[#allocation2 + $0xbc] sm:$0xf] %vm1010_vm9, %v961_v47  ;;  %vm3482_vm9 = vcmask 334848  }
 0x1f6   :  { %1093 = vst.msk [vmem:[#allocation2 + $0xb0] sm:$0xf] %vm1082_vm10, %v961_v47  ;;  %v1098_v31 = vpop.permute.xlu2 %1097  ;;  %v3125_v11 = vpop.permute.xlu0 %1159 }
 0x1f7   :  { %1140 = vst.msk [vmem:[#allocation2 + $0xa4] sm:$0xf] %vm1132_vm4, %v961_v47 }
 0x1f8   :  { %1204 = vst.msk [vmem:[#allocation2 + $0x8c] sm:$0xf] %vm1195_vm11, %v961_v47  ;;  %v1378_v46 = vld [vmem:[#allocation2 + $0x5c] sm:$0xf] }
 0x1f9   :  { %1235 = vst.msk [vmem:[#allocation2 + $0x80] sm:$0xf] %vm1224_vm12, %v961_v47  ;;  %v1033_v62 = vpop.permute.xlu1 %1032 }
 0x1fa   :  { %1271 = vst.msk [vmem:[#allocation2 + $0x74] sm:$0xf] %vm1263_vm8, %v961_v47  ;;  %1165 = vrot.lane.b32.xlu1 %v2519_v19, %s2082_s26 }
 0x1fb   :  { %1294 = vst.msk [vmem:[#allocation2 + $0x40] sm:$0xf] %vm1122_vm1, %v1279_v58  ;;  %v1376_v10 = vld [vmem:[#allocation2 + $0x50] sm:$0xf] }
 0x1fc   :  { %1094 = vst.msk [vmem:[#allocation2 + $0xbc] sm:$0xf] %vm1082_vm10, %v962_v56  ;;  %1163 = vrot.lane.b32.xlu2 %v2534_v4, %s2082_s26  ;;  %v1374_v4 = vld [vmem:[#allocation2 + $0x44] sm:$0xf] }
 0x1fd   :  { %1141 = vst.msk [vmem:[#allocation2 + $0xb0] sm:$0xf] %vm1132_vm4, %v962_v56 }
 0x1fe   :  { %1236 = vst.msk [vmem:[#allocation2 + $0x8c] sm:$0xf] %vm1224_vm12, %v962_v56  ;;  %v3131_v25 = vpop.permute.xlu2 %1109 }
 0x1ff   :  { %1272 = vst.msk [vmem:[#allocation2 + $0x80] sm:$0xf] %vm1263_vm8, %v962_v56 }
 0x200   :  { %1077 = vst.msk [vmem:[#allocation2 + $0x84] sm:$0xf] %vm1069_vm15, %v1047_v63 }
 0x201   :  { %1256 = vst.msk [vmem:[#allocation2 + $0x4c] sm:$0xf] %vm1069_vm15, %v1047_v63  ;;  %v3133_v37 = vpop.permute.xlu1 %1107 }
 0x202   :  { %1324 = vst.msk [vmem:[#allocation2 + $0x40] sm:$0xf] %vm1182_vm5, %v3125_v11  ;;  %1048 = vrot.lane.b32.xlu1 %v2393_v59, %s2079_s24 }
 0x203   :  { %1124 = vst.msk [vmem:[#allocation2 + $0x3c] sm:$0xf] %vm1122_vm1, %v1098_v31 }
 0x204   :  { %1186 = vst.msk [vmem:[#allocation2 + $0x3c] sm:$0xf] %vm1182_vm5, %v2981_v7  ;;  %1314 = vrot.lane.b32.xlu2 %v2565_v20, %s2082_s26 }
 0x205   :  { %1070 = vst.msk [vmem:[#allocation2 + $0x30] sm:$0xf] %vm1069_vm15, %v1033_v62 }
 0x206   :  { %1450 = vst [vmem:[#allocation1 + $0x10] ss:$2 sm:$0xff] %v1372_v13  ;;  %v1158_v0 = vpop.permute.xlu2 %1157 }
 0x207   :  { %1451 = vst [vmem:[#allocation1 + $0x11] ss:$2 sm:$0xff] %v1374_v4 }
 0x208   :  { %1454 = vst [vmem:[#allocation1 + $0x30] ss:$2 sm:$0xff] %v1376_v10 }
 0x209   :  { %1455 = vst [vmem:[#allocation1 + $0x31] ss:$2 sm:$0xff] %v1378_v46  ;;  %v1096_v59 = vpop.permute.xlu1 %1095 }
 0x20a   :  { %1296 = vst.msk [vmem:[#allocation2 + $0x58] sm:$0xf] %vm1122_vm1, %v3131_v25  ;;  %1244 = vrot.lane.b32.xlu1 %v2504_v33, %s2079_s24 }
 0x20b   :  { %v1373_v7 = vld [vmem:[#allocation2 + $0x3c] sm:$0xff]  ;;  %1295 = vst.msk [vmem:[#allocation2 + $0x4c] sm:$0xf] %vm1122_vm1, %v3133_v37 }
 0x20c   :  { %1449 = vst [vmem:[#allocation1 + $0x1] ss:$2 sm:$0xff] %v1373_v7  ;;  %1242 = vrot.lane.b32.xlu2 %v2519_v19, %s2079_s24 }
 0x20d   :  { %1189 = vst.msk [vmem:[#allocation2 + $0x6c] sm:$0xf] %vm1182_vm5, %v1158_v0 }
 0x20e   :  { %1323 = vst.msk [vmem:[#allocation2 + $0x34] sm:$0xf] %vm1182_vm5, %v1158_v0  ;;  %v1458_v1 = vld.sshfl [vmem:[#allocation1 + $0x10] sm:$0xff pattern:$0x75316420]  ;;  %v1313_v36 = vpop.permute.xlu2 %1312 }
 0x20f   :  { %1123 = vst.msk [vmem:[#allocation2 + $0x30] sm:$0xf] %vm1122_vm1, %v1096_v59 }
 0x210   :  { %v1461_v12 = vld.sshfl [vmem:[#allocation1 + $0x30] sm:$0xff pattern:$0x75316420]  ;;  %1326 = vst.msk [vmem:[#allocation2 + $0x58] sm:$0xf] %vm1182_vm5, %v1313_v36 }
 0x211   :  { %v1519_v42 = vpack.c.bf16 %v1461_v12, %v1458_v1  ;;  %v1162_v39 = vpop.permute.xlu1 %1161 }
 0x212   :  { %1191 = vst.msk [vmem:[#allocation2 + $0x84] sm:$0xf] %vm1182_vm5, %v1162_v39 }
 0x213   :  { %1992 = vmatmul.msk.bf16.gmra.mxu2 %vm3482_vm9, %v1519_v42  ;;  %1325 = vst.msk [vmem:[#allocation2 + $0x4c] sm:$0xf] %vm1182_vm5, %v1162_v39 }
 0x216   :  { %v1371_v49 = vld [vmem:[#allocation2 + $0x30] sm:$0xff] }
 0x217   :  { %1448 = vst [vmem:[#allocation1] ss:$2 sm:$0xff] %v1371_v49  ;;  %v1377_v27 = vld [vmem:[#allocation2 + $0x54] sm:$0xff] }
 0x218   :  { %1453 = vst [vmem:[#allocation1 + $0x21] ss:$2 sm:$0xff] %v1377_v27 }
 0x21a   :  { %v1375_v43 = vld [vmem:[#allocation2 + $0x48] sm:$0xff] }
 0x21b   :  { %1452 = vst [vmem:[#allocation1 + $0x20] ss:$2 sm:$0xff] %v1375_v43 }
 0x21e   :  { %v1456_v52 = vld.sshfl [vmem:[#allocation1] sm:$0xff pattern:$0x75316420]  ;;  %v1457_v14 = vld.sshfl [vmem:[#allocation1 + $0x8] sm:$0xff pattern:$0x75316420] }
 0x221   :  { %v934_v5 = vpop.xlane.xlu0 %933 }
 0x222   :  { %v963_v9 = vmul.f32 %v2637_v53, %v934_v5  ;;  %v1459_v15 = vld.sshfl [vmem:[#allocation1 + $0x20] sm:$0xff pattern:$0x75316420]  ;;  %v1460_v21 = vld.sshfl [vmem:[#allocation1 + $0x28] sm:$0xff pattern:$0x75316420] }
 0x223   :  { %v1517_v50 = vpack.c.bf16 %v1459_v15, %v1456_v52  ;;  %v1518_v22 = vpack.c.bf16 %v1460_v21, %v1457_v14 }
 0x224   :  { %1205 = vst.msk [vmem:[#allocation2 + $0xa4] sm:$0xf] %vm1195_vm11, %v963_v9 }
 0x225   :  { %1237 = vst.msk [vmem:[#allocation2 + $0x98] sm:$0xf] %vm1224_vm12, %v963_v9  ;;  %1618 = vmatmul.bf16.gmra.mxu0 %v1517_v50  ;;  %1647 = vmatmul.bf16.gmra.mxu1 %v1518_v22 }
 0x226   :  { %1307 = vst.msk [vmem:[#allocation2 + $0x74] sm:$0xf] %vm1300_vm13, %v963_v9 }
 0x227   :  { %1340 = vst.msk [vmem:[#allocation2 + $0x68] sm:$0xf] %vm1331_vm14, %v963_v9 }
 0x228   :  { %1350 = vst.msk [vmem:[#allocation2 + $0x68] sm:$0xf] %vm391_vm0, %v2519_v19 }
 0x229   :  { %v943_v24 = vpop.xlane.xlu0 %942 }
 0x22a   :  { %v966_v17 = vmul.f32 %v2637_v53, %v943_v24 }
 0x23c   :  { %v1041_v45 = vpop.permute.xlu0 %1040  ;;  %v937_v35 = vpop.xlane.xlu1 %936 }
 0x23d   :  { %1074 = vst.msk [vmem:[#allocation2 + $0x60] sm:$0xf] %vm1069_vm15, %v1041_v45  ;;  %v964_v30 = vmul.f32 %v2637_v53, %v937_v35 }
 0x23e   :  { %1126 = vst.msk [vmem:[#allocation2 + $0x60] sm:$0xf] %vm1122_vm1, %v2773_v29  ;;  %v1672_v29 = vpop.f32.mrf.mxu2 }
 0x23f   :  { %1206 = vst.msk [vmem:[#allocation2 + $0xb0] sm:$0xf] %vm1195_vm11, %v964_v30 }
 0x240   :  { %1238 = vst.msk [vmem:[#allocation2 + $0xa4] sm:$0xf] %vm1224_vm12, %v964_v30 }
 0x241   :  { %1273 = vst.msk [vmem:[#allocation2 + $0x98] sm:$0xf] %vm1263_vm8, %v964_v30 }
 0x242   :  { %1308 = vst.msk [vmem:[#allocation2 + $0x80] sm:$0xf] %vm1300_vm13, %v964_v30 }
 0x243   :  { %v1614_v19 = vpop.f32.mrf.mxu0  ;;  %v1643_v34 = vpop.f32.mrf.mxu1  ;;  %1341 = vst.msk [vmem:[#allocation2 + $0x74] sm:$0xf] %vm1331_vm14, %v964_v30 }
 0x244   :  { %v1615_v6 = vadd.f32 %v3174_v8, %v1614_v19  ;;  %v1106_v55 = vpop.permute.xlu0 %1105  ;;  %1360 = vst.msk [vmem:[#allocation2 + $0x68] sm:$0xf] %vm1353_vm6, %v964_v30 }
 0x245   :  { %1351 = vst.msk [vmem:[#allocation2 + $0x74] sm:$0xf] %vm391_vm0, %v2504_v33 }
 0x246   :  { %v1644_v16 = vadd.f32 %v1643_v34, %v1615_v6  ;;  %1128 = vst.msk [vmem:[#allocation2 + $0x78] sm:$0xf] %vm1122_vm1, %v1106_v55  ;;  %v1674_v38 = vpop.f32.mrf.mxu2 }
 0x247   :  { %1190 = vst.msk [vmem:[#allocation2 + $0x78] sm:$0xf] %vm1182_vm5, %v3125_v11  ;;  %v940_v32 = vpop.xlane.xlu2 %939 }
 0x248   :  { %v1673_v23 = vadd.f32 %v1672_v29, %v1644_v16  ;;  %v965_v60 = vmul.f32 %v2637_v53, %v940_v32 }
 0x24a   :  { %vm1692_vm10 = vcmp.gt.f32.partialorder %v1673_v23, 0.0  ;;  %v1700_v18 = vmul.f32 0.2, %v1673_v23  ;;  %1207 = vst.msk [vmem:[#allocation2 + $0xbc] sm:$0xf] %vm1195_vm11, %v965_v60  ;;  %vm3483_vm11 = vmmov %vm3482_vm9 }
 0x24b   :  { %v1616_v54 = vpop.f32.mrf.mxu0  ;;  %v1645_v44 = vpop.f32.mrf.mxu1  ;;  %1239 = vst.msk [vmem:[#allocation2 + $0xb0] sm:$0xf] %vm1224_vm12, %v965_v60 }
 0x24c   :  { %v1708_v61 = vsel %vm1692_vm10, %v1673_v23, %v1700_v18  ;;  %v1617_v40 = vadd.f32 %v3174_v8, %v1616_v54  ;;  %v1285_v41 = vpop.permute.xlu0 %1284  ;;  %1240 = vst.msk [vmem:[#allocation2 + $0xbc] sm:$0xf] %vm1224_vm12, %v966_v17  ;;  %vm3484_vm12 = vmmov %vm3482_vm9 }
 0x24d   :  { %1716 = vst.msk [vmem:[#allocation3] sm:$0xff] %vm895_vm7, %v1708_v61 }
 0x24e   :  { %1299 = vst.msk [vmem:[#allocation2 + $0x88] sm:$0xf] %vm1122_vm1, %v1285_v41  ;;  %v1646_v33 = vadd.f32 %v1645_v44, %v1617_v40 }
 0x24f   :  { %1274 = vst.msk [vmem:[#allocation2 + $0xa4] sm:$0xf] %vm1263_vm8, %v965_v60  ;;  %v1055_v28 = vpop.permute.xlu2 %1054 }
 0x250   :  { %v1675_v57 = vadd.f32 %v1674_v38, %v1646_v33  ;;  %1275 = vst.msk [vmem:[#allocation2 + $0xb0] sm:$0xf] %vm1263_vm8, %v966_v17 }
 0x251   :  { %1309 = vst.msk [vmem:[#allocation2 + $0x8c] sm:$0xf] %vm1300_vm13, %v965_v60 }
 0x252   :  { %vm1693_vm4 = vcmp.gt.f32.partialorder %v1675_v57, 0.0  ;;  %v1701_v26 = vmul.f32 0.2, %v1675_v57  ;;  %1342 = vst.msk [vmem:[#allocation2 + $0x80] sm:$0xf] %vm1331_vm14, %v965_v60 }
 0x253   :  { %1343 = vst.msk [vmem:[#allocation2 + $0x8c] sm:$0xf] %vm1331_vm14, %v966_v17  ;;  %v1394_v12 = vld [vmem:[#allocation2 + $0xbc] sm:$0xf] }
 0x254   :  { %v1709_v51 = vsel %vm1693_vm4, %v1675_v57, %v1701_v26  ;;  %v1726_v2 = vld [vmem:[#allocation3 + $0x4] sm:$0xf]  ;;  %v1168_v53 = vpop.permute.xlu0 %1167  ;;  %v1053_v48 = vpop.permute.xlu1 %1052  ;;  %1352 = vst.msk [vmem:[#allocation2 + $0x80] sm:$0xf] %vm391_vm0, %v2565_v20  ;;  %v1380_v20 = vld [vmem:[#allocation2 + $0x68] sm:$0xf] }
 0x255   :  { %1717 = vst.msk [vmem:[#allocation3 + $0x8] sm:$0xff] %vm895_vm7, %v1709_v51  ;;  %1728 = vrot.lane.b32.xlu2 %v1726_v2, %s2079_s24  ;;  %v1724_v5 = vld [vmem:[#allocation3] sm:$0xf] }
 0x256   :  { %1361 = vst.msk [vmem:[#allocation2 + $0x74] sm:$0xf] %vm1353_vm6, %v965_v60  ;;  %v1390_v59 = vld [vmem:[#allocation2 + $0xa4] sm:$0xf] }
 0x257   :  { %1362 = vst.msk [vmem:[#allocation2 + $0x80] sm:$0xf] %vm1353_vm6, %v966_v17  ;;  %v1281_v47 = vpop.permute.xlu2 %1280  ;;  %v1392_v7 = vld [vmem:[#allocation2 + $0xb0] sm:$0xf] }
 0x258   :  { %1081 = vst.msk [vmem:[#allocation2 + $0xb4] sm:$0xf] %vm1069_vm15, %v1055_v28 }
 0x259   :  { %1194 = vst.msk [vmem:[#allocation2 + $0xb4] sm:$0xf] %vm1182_vm5, %v1168_v53 }
 0x25a   :  { %1259 = vst.msk [vmem:[#allocation2 + $0x7c] sm:$0xf] %vm1069_vm15, %v1055_v28  ;;  %v1386_v4 = vld [vmem:[#allocation2 + $0x8c] sm:$0xf] }
 0x25b   :  { %1080 = vst.msk [vmem:[#allocation2 + $0xa8] sm:$0xf] %vm1069_vm15, %v1053_v48 }
 0x25c   :  { %v1732_v3 = vld [vmem:[#allocation3 + $0x8] sm:$0xf]  ;;  %v1112_v56 = vpop.permute.xlu0 %1111  ;;  %v1051_v63 = vpop.permute.xlu1 %1050  ;;  %1258 = vst.msk [vmem:[#allocation2 + $0x70] sm:$0xf] %vm1069_vm15, %v1053_v48 }
 0x25d   :  { %1734 = vrot.lane.b32.xlu0 %v1732_v3, %s2080_s25  ;;  %1131 = vst.msk [vmem:[#allocation2 + $0xa8] sm:$0xf] %vm1122_vm1, %v1112_v56  ;;  %v1382_v58 = vld [vmem:[#allocation2 + $0x74] sm:$0xf] }
 0x25e   :  { %1297 = vst.msk [vmem:[#allocation2 + $0x70] sm:$0xf] %vm1122_vm1, %v1281_v47  ;;  %v1384_v11 = vld [vmem:[#allocation2 + $0x80] sm:$0xf] }
 0x25f   :  { %1079 = vst.msk [vmem:[#allocation2 + $0x9c] sm:$0xf] %vm1069_vm15, %v1051_v63  ;;  %v1164_v31 = vpop.permute.xlu2 %1163 }
 0x260   :  { %1257 = vst.msk [vmem:[#allocation2 + $0x64] sm:$0xf] %vm1069_vm15, %v1051_v63  ;;  %v1393_v24 = vld [vmem:[#allocation2 + $0xb4] sm:$0xff] }
 0x261   :  { %1130 = vst.msk [vmem:[#allocation2 + $0x9c] sm:$0xf] %vm1122_vm1, %v3131_v25  ;;  %v1388_v25 = vld [vmem:[#allocation2 + $0x98] sm:$0xf] }
 0x262   :  { %1464 = vst [vmem:[#allocation1 + $0x10] ss:$2 sm:$0xff] %v1380_v20 }
 0x263   :  { %1465 = vst [vmem:[#allocation1 + $0x11] ss:$2 sm:$0xff] %v1382_v58  ;;  %v1738_v58 = vld [vmem:[#allocation3 + $0xc] sm:$0xf] }
 0x264   :  { %v1247_v62 = vpop.permute.xlu0 %1246  ;;  %v1283_v13 = vpop.permute.xlu1 %1282  ;;  %1468 = vst [vmem:[#allocation1 + $0x30] ss:$2 sm:$0xff] %v1384_v11 }
 0x265   :  { %1262 = vst.msk [vmem:[#allocation2 + $0xac] sm:$0xf] %vm1069_vm15, %v1247_v62 }
 0x266   :  { %1469 = vst [vmem:[#allocation1 + $0x31] ss:$2 sm:$0xff] %v1386_v4 }
 0x267   :  { %1192 = vst.msk [vmem:[#allocation2 + $0x9c] sm:$0xf] %vm1182_vm5, %v1164_v31  ;;  %v1315_v10 = vpop.permute.xlu2 %1314 }
 0x268   :  { %1327 = vst.msk [vmem:[#allocation2 + $0x64] sm:$0xf] %vm1182_vm5, %v1164_v31 }
 0x269   :  { %1298 = vst.msk [vmem:[#allocation2 + $0x7c] sm:$0xf] %vm1122_vm1, %v1283_v13 }
 0x26a   :  { %1329 = vst.msk [vmem:[#allocation2 + $0x7c] sm:$0xf] %vm1182_vm5, %v1168_v53  ;;  %v1472_v0 = vld.sshfl [vmem:[#allocation1 + $0x10] sm:$0xff pattern:$0x75316420] }
 0x26b   :  { %1330 = vst.msk [vmem:[#allocation2 + $0x88] sm:$0xf] %vm1182_vm5, %v1315_v10  ;;  %v1837_v10 = vld [vmem:[%s3478_s1 + $0x1a8] sm:$0xff] }
 0x26c   :  { %v1166_v46 = vpop.permute.xlu1 %1165  ;;  %1478 = vst [vmem:[#allocation1 + $0x10] ss:$2 sm:$0xff] %v1388_v25  ;;  %v1838_v25 = vld [vmem:[%s3478_s1 + $0x1b0] sm:$0xff] }
 0x26d   :  { %v1475_v1 = vld.sshfl [vmem:[#allocation1 + $0x30] sm:$0xff pattern:$0x75316420]  ;;  %1479 = vst [vmem:[#allocation1 + $0x11] ss:$2 sm:$0xff] %v1390_v59  ;;  %v1894_v59 = vpack.c.bf16 %v1838_v25, %v1837_v10  ;;  %v1849_v25 = vld [vmem:[%s3478_s1 + $0x208] sm:$0xff] }
 0x26e   :  { %1482 = vst [vmem:[#allocation1 + $0x30] ss:$2 sm:$0xff] %v1392_v7  ;;  %v1522_v42 = vpack.c.bf16 %v1475_v1, %v1472_v0  ;;  %v1836_v7 = vld [vmem:[%s3478_s1 + $0x1a0] sm:$0xff] }
 0x26f   :  { %1483 = vst [vmem:[#allocation1 + $0x31] ss:$2 sm:$0xff] %v1394_v12  ;;  %v1379_v36 = vld [vmem:[#allocation2 + $0x60] sm:$0xff]  ;;  %v1243_v27 = vpop.permute.xlu2 %1242  ;;  %1921 = vmatpush.bf16.msra.mxu3 %v1894_v59  ;;  %v1847_v59 = vld [vmem:[%s3478_s1 + $0x1f8] sm:$0xff] }
 0x270   :  { %1993 = vmatmul.msk.bf16.gmra.mxu2 %vm3483_vm11, %v1522_v42  ;;  %1462 = vst [vmem:[#allocation1] ss:$2 sm:$0xff] %v1379_v36  ;;  %v1833_v42 = vld [vmem:[%s3478_s1 + $0x188] sm:$0xff]  ;;  %v1834_v36 = vld [vmem:[%s3478_s1 + $0x190] sm:$0xff] }
 0x271   :  { %v1383_v39 = vld [vmem:[#allocation2 + $0x78] sm:$0xff]  ;;  %1193 = vst.msk [vmem:[#allocation2 + $0xa8] sm:$0xf] %vm1182_vm5, %v1166_v46 }
 0x272   :  { %1466 = vst [vmem:[#allocation1 + $0x20] ss:$2 sm:$0xff] %v1383_v39  ;;  %v1385_v49 = vld [vmem:[#allocation2 + $0x84] sm:$0xff] }
 0x273   :  { %1467 = vst [vmem:[#allocation1 + $0x21] ss:$2 sm:$0xff] %v1385_v49 }
 0x274   :  { %v1049_v43 = vpop.permute.xlu1 %1048  ;;  %1328 = vst.msk [vmem:[#allocation2 + $0x70] sm:$0xf] %vm1182_vm5, %v1166_v46  ;;  %v1486_v22 = vld.sshfl [vmem:[#allocation1 + $0x10] sm:$0xff pattern:$0x75316420]  ;;  %v1835_v46 = vld [vmem:[%s3478_s1 + $0x198] sm:$0xff] }
 0x275   :  { %1260 = vst.msk [vmem:[#allocation2 + $0x94] sm:$0xf] %vm1069_vm15, %v1243_v27  ;;  %v1893_v12 = vpack.c.bf16 %v1836_v7, %v1835_v46  ;;  %v1850_v46 = vld [vmem:[%s3478_s1 + $0x210] sm:$0xff]  ;;  %v1848_v7 = vld [vmem:[%s3478_s1 + $0x200] sm:$0xff] }
 0x276   :  { %1078 = vst.msk [vmem:[#allocation2 + $0x90] sm:$0xf] %vm1069_vm15, %v1049_v43  ;;  %v1489_v21 = vld.sshfl [vmem:[#allocation1 + $0x30] sm:$0xff pattern:$0x75316420] }
 0x277   :  { %1129 = vst.msk [vmem:[#allocation2 + $0x90] sm:$0xf] %vm1122_vm1, %v3133_v37  ;;  %v1525_v45 = vpack.c.bf16 %v1489_v21, %v1486_v22  ;;  %1922 = vmatpush.bf16.msra.mxu3 %v1893_v12 }
 0x278   :  { %1725 = vst.msk [vmem:[#allocation4] sm:$0xf] %vm391_vm0, %v1724_v5  ;;  %v1391_v50 = vld [vmem:[#allocation2 + $0xa8] sm:$0xff] }
 0x27a   :  { %v1473_v52 = vld.sshfl [vmem:[#allocation1 + $0x20] sm:$0xff pattern:$0x75316420]  ;;  %v1474_v14 = vld.sshfl [vmem:[#allocation1 + $0x28] sm:$0xff pattern:$0x75316420] }
 0x27b   :  { %v1381_v15 = vld [vmem:[#allocation2 + $0x6c] sm:$0xff]  ;;  %1480 = vst [vmem:[#allocation1 + $0x20] ss:$2 sm:$0xff] %v1391_v50 }
 0x27c   :  { %v1245_v9 = vpop.permute.xlu1 %1244  ;;  %1463 = vst [vmem:[#allocation1 + $0x1] ss:$2 sm:$0xff] %v1381_v15  ;;  %v1832_v15 = vld [vmem:[%s3478_s1 + $0x180] sm:$0xff] }
 0x27d   :  { %1261 = vst.msk [vmem:[#allocation2 + $0xa0] sm:$0xf] %vm1069_vm15, %v1245_v9 }
 0x27e   :  { %1481 = vst [vmem:[#allocation1 + $0x21] ss:$2 sm:$0xff] %v1393_v24  ;;  %v1387_v35 = vld [vmem:[#allocation2 + $0x90] sm:$0xff]  ;;  %v1829_v24 = vld [vmem:[%s3478_s1 + $0x168] sm:$0xff] }
 0x280   :  { %1994 = vmatmul.msk.bf16.gmra.mxu2 %vm3484_vm12, %v1525_v45  ;;  %v1830_v45 = vld [vmem:[%s3478_s1 + $0x170] sm:$0xff] }
 0x283   :  { %v1470_v30 = vld.sshfl [vmem:[#allocation1] sm:$0xff pattern:$0x75316420]  ;;  %v1471_v19 = vld.sshfl [vmem:[#allocation1 + $0x8] sm:$0xff pattern:$0x75316420] }
 0x284   :  { %v1389_v37 = vld [vmem:[#allocation2 + $0x9c] sm:$0xff]  ;;  %v1520_v34 = vpack.c.bf16 %v1473_v52, %v1470_v30  ;;  %1476 = vst [vmem:[#allocation1] ss:$2 sm:$0xff] %v1387_v35  ;;  %v1521_v6 = vpack.c.bf16 %v1474_v14, %v1471_v19  ;;  %v1892_v52 = vpack.c.bf16 %v1834_v36, %v1833_v42  ;;  %v1831_v14 = vld [vmem:[%s3478_s1 + $0x178] sm:$0xff] }
 0x285   :  { %1477 = vst [vmem:[#allocation1 + $0x1] ss:$2 sm:$0xff] %v1389_v37  ;;  %v1487_v16 = vld.sshfl [vmem:[#allocation1 + $0x20] sm:$0xff pattern:$0x75316420]  ;;  %v1891_v22 = vpack.c.bf16 %v1832_v15, %v1831_v14 }
 0x286   :  { %1623 = vmatmul.bf16.gmra.mxu0 %v1520_v34  ;;  %1652 = vmatmul.bf16.gmra.mxu1 %v1521_v6  ;;  %v1488_v23 = vld.sshfl [vmem:[#allocation1 + $0x28] sm:$0xff pattern:$0x75316420] }
 0x287   :  { %1923 = vmatpush.bf16.msra.mxu3 %v1892_v52  ;;  %v1844_v52 = vld [vmem:[%s3478_s1 + $0x1e0] sm:$0xff] }
 0x28b   :  { %1924 = vmatpush.bf16.msra.mxu3 %v1891_v22 }
 0x28c   :  { %v1484_v29 = vld.sshfl [vmem:[#allocation1] sm:$0xff pattern:$0x75316420]  ;;  %v1485_v55 = vld.sshfl [vmem:[#allocation1 + $0x8] sm:$0xff pattern:$0x75316420] }
 0x28d   :  { %v1523_v18 = vpack.c.bf16 %v1487_v16, %v1484_v29  ;;  %v1524_v54 = vpack.c.bf16 %v1488_v23, %v1485_v55  ;;  %v1890_v29 = vpack.c.bf16 %v1830_v45, %v1829_v24  ;;  %v1827_v16 = vld [vmem:[%s3478_s1 + $0x158] sm:$0xff]  ;;  %v1828_v23 = vld [vmem:[%s3478_s1 + $0x160] sm:$0xff] }
 0x28e   :  { %v1839_v24 = vld [vmem:[%s3478_s1 + $0x1b8] sm:$0xff]  ;;  %v1840_v45 = vld [vmem:[%s3478_s1 + $0x1c0] sm:$0xff] }
 0x28f   :  { %1925 = vmatpush.bf16.msra.mxu3 %v1890_v29  ;;  %v1870_v29 = vld [vmem:[%s3478_s1 + $0x2b0] sm:$0xff] }
 0x296   :  { %1628 = vmatmul.bf16.gmra.mxu0 %v1523_v18  ;;  %1657 = vmatmul.bf16.gmra.mxu1 %v1524_v54  ;;  %v1677_v41 = vpop.f32.mrf.mxu2 }
 0x29e   :  { %v1679_v2 = vpop.f32.mrf.mxu2 }
 0x2a2   :  { %v1619_v61 = vpop.f32.mrf.mxu0  ;;  %v1648_v40 = vpop.f32.mrf.mxu1 }
 0x2a3   :  { %v1620_v32 = vadd.f32 %v3174_v8, %v1619_v61 }
 0x2a5   :  { %v1649_v44 = vadd.f32 %v1648_v40, %v1620_v32  ;;  %v1889_v40 = vpack.c.bf16 %v1828_v23, %v1827_v16  ;;  %v1825_v32 = vld [vmem:[%s3478_s1 + $0x148] sm:$0xff]  ;;  %v1868_v23 = vld [vmem:[%s3478_s1 + $0x2a0] sm:$0xff] }
 0x2a7   :  { %v1678_v60 = vadd.f32 %v1677_v41, %v1649_v44  ;;  %v1826_v41 = vld [vmem:[%s3478_s1 + $0x150] sm:$0xff]  ;;  %1926 = vmatpush.bf16.msra.mxu3 %v1889_v40  ;;  %v1883_v40 = vld [vmem:[%s3478_s1 + $0x318] sm:$0xff] }
 0x2a9   :  { %vm1694_vm8 = vcmp.gt.f32.partialorder %v1678_v60, 0.0  ;;  %v1702_v33 = vmul.f32 0.2, %v1678_v60 }
 0x2aa   :  { %v1621_v17 = vpop.f32.mrf.mxu0  ;;  %v1650_v26 = vpop.f32.mrf.mxu1 }
 0x2ab   :  { %v1710_v38 = vsel %vm1694_vm8, %v1678_v60, %v1702_v33  ;;  %v1622_v57 = vadd.f32 %v3174_v8, %v1621_v17 }
 0x2ac   :  { %1718 = vst.msk [vmem:[#allocation3 + $0x10] sm:$0xff] %vm895_vm7, %v1710_v38 }
 0x2ad   :  { %v1651_v51 = vadd.f32 %v1650_v26, %v1622_v57  ;;  %v1888_v57 = vpack.c.bf16 %v1826_v41, %v1825_v32  ;;  %v1884_v41 = vld [vmem:[%s3478_s1 + $0x320] sm:$0xff] }
 0x2af   :  { %v1729_v28 = vpop.permute.xlu2 %1728  ;;  %v1680_v53 = vadd.f32 %v1679_v2, %v1651_v51  ;;  %v1823_v51 = vld [vmem:[%s3478_s1 + $0x138] sm:$0xff]  ;;  %1927 = vmatpush.bf16.msra.mxu3 %v1888_v57  ;;  %v1864_v57 = vld [vmem:[%s3478_s1 + $0x280] sm:$0xff] }
 0x2b0   :  { %1731 = vst.msk [vmem:[#allocation4] sm:$0xf] %vm1069_vm15, %v1729_v28  ;;  %v1824_v28 = vld [vmem:[%s3478_s1 + $0x140] sm:$0xff] }
 0x2b1   :  { %vm1695_vm13 = vcmp.gt.f32.partialorder %v1680_v53, 0.0  ;;  %v1703_v48 = vmul.f32 0.2, %v1680_v53 }
 0x2b3   :  { %v1711_v47 = vsel %vm1695_vm13, %v1680_v53, %v1703_v48  ;;  %v1746_v3 = vld [vmem:[#allocation3 + $0x14] sm:$0xf]  ;;  %v1744_v20 = vld [vmem:[#allocation3 + $0x10] sm:$0xf]  ;;  %v1854_v53 = vld [vmem:[%s3478_s1 + $0x230] sm:$0xff] }
 0x2b4   :  { %1719 = vst.msk [vmem:[#allocation3 + $0x18] sm:$0xff] %vm895_vm7, %v1711_v47  ;;  %1748 = vrot.lane.b32.xlu1 %v1746_v3, %s2079_s24  ;;  %v1887_v3 = vpack.c.bf16 %v1824_v28, %v1823_v51  ;;  %v1882_v28 = vld [vmem:[%s3478_s1 + $0x310] sm:$0xff] }
 0x2b5   :  { %1745 = vst.msk [vmem:[#allocation4 + $0x4] sm:$0xf] %vm391_vm0, %v1744_v20  ;;  %v1851_v20 = vld [vmem:[%s3478_s1 + $0x218] sm:$0xff] }
 0x2b6   :  { %1928 = vmatpush.bf16.msra.mxu3 %v1887_v3 }
 0x2bb   :  { %v1758_v56 = vld [vmem:[#allocation3 + $0x1c] sm:$0xf]  ;;  %v1752_v63 = vld [vmem:[#allocation3 + $0x18] sm:$0xf] }
 0x2bc   :  { %1760 = vrot.lane.b32.xlu0 %v1758_v56, %s2082_s26  ;;  %1754 = vrot.lane.b32.xlu2 %v1752_v63, %s2080_s25 }
 0x2bd   :  { %1740 = vrot.lane.b32.xlu1 %v1738_v58, %s2082_s26  ;;  %v1852_v58 = vld [vmem:[%s3478_s1 + $0x220] sm:$0xff] }
 0x2cf   :  { %v1735_v31 = vpop.permute.xlu0 %1734 }
 0x2d0   :  { %1737 = vst.msk [vmem:[#allocation4] sm:$0xf] %vm1122_vm1, %v1735_v31 }
 0x2f3   :  { %v1682_v62 = vpop.f32.mrf.mxu2 }
 0x2fb   :  { %v1684_v49 = vpop.f32.mrf.mxu2 }
 0x303   :  { %v1624_v11 = vpop.f32.mrf.mxu0  ;;  %v1653_v4 = vpop.f32.mrf.mxu1 }
 0x304   :  { %v1625_v13 = vadd.f32 %v3174_v8, %v1624_v11  ;;  %v1687_v55 = vpop.f32.mrf.mxu2 }
 0x306   :  { %v1654_v0 = vadd.f32 %v1653_v4, %v1625_v13  ;;  %v1901_v13 = vpack.c.bf16 %v1852_v58, %v1851_v20  ;;  %v1859_v20 = vld [vmem:[%s3478_s1 + $0x258] sm:$0xff]  ;;  %v1860_v58 = vld [vmem:[%s3478_s1 + $0x260] sm:$0xff] }
 0x308   :  { %v1683_v1 = vadd.f32 %v1682_v62, %v1654_v0  ;;  %v1900_v0 = vpack.c.bf16 %v1850_v46, %v1849_v25  ;;  %v1875_v25 = vld [vmem:[%s3478_s1 + $0x2d8] sm:$0xff] }
 0x30a   :  { %vm1696_vm14 = vcmp.gt.f32.partialorder %v1683_v1, 0.0  ;;  %v1704_v39 = vmul.f32 0.2, %v1683_v1 }
 0x30b   :  { %v1626_v27 = vpop.f32.mrf.mxu0  ;;  %v1655_v9 = vpop.f32.mrf.mxu1 }
 0x30c   :  { %v1712_v43 = vsel %vm1696_vm14, %v1683_v1, %v1704_v39  ;;  %v1627_v5 = vadd.f32 %v3174_v8, %v1626_v27  ;;  %v1689_v48 = vpop.f32.mrf.mxu2  ;;  %v1845_v27 = vld [vmem:[%s3478_s1 + $0x1e8] sm:$0xff] }
 0x30d   :  { %1720 = vst.msk [vmem:[#allocation3 + $0x20] sm:$0xff] %vm895_vm7, %v1712_v43  ;;  %v1846_v43 = vld [vmem:[%s3478_s1 + $0x1f0] sm:$0xff] }
 0x30e   :  { %v1656_v21 = vadd.f32 %v1655_v9, %v1627_v5  ;;  %v1898_v5 = vpack.c.bf16 %v1846_v43, %v1845_v27  ;;  %v1843_v9 = vld [vmem:[%s3478_s1 + $0x1d8] sm:$0xff]  ;;  %v1872_v27 = vld [vmem:[%s3478_s1 + $0x2c0] sm:$0xff] }
 0x30f   :  { %v1897_v15 = vpack.c.bf16 %v1844_v52, %v1843_v9 }
 0x310   :  { %v1685_v50 = vadd.f32 %v1684_v49, %v1656_v21  ;;  %v1899_v49 = vpack.c.bf16 %v1848_v7, %v1847_v59  ;;  %v1841_v21 = vld [vmem:[%s3478_s1 + $0x1c8] sm:$0xff]  ;;  %v1855_v59 = vld [vmem:[%s3478_s1 + $0x238] sm:$0xff]  ;;  %v1856_v7 = vld [vmem:[%s3478_s1 + $0x240] sm:$0xff] }
 0x312   :  { %vm1697_vm6 = vcmp.gt.f32.partialorder %v1685_v50, 0.0  ;;  %v1705_v35 = vmul.f32 0.2, %v1685_v50 }
 0x313   :  { %v1629_v37 = vpop.f32.mrf.mxu0  ;;  %v1658_v34 = vpop.f32.mrf.mxu1 }
 0x314   :  { %v1713_v30 = vsel %vm1697_vm6, %v1685_v50, %v1705_v35  ;;  %v1630_v19 = vadd.f32 %v3174_v8, %v1629_v37  ;;  %v1766_v6 = vld [vmem:[#allocation3 + $0x24] sm:$0xf]  ;;  %v1764_v18 = vld [vmem:[#allocation3 + $0x20] sm:$0xf]  ;;  %v1842_v50 = vld [vmem:[%s3478_s1 + $0x1d0] sm:$0xff]  ;;  %v1895_v37 = vpack.c.bf16 %v1840_v45, %v1839_v24 }
 0x315   :  { %1721 = vst.msk [vmem:[#allocation3 + $0x28] sm:$0xff] %vm895_vm7, %v1713_v30  ;;  %1768 = vrot.lane.b32.xlu2 %v1766_v6, %s2079_s24  ;;  %v1896_v22 = vpack.c.bf16 %v1842_v50, %v1841_v21  ;;  %v1869_v6 = vld [vmem:[%s3478_s1 + $0x2a8] sm:$0xff] }
 0x316   :  { %v1659_v54 = vadd.f32 %v1658_v34, %v1630_v19  ;;  %1765 = vst.msk [vmem:[#allocation4 + $0x8] sm:$0xf] %vm391_vm0, %v1764_v18  ;;  %v1755_v10 = vpop.permute.xlu2 %1754  ;;  %v1910_v16 = vpack.c.bf16 %v1870_v29, %v1869_v6  ;;  %v1885_v18 = vld [vmem:[%s3478_s1 + $0x328] sm:$0xff] }
 0x318   :  { %v1688_v61 = vadd.f32 %v1687_v55, %v1659_v54  ;;  %v1867_v55 = vld [vmem:[%s3478_s1 + $0x298] sm:$0xff]  ;;  %v1886_v54 = vld [vmem:[%s3478_s1 + $0x330] sm:$0xff]  ;;  %1947 = vmatpush.bf16.msrb.mxu2 %v1910_v16 }
 0x319   :  { %v1909_v32 = vpack.c.bf16 %v1868_v23, %v1867_v55 }
 0x31a   :  { %vm1698_vm3 = vcmp.gt.f32.partialorder %v1688_v61, 0.0  ;;  %v1706_v44 = vmul.f32 0.2, %v1688_v61 }
 0x31b   :  { %v1631_v60 = vpop.f32.mrf.mxu0  ;;  %v1660_v26 = vpop.f32.mrf.mxu1 }
 0x31c   :  { %v1714_v33 = vsel %vm1698_vm3, %v1688_v61, %v1706_v44  ;;  %v1632_v17 = vadd.f32 %v3174_v8, %v1631_v60  ;;  %v1772_v38 = vld [vmem:[#allocation3 + $0x28] sm:$0xf]  ;;  %v1853_v8 = vld [vmem:[%s3478_s1 + $0x228] sm:$0xff]  ;;  %v1778_v42 = vld [vmem:[#allocation3 + $0x2c] sm:$0xf]  ;;  %v1918_v61 = vpack.c.bf16 %v1886_v54, %v1885_v18  ;;  %1948 = vmatpush.bf16.msrb.mxu2 %v1909_v32 }
 0x31d   :  { %1722 = vst.msk [vmem:[#allocation3 + $0x30] sm:$0xff] %vm895_vm7, %v1714_v33  ;;  %1774 = vrot.lane.b32.xlu0 %v1772_v38, %s2080_s25  ;;  %v1902_v56 = vpack.c.bf16 %v1854_v53, %v1853_v8  ;;  %v1865_v44 = vld [vmem:[%s3478_s1 + $0x288] sm:$0xff]  ;;  %v1866_v60 = vld [vmem:[%s3478_s1 + $0x290] sm:$0xff]  ;;  %v1917_v33 = vpack.c.bf16 %v1884_v41, %v1883_v40  ;;  %v1863_v38 = vld [vmem:[%s3478_s1 + $0x278] sm:$0xff] }
 0x31e   :  { %v1661_v2 = vadd.f32 %v1660_v26, %v1632_v17  ;;  %1960 = vmatpush.bf16.msrb.mxu0 %v1918_v61  ;;  %v1908_v17 = vpack.c.bf16 %v1866_v60, %v1865_v44  ;;  %v1881_v26 = vld [vmem:[%s3478_s1 + $0x308] sm:$0xff]  ;;  %v1907_v51 = vpack.c.bf16 %v1864_v57, %v1863_v38  ;;  %v2036_v61 = vld [vmem:[%s3479_s2 + $0x3] ss:$0 sm:$0xff] }
 0x31f   :  { %1934 = vmatpush.bf16.msrb.mxu3 %v1902_v56  ;;  %v1861_v53 = vld [vmem:[%s3478_s1 + $0x268] sm:$0xff]  ;;  %v1880_v56 = vld [vmem:[%s3478_s1 + $0x300] sm:$0xff] }
 0x320   :  { %v1690_v47 = vadd.f32 %v1689_v48, %v1661_v2  ;;  %1949 = vmatpush.bf16.msrb.mxu2 %v1908_v17  ;;  %v1916_v2 = vpack.c.bf16 %v1882_v28, %v1881_v26  ;;  %v1862_v48 = vld [vmem:[%s3478_s1 + $0x270] sm:$0xff] }
 0x321   :  { %v1906_v3 = vpack.c.bf16 %v1862_v48, %v1861_v53 }
 0x322   :  { %vm1699_vm2 = vcmp.gt.f32.partialorder %v1690_v47, 0.0  ;;  %v1707_v63 = vmul.f32 0.2, %v1690_v47  ;;  %1961 = vmatpush.bf16.msrb.mxu0 %v1917_v33  ;;  %v2037_v33 = vld [vmem:[%s3479_s2 + $0x4] ss:$0 sm:$0xff] }
 0x323   :  { %1935 = vmatpush.bf16.msrb.mxu3 %v1901_v13 }
 0x324   :  { %v1715_v31 = vsel %vm1699_vm2, %v1690_v47, %v1707_v63  ;;  %v1786_v62 = vld [vmem:[#allocation3 + $0x34] sm:$0xf]  ;;  %v1784_v4 = vld [vmem:[#allocation3 + $0x30] sm:$0xf]  ;;  %1950 = vmatpush.bf16.msrb.mxu2 %v1907_v51 }
 0x325   :  { %1723 = vst.msk [vmem:[#allocation3 + $0x38] sm:$0xff] %vm895_vm7, %v1715_v31  ;;  %1788 = vrot.lane.b32.xlu1 %v1786_v62, %s2079_s24  ;;  %v1879_v47 = vld [vmem:[%s3478_s1 + $0x2f8] sm:$0xff]  ;;  %v1877_v31 = vld [vmem:[%s3478_s1 + $0x2e8] sm:$0xff]  ;;  %v1905_v62 = vpack.c.bf16 %v1860_v58, %v1859_v20 }
 0x326   :  { %v1749_v11 = vpop.permute.xlu1 %1748  ;;  %1785 = vst.msk [vmem:[#allocation4 + $0xc] sm:$0xf] %vm391_vm0, %v1784_v4  ;;  %1962 = vmatpush.bf16.msrb.mxu0 %v1916_v2  ;;  %v1915_v63 = vpack.c.bf16 %v1880_v56, %v1879_v47  ;;  %v1857_v4 = vld [vmem:[%s3478_s1 + $0x248] sm:$0xff] }
 0x327   :  { %1751 = vst.msk [vmem:[#allocation4 + $0x4] sm:$0xf] %vm1069_vm15, %v1749_v11  ;;  %1936 = vmatpush.bf16.msrb.mxu3 %v1900_v0  ;;  %v1878_v11 = vld [vmem:[%s3478_s1 + $0x2f0] sm:$0xff]  ;;  %v1876_v0 = vld [vmem:[%s3478_s1 + $0x2e0] sm:$0xff] }
 0x328   :  { %1757 = vst.msk [vmem:[#allocation4 + $0x4] sm:$0xf] %vm1122_vm1, %v1755_v10  ;;  %1951 = vmatpush.bf16.msrb.mxu2 %v1906_v3  ;;  %v1914_v13 = vpack.c.bf16 %v1878_v11, %v1877_v31  ;;  %v1858_v10 = vld [vmem:[%s3478_s1 + $0x250] sm:$0xff] }
 0x329   :  { %v1904_v46 = vpack.c.bf16 %v1858_v10, %v1857_v4 }
 0x32a   :  { %1963 = vmatpush.bf16.msrb.mxu0 %v1915_v63 }
 0x32b   :  { %1937 = vmatpush.bf16.msrb.mxu3 %v1899_v49  ;;  %v1871_v49 = vld [vmem:[%s3478_s1 + $0x2b8] sm:$0xff] }
 0x32c   :  { %v1798_v1 = vld [vmem:[#allocation3 + $0x3c] sm:$0xf]  ;;  %v1792_v12 = vld [vmem:[#allocation3 + $0x38] sm:$0xf]  ;;  %1952 = vmatpush.bf16.msrb.mxu2 %v1905_v62 }
 0x32d   :  { %1800 = vrot.lane.b32.xlu0 %v1798_v1, %s2082_s26  ;;  %1794 = vrot.lane.b32.xlu2 %v1792_v12, %s2080_s25  ;;  %v1913_v1 = vpack.c.bf16 %v1876_v0, %v1875_v25  ;;  %v1873_v12 = vld [vmem:[%s3478_s1 + $0x2c8] sm:$0xff] }
 0x32e   :  { %v1761_v36 = vpop.permute.xlu0 %1760  ;;  %1780 = vrot.lane.b32.xlu1 %v1778_v42, %s2082_s26  ;;  %1964 = vmatpush.bf16.msrb.mxu0 %v1914_v13  ;;  %v1874_v42 = vld [vmem:[%s3478_s1 + $0x2d0] sm:$0xff] }
 0x32f   :  { %v1741_v39 = vpop.permute.xlu1 %1740  ;;  %1763 = vst.msk [vmem:[#allocation4 + $0x4] sm:$0xf] %vm1182_vm5, %v1761_v36  ;;  %1938 = vmatpush.bf16.msrb.mxu3 %v1898_v5  ;;  %v1903_v36 = vpack.c.bf16 %v1856_v7, %v1855_v59  ;;  %v1911_v5 = vpack.c.bf16 %v1872_v27, %v1871_v49 }
 0x330   :  { %1743 = vst.msk [vmem:[#allocation4] sm:$0xf] %vm1182_vm5, %v1741_v39  ;;  %1953 = vmatpush.bf16.msrb.mxu2 %v1904_v46  ;;  %v1912_v39 = vpack.c.bf16 %v1874_v42, %v1873_v12 }
 0x332   :  { %1965 = vmatpush.bf16.msrb.mxu0 %v1913_v1 }
 0x333   :  { %1939 = vmatpush.bf16.msrb.mxu3 %v1897_v15 }
 0x334   :  { %1954 = vmatpush.bf16.msrb.mxu2 %v1903_v36 }
 0x336   :  { %1966 = vmatpush.bf16.msrb.mxu0 %v1912_v39 }
 0x337   :  { %v1804_v14 = vld [vmem:[#allocation4] sm:$0xff]  ;;  %1940 = vmatpush.bf16.msrb.mxu3 %v1896_v22 }
 0x338   :  { %1808 = vst [vmem:[#allocation1] ss:$2 sm:$0xff] %v1804_v14 }
 0x33a   :  { %1967 = vmatpush.bf16.msrb.mxu0 %v1911_v5 }
 0x33b   :  { %1941 = vmatpush.bf16.msrb.mxu3 %v1895_v37 }
 0x33f   :  { %v1811_v35 = vld.sshfl [vmem:[#allocation1] sm:$0xff pattern:$0x75316420]  ;;  %v1812_v19 = vld.sshfl [vmem:[#allocation1 + $0x8] sm:$0xff pattern:$0x75316420] }
 0x340   :  { %v1819_v30 = vpack.c.bf16 %v1811_v35, %v1811_v35  ;;  %v1820_v34 = vpack.c.bf16 %v1812_v19, %v1812_v19 }
 0x342   :  { %1929 = vmatmul.bf16.vlgmr.msra.gmra.mxu3 %v1819_v30  ;;  %v2035_v30 = vld [vmem:[%s3479_s2 + $0x2] ss:$0 sm:$0xff] }
 0x352   :  { %1942 = vmatmul.bf16.vlgmr.msrb.gmra.mxu3 %v1820_v34 }
 0x36f   :  { %v1769_v8 = vpop.permute.xlu2 %1768 }
 0x370   :  { %1771 = vst.msk [vmem:[#allocation4 + $0x8] sm:$0xf] %vm1069_vm15, %v1769_v8 }
 0x387   :  { %v1795_v52 = vpop.permute.xlu2 %1794 }
 0x38f   :  { %v1775_v43 = vpop.permute.xlu0 %1774 }
 0x390   :  { %1777 = vst.msk [vmem:[#allocation4 + $0x8] sm:$0xf] %vm1122_vm1, %v1775_v43 }
 0x397   :  { %v1789_v9 = vpop.permute.xlu1 %1788 }
 0x398   :  { %1791 = vst.msk [vmem:[#allocation4 + $0xc] sm:$0xf] %vm1069_vm15, %v1789_v9  ;;  %vm1985_vm15 = vcmask 3072  }
 0x399   :  { %1797 = vst.msk [vmem:[#allocation4 + $0xc] sm:$0xf] %vm1122_vm1, %v1795_v52 }
 0x39f   :  { %v1801_v14 = vpop.permute.xlu0 %1800 }
 0x3a0   :  { %v1781_v15 = vpop.permute.xlu1 %1780  ;;  %1803 = vst.msk [vmem:[#allocation4 + $0xc] sm:$0xf] %vm1182_vm5, %v1801_v14 }
 0x3a1   :  { %1783 = vst.msk [vmem:[#allocation4 + $0x8] sm:$0xf] %vm1182_vm5, %v1781_v15 }
 0x3a8   :  { %v1805_v21 = vld [vmem:[#allocation4 + $0x8] sm:$0xff] }
 0x3a9   :  { %1810 = vst [vmem:[#allocation1 + $0x10] ss:$2 sm:$0xff] %v1805_v21 }
 0x3b0   :  { %v1813_v50 = vld.sshfl [vmem:[#allocation1 + $0x10] sm:$0xff pattern:$0x75316420]  ;;  %v1814_v22 = vld.sshfl [vmem:[#allocation1 + $0x18] sm:$0xff pattern:$0x75316420] }
 0x3b1   :  { %v1821_v24 = vpack.c.bf16 %v1813_v50, %v1813_v50  ;;  %v1822_v45 = vpack.c.bf16 %v1814_v22, %v1814_v22 }
 0x3b3   :  { %1955 = vmatmul.bf16.vlgmr.msrb.gmra.mxu2 %v1821_v24  ;;  %1968 = vmatmul.bf16.vlgmr.msrb.gmra.mxu0 %v1822_v45 }
 0x3c5   :  { %v1930_v35 = vpop.f32.mrf.mxu3 }
 0x3c6   :  { %v1931_v19 = vadd.f32 %v2035_v30, %v1930_v35 }
 0x3cd   :  { %v1932_v37 = vpop.f32.mrf.mxu3 }
 0x3d5   :  { %v1943_v34 = vpop.f32.mrf.mxu3 }
 0x3d6   :  { %v1944_v6 = vadd.f32 %v1943_v34, %v1931_v19 }
 0x3dd   :  { %v1945_v29 = vpop.f32.mrf.mxu3 }
 0x430   :  { %v1969_v55 = vpop.f32.mrf.mxu0 }
 0x436   :  { %v1956_v16 = vpop.f32.mrf.mxu2 }
 0x437   :  { %v1957_v23 = vadd.f32 %v1956_v16, %v1944_v6 }
 0x438   :  { %v1971_v18 = vpop.f32.mrf.mxu0 }
 0x439   :  { %v1970_v54 = vadd.f32 %v1969_v55, %v1957_v23 }
 0x43b   :  { %v1974_v40 = vmul.f32 0.2, %v1970_v54  ;;  %vm1973_vm7 = vcmp.gt.f32.partialorder %v1970_v54, 0.0 }
 0x43d   :  { %v1975_v32 = vsel %vm1973_vm7, %v1970_v54, %v1974_v40 }
 0x43e   :  { %v1958_v41 = vpop.f32.mrf.mxu2  ;;  %v1978_v44 = vmul.f32 %v2036_v61, %v1975_v32 }
 0x440   :  { %v1979_v60 = vsel %vm391_vm0, %v1978_v44, 0.0 }
 0x441   :  { %1980 = vadd.xlane.f32.xlu2 %v1979_v60 }
 0x4b4   :  { %v1981_v17 = vpop.xlane.xlu2 %1980 }
 0x4b5   :  { %v1984_v38 = vadd.f32 %v2037_v33, %v1981_v17 }
 0x4b7   :  { %1986 = vst.msk [vmem:[%s3480_s3] sm:$0xf] %vm1985_vm15, %v1984_v38 }

</bundles_post_ra>
